<compile_context>
chip_gen: v7x
topology: tpu7x:2x2x1
jax: 0.10.0
libtpu: 0.0.40
codegen_flags: <defaults>
</compile_context>

<pallas_src>
import jax
import jax.numpy as jnp
from jax.experimental import pallas as pl
from jax.experimental.pallas import tpu as pltpu


# ------------------------------ fused kernel -------------------------------

def _lenet_kernel(xe_ref, xo_ref, w1_ref, b1_ref, w2_ref, b2_ref,
                  w3_ref, b3_ref, wf1_ref, bf1_ref, wf2_ref, bf2_ref,
                  out_ref, s1_ref, a2_ref):
    """Fused LeNet forward for TB samples, entirely in VMEM.

    Row layout is sample-major with fixed per-sample row strides:
      xe/xo : (TB*14, 5*32*C)   im2col for even/odd conv1 output rows
      s1    : (TB*14, 28*6)     pool1 row-sums (rows b*14+i', i'=0..13, all valid)
      a2    : (TB*14-4, 10*16)  conv2 act; rows b*14+i2 valid for i2<=9, rest garbage
      logits: (TB*14-13, 128)   conv3/fc output; only rows b*14 are real samples
    """
    f32 = jnp.float32
    bf16 = jnp.bfloat16
    tb = out_ref.shape[0]
    r1 = tb * 14          # pool1 rows per step (14 per sample, all valid)
    r2 = r1 - 4           # conv2 rows: last shifted-window start is 4 rows earlier
    r3 = r1 - 13          # conv3 rows: row b*14 holds sample b's 1x1x120 output

    # ---- conv1 + tanh for even / odd output rows (two K=5*32*C dots).
    #      pool1's row pairing is simply the sum of the two results; its lane
    #      pairing and the 0.25 factor are folded into w2.
    z1e = jnp.dot(xe_ref[...], w1_ref[...], preferred_element_type=f32)
    z1o = jnp.dot(xo_ref[...], w1_ref[...], preferred_element_type=f32)
    s1_ref[...] = jnp.tanh(z1e + b1_ref[...]) + jnp.tanh(z1o + b1_ref[...])

    # ---- conv2 + tanh: 5 row-shifted dots, K = 28*6 = 168 (avgpool1 folded in).
    acc2 = jnp.zeros((r2, 160), f32)
    for di in range(5):
        acc2 = acc2 + jnp.dot(s1_ref[pl.ds(di, r2), :].astype(bf16), w2_ref[di],
                              preferred_element_type=f32)
    a2_ref[...] = jnp.tanh(acc2 + b2_ref[...])

    # ---- conv3 + tanh: 5 row-pair-shifted dots, K = 10*16 = 160 (avgpool2 folded).
    acc3 = jnp.zeros((r3, 120), f32)
    for m in range(5):
        pair = a2_ref[pl.ds(2 * m, r3), :] + a2_ref[pl.ds(2 * m + 1, r3), :]
        acc3 = acc3 + jnp.dot(pair.astype(bf16), w3_ref[m],
                              preferred_element_type=f32)
    h3 = jnp.tanh(acc3 + b3_ref[...])

    # ---- fc1 + tanh, fc2.  Applied to all r3 rows (only tb of them matter);
    #      the extra rows cost ~30 MXU cycles and avoid a strided row gather.
    h4 = jnp.tanh(jnp.dot(h3.astype(bf16), wf1_ref[...],
                          preferred_element_type=f32) + bf1_ref[...])
    logits = jnp.dot(h4.astype(bf16), wf2_ref[...],
                     preferred_element_type=f32) + bf2_ref[...]

    # ---- valid sample rows are b*14 -> one lane-dense (1, 128) row per sample.
    for b in range(tb):
        out_ref[pl.ds(b, 1), :] = logits[b * 14:b * 14 + 1, :]


# --------------------------- parameter preparation --------------------------

def prepare_lenet_params(params, out_features):
    """One-time re-layout: width-Toeplitz conv weights (taps folded into K),
    avgpool lane-pairing and 0.25 folded into the next conv, bf16 weights."""
    assert out_features <= 128, "fc2 output is padded to 128 lanes"
    f32, bf16 = jnp.float32, jnp.bfloat16
    C = params["w1"].shape[1]

    # conv1: W1[(di, w, c), (j, f)] = w1[f, c, di, w - j]  for 0 <= w - j < 5
    w1t = jnp.transpose(params["w1"], (2, 3, 1, 0))            # (di, dj, c, f)
    T1 = jnp.zeros((5, 32, C, 28, 6), f32)
    for j in range(28):
        T1 = T1.at[:, j:j + 5, :, j, :].set(w1t)
    W1 = T1.reshape(5 * 32 * C, 28 * 6)

    # conv2 (avgpool1 folded): W2[di][(j, c), (j2, f)] = 0.25*w2[f, c, di, j//2 - j2]
    w2t = jnp.transpose(params["w2"], (2, 3, 1, 0))            # (di, dj, c, f)
    T2 = jnp.zeros((5, 28, 6, 10, 16), f32)
    for j2 in range(10):
        for dj in range(5):
            T2 = T2.at[:, 2 * (j2 + dj), :, j2, :].set(0.25 * w2t[:, dj])
            T2 = T2.at[:, 2 * (j2 + dj) + 1, :, j2, :].set(0.25 * w2t[:, dj])
    W2 = T2.reshape(5, 28 * 6, 10 * 16)

    # conv3 (avgpool2 folded): W3[m][(j2, c), f3] = 0.25 * w3[f3, c, m, j2 // 2]
    w3t = jnp.transpose(params["w3"], (2, 3, 1, 0))            # (di, dj, c, f3)
    W3 = (0.25 * w3t[:, jnp.arange(10) // 2]).reshape(5, 10 * 16, 120)

    wf2 = jnp.zeros((84, 128), f32).at[:, :out_features].set(params["wf2"].T)
    bf2 = jnp.zeros((1, 128), f32).at[0, :out_features].set(params["bf2"])

    return {
        "w1": W1.astype(bf16), "b1": jnp.tile(params["b1"], 28).reshape(1, -1),
        "w2": W2.astype(bf16), "b2": jnp.tile(params["b2"], 10).reshape(1, -1),
        "w3": W3.astype(bf16), "b3": params["b3"].reshape(1, -1),
        "wf1": params["wf1"].T.astype(bf16), "bf1": params["bf1"].reshape(1, -1),
        "wf2": wf2.astype(bf16), "bf2": bf2,
    }


# ------------------------------ forward wrapper -----------------------------

def lenet_forward(prep, x, out_features, tb=8):
    """x: (B, C, 32, 32) NCHW float32 -> logits (B, out_features)."""
    B, C, H, W = x.shape
    assert (H, W) == (32, 32), "LeNet (conv3 k=5 after two 2x2 pools) needs 32x32"
    assert B % tb == 0 and tb % 8 == 0
    G = B // tb                       # keep G even so both v7x TCs get equal work
    k1 = 5 * W * C                    # conv1 contraction: 5 rows x 32 cols x C

    # Wrapper-side (XLA) im2col for conv1, lane-dense for the DMA:
    #   slab[(b, i'), di*W*C + w*C + c] = x[b, c, 2*i' + p + di, w]
    xhwc = jnp.transpose(x, (0, 2, 3, 1))                      # (B, 32, 32, C)

    def im2col(p):
        taps = [xhwc[:, p + di:p + di + 28:2, :, :] for di in range(5)]
        return jnp.stack(taps, axis=2).reshape(B * 14, k1).astype(jnp.bfloat16)

    xe, xo = im2col(0), im2col(1)

    def full(a):                       # whole-array block, fetched once
        nd = a.ndim
        return pl.BlockSpec(a.shape, lambda g, _n=nd: (0,) * _n)

    out = pl.pallas_call(
        _lenet_kernel,
        out_shape=jax.ShapeDtypeStruct((B, 128), jnp.float32),
        grid=(G,),
        in_specs=[
            pl.BlockSpec((tb * 14, k1), lambda g: (g, 0)),
            pl.BlockSpec((tb * 14, k1), lambda g: (g, 0)),
            full(prep["w1"]), full(prep["b1"]),
            full(prep["w2"]), full(prep["b2"]),
            full(prep["w3"]), full(prep["b3"]),
            full(prep["wf1"]), full(prep["bf1"]),
            full(prep["wf2"]), full(prep["bf2"]),
        ],
        out_specs=pl.BlockSpec((tb, 128), lambda g: (g, 0)),
        scratch_shapes=[
            pltpu.VMEM((tb * 14, 168), jnp.float32),      # s1: pool1 row sums
            pltpu.VMEM((tb * 14 - 4, 160), jnp.float32),  # a2: conv2 activations
        ],
        compiler_params=pltpu.CompilerParams(
            dimension_semantics=("parallel",),
        ),
    )(xe, xo, prep["w1"], prep["b1"], prep["w2"], prep["b2"],
      prep["w3"], prep["b3"], prep["wf1"], prep["bf1"], prep["wf2"], prep["bf2"])

    return out[:, :out_features]


# ----------------------------- init & reference -----------------------------

def init_lenet_params(key, init_channel=3, out_features=10):
    """Deterministic init mimicking PyTorch's uniform(-1/sqrt(fan_in), ...)."""
    ks = jax.random.split(key, 10)

    def u(k, shape, fan_in):
        bound = 1.0 / (fan_in ** 0.5)
        return jax.random.uniform(k, shape, jnp.float32, -bound, bound)

    p = {}
    p["w1"] = u(ks[0], (6, init_channel, 5, 5), init_channel * 25)
    p["b1"] = u(ks[1], (6,), init_channel * 25)
    p["w2"] = u(ks[2], (16, 6, 5, 5), 6 * 25)
    p["b2"] = u(ks[3], (16,), 6 * 25)
    p["w3"] = u(ks[4], (120, 16, 5, 5), 16 * 25)
    p["b3"] = u(ks[5], (120,), 16 * 25)
    p["wf1"] = u(ks[6], (84, 120), 120)          # PyTorch Linear: (out, in)
    p["bf1"] = u(ks[7], (84,), 120)
    p["wf2"] = u(ks[8], (out_features, 84), 84)
    p["bf2"] = u(ks[9], (out_features,), 84)
    return p


def lenet_reference(params, x):
    """Pure-JAX f32 (HIGHEST precision) reference matching the PyTorch module."""
    hi = jax.lax.Precision.HIGHEST

    def conv(h, w, b):
        y = jax.lax.conv_general_dilated(
            h, w, window_strides=(1, 1), padding="VALID",
            dimension_numbers=("NCHW", "OIHW", "NCHW"), precision=hi)
        return jnp.tanh(y + b[None, :, None, None])

    def pool(h):
        B, C, H, W = h.shape
        return h.reshape(B, C, H // 2, 2, W // 2, 2).mean(axis=(3, 5))

    h = pool(conv(x, params["w1"], params["b1"]))
    h = pool(conv(h, params["w2"], params["b2"]))
    h = conv(h, params["w3"], params["b3"]).reshape(x.shape[0], -1)
    h = jnp.tanh(jnp.matmul(h, params["wf1"].T, precision=hi) + params["bf1"])
    return jnp.matmul(h, params["wf2"].T, precision=hi) + params["bf2"]


if __name__ == "__main__":
    key = jax.random.PRNGKey(0)
    k_param, k_x = jax.random.split(key)

    B, C, H, W = 16, 3, 32, 32        # conv3 (k=5) after two 2x2 pools => 32x32
    out_features = 10
    TB = 8                            # 8 samples / grid step -> grid = (2,), even

    params = init_lenet_params(k_param, init_channel=C, out_features=out_features)
    prep = prepare_lenet_params(params, out_features)   # one-time weight re-layout
    x = jax.random.normal(k_x, (B, C, H, W), dtype=jnp.float32)

    fwd = jax.jit(lenet_forward, static_argnums=(2, 3))
    out = jax.block_until_ready(fwd(prep, x, out_features, TB))

    assert out.shape == (B, out_features), out.shape
    assert out.dtype == jnp.float32

    ref = jax.block_until_ready(lenet_reference(params, x))
    err = float(jnp.max(jnp.abs(out - ref)))
    # bf16 matmul operands (f32 accumulation) vs an f32 HIGHEST reference.
    assert err < 3e-2, f"max abs err vs reference: {err}"

    print("KERNEL_OK")
</pallas_src>

<mosaic_0001>
module attributes {stable_mosaic.version = 11 : i64} {
  func.func @_lenet_kernel(%arg0: i32, %arg1: memref<112x480xbf16, #tpu.memory_space<vmem>>, %arg2: memref<112x480xbf16, #tpu.memory_space<vmem>>, %arg3: memref<480x168xbf16, #tpu.memory_space<vmem>>, %arg4: memref<1x168xf32, #tpu.memory_space<vmem>>, %arg5: memref<5x168x160xbf16, #tpu.memory_space<vmem>>, %arg6: memref<1x160xf32, #tpu.memory_space<vmem>>, %arg7: memref<5x160x120xbf16, #tpu.memory_space<vmem>>, %arg8: memref<1x120xf32, #tpu.memory_space<vmem>>, %arg9: memref<120x84xbf16, #tpu.memory_space<vmem>>, %arg10: memref<1x84xf32, #tpu.memory_space<vmem>>, %arg11: memref<84x128xbf16, #tpu.memory_space<vmem>>, %arg12: memref<1x128xf32, #tpu.memory_space<vmem>>, %arg13: memref<8x128xf32, #tpu.memory_space<vmem>>, %arg14: memref<112x168xf32, #tpu.memory_space<vmem>>, %arg15: memref<108x160xf32, #tpu.memory_space<vmem>>) attributes {dimension_semantics = [#tpu.dimension_semantics<parallel>], iteration_bounds = array<i64: 2>, scalar_prefetch = 0 : i64, scratch_operands = 2 : i64, tpu.core_type = #tpu.core_type<tc>, window_params = [{transform_indices = @transform_0, window_bounds = array<i64: 112, 480>}, {transform_indices = @transform_1, window_bounds = array<i64: 112, 480>}, {pipeline_mode = #tpu.pipeline_mode<synchronous>, transform_indices = @transform_2, window_bounds = array<i64: 480, 168>}, {pipeline_mode = #tpu.pipeline_mode<synchronous>, transform_indices = @transform_3, window_bounds = array<i64: 1, 168>}, {pipeline_mode = #tpu.pipeline_mode<synchronous>, transform_indices = @transform_4, window_bounds = array<i64: 5, 168, 160>}, {pipeline_mode = #tpu.pipeline_mode<synchronous>, transform_indices = @transform_5, window_bounds = array<i64: 1, 160>}, {pipeline_mode = #tpu.pipeline_mode<synchronous>, transform_indices = @transform_6, window_bounds = array<i64: 5, 160, 120>}, {pipeline_mode = #tpu.pipeline_mode<synchronous>, transform_indices = @transform_7, window_bounds = array<i64: 1, 120>}, {pipeline_mode = #tpu.pipeline_mode<synchronous>, transform_indices = @transform_8, window_bounds = array<i64: 120, 84>}, {pipeline_mode = #tpu.pipeline_mode<synchronous>, transform_indices = @transform_9, window_bounds = array<i64: 1, 84>}, {pipeline_mode = #tpu.pipeline_mode<synchronous>, transform_indices = @transform_10, window_bounds = array<i64: 84, 128>}, {pipeline_mode = #tpu.pipeline_mode<synchronous>, transform_indices = @transform_11, window_bounds = array<i64: 1, 128>}, {transform_indices = @transform_12, window_bounds = array<i64: 8, 128>}]} {
    %c0 = arith.constant 0 : index
    %c0_0 = arith.constant 0 : index
    %0 = vector.load %arg1[%c0, %c0_0] : memref<112x480xbf16, #tpu.memory_space<vmem>>, vector<112x480xbf16>
    %c0_1 = arith.constant 0 : index
    %c0_2 = arith.constant 0 : index
    %1 = vector.load %arg3[%c0_1, %c0_2] : memref<480x168xbf16, #tpu.memory_space<vmem>>, vector<480x168xbf16>
    %cst = arith.constant dense<0.000000e+00> : vector<112x168xf32>
    %2 = tpu.matmul %0, %1, %cst {dimension_numbers = #tpu.dot_dimension_numbers<[1], [0], [0], [1], [0, 0, 1, 1], [], []>} : vector<112x480xbf16>, vector<480x168xbf16>, vector<112x168xf32> -> vector<112x168xf32>
    %c0_3 = arith.constant 0 : index
    %c0_4 = arith.constant 0 : index
    %3 = vector.load %arg2[%c0_3, %c0_4] : memref<112x480xbf16, #tpu.memory_space<vmem>>, vector<112x480xbf16>
    %c0_5 = arith.constant 0 : index
    %c0_6 = arith.constant 0 : index
    %4 = vector.load %arg3[%c0_5, %c0_6] : memref<480x168xbf16, #tpu.memory_space<vmem>>, vector<480x168xbf16>
    %cst_7 = arith.constant dense<0.000000e+00> : vector<112x168xf32>
    %5 = tpu.matmul %3, %4, %cst_7 {dimension_numbers = #tpu.dot_dimension_numbers<[1], [0], [0], [1], [0, 0, 1, 1], [], []>} : vector<112x480xbf16>, vector<480x168xbf16>, vector<112x168xf32> -> vector<112x168xf32>
    %c0_8 = arith.constant 0 : index
    %c0_9 = arith.constant 0 : index
    %6 = vector.load %arg4[%c0_8, %c0_9] : memref<1x168xf32, #tpu.memory_space<vmem>>, vector<1x168xf32>
    %7 = vector.broadcast %6 : vector<1x168xf32> to vector<112x168xf32>
    %8 = arith.addf %2, %7 : vector<112x168xf32>
    %9 = math.tanh %8 : vector<112x168xf32>
    %c0_10 = arith.constant 0 : index
    %c0_11 = arith.constant 0 : index
    %10 = vector.load %arg4[%c0_10, %c0_11] : memref<1x168xf32, #tpu.memory_space<vmem>>, vector<1x168xf32>
    %11 = vector.broadcast %10 : vector<1x168xf32> to vector<112x168xf32>
    %12 = arith.addf %5, %11 : vector<112x168xf32>
    %13 = math.tanh %12 : vector<112x168xf32>
    %14 = arith.addf %9, %13 : vector<112x168xf32>
    %c0_12 = arith.constant 0 : index
    %c0_13 = arith.constant 0 : index
    %15 = vector.load %arg14[%c0_12, %c0_13] : memref<112x168xf32, #tpu.memory_space<vmem>>, vector<112x168xf32>
    tpu.vector_store %arg14[%c0_12, %c0_13], %14 {strides = array<i32>} : memref<112x168xf32, #tpu.memory_space<vmem>>, vector<112x168xf32>,
    %cst_14 = arith.constant 0.000000e+00 : f32
    %16 = vector.broadcast %cst_14 : f32 to vector<108x160xf32>
    %c0_15 = arith.constant 0 : index
    %c0_16 = arith.constant 0 : index
    %17 = vector.load %arg14[%c0_15, %c0_16] : memref<112x168xf32, #tpu.memory_space<vmem>>, vector<108x168xf32>
    %18 = arith.truncf %17 : vector<108x168xf32> to vector<108x168xbf16>
    %c0_17 = arith.constant 0 : index
    %c0_18 = arith.constant 0 : index
    %c0_19 = arith.constant 0 : index
    %19 = vector.load %arg5[%c0_17, %c0_18, %c0_19] : memref<5x168x160xbf16, #tpu.memory_space<vmem>>, vector<1x168x160xbf16>
    %20 = vector.shape_cast %19 : vector<1x168x160xbf16> to vector<168x160xbf16>
    %cst_20 = arith.constant dense<0.000000e+00> : vector<108x160xf32>
    %21 = tpu.matmul %18, %20, %cst_20 {dimension_numbers = #tpu.dot_dimension_numbers<[1], [0], [0], [1], [0, 0, 1, 1], [], []>} : vector<108x168xbf16>, vector<168x160xbf16>, vector<108x160xf32> -> vector<108x160xf32>
    %22 = arith.addf %16, %21 : vector<108x160xf32>
    %c1 = arith.constant 1 : index
    %c0_21 = arith.constant 0 : index
    %23 = vector.load %arg14[%c1, %c0_21] : memref<112x168xf32, #tpu.memory_space<vmem>>, vector<108x168xf32>
    %24 = arith.truncf %23 : vector<108x168xf32> to vector<108x168xbf16>
    %c1_22 = arith.constant 1 : index
    %c0_23 = arith.constant 0 : index
    %c0_24 = arith.constant 0 : index
    %25 = vector.load %arg5[%c1_22, %c0_23, %c0_24] : memref<5x168x160xbf16, #tpu.memory_space<vmem>>, vector<1x168x160xbf16>
    %26 = vector.shape_cast %25 : vector<1x168x160xbf16> to vector<168x160xbf16>
    %cst_25 = arith.constant dense<0.000000e+00> : vector<108x160xf32>
    %27 = tpu.matmul %24, %26, %cst_25 {dimension_numbers = #tpu.dot_dimension_numbers<[1], [0], [0], [1], [0, 0, 1, 1], [], []>} : vector<108x168xbf16>, vector<168x160xbf16>, vector<108x160xf32> -> vector<108x160xf32>
    %28 = arith.addf %22, %27 : vector<108x160xf32>
    %c2 = arith.constant 2 : index
    %c0_26 = arith.constant 0 : index
    %29 = vector.load %arg14[%c2, %c0_26] : memref<112x168xf32, #tpu.memory_space<vmem>>, vector<108x168xf32>
    %30 = arith.truncf %29 : vector<108x168xf32> to vector<108x168xbf16>
    %c2_27 = arith.constant 2 : index
    %c0_28 = arith.constant 0 : index
    %c0_29 = arith.constant 0 : index
    %31 = vector.load %arg5[%c2_27, %c0_28, %c0_29] : memref<5x168x160xbf16, #tpu.memory_space<vmem>>, vector<1x168x160xbf16>
    %32 = vector.shape_cast %31 : vector<1x168x160xbf16> to vector<168x160xbf16>
    %cst_30 = arith.constant dense<0.000000e+00> : vector<108x160xf32>
    %33 = tpu.matmul %30, %32, %cst_30 {dimension_numbers = #tpu.dot_dimension_numbers<[1], [0], [0], [1], [0, 0, 1, 1], [], []>} : vector<108x168xbf16>, vector<168x160xbf16>, vector<108x160xf32> -> vector<108x160xf32>
    %34 = arith.addf %28, %33 : vector<108x160xf32>
    %c3 = arith.constant 3 : index
    %c0_31 = arith.constant 0 : index
    %35 = vector.load %arg14[%c3, %c0_31] : memref<112x168xf32, #tpu.memory_space<vmem>>, vector<108x168xf32>
    %36 = arith.truncf %35 : vector<108x168xf32> to vector<108x168xbf16>
    %c3_32 = arith.constant 3 : index
    %c0_33 = arith.constant 0 : index
    %c0_34 = arith.constant 0 : index
    %37 = vector.load %arg5[%c3_32, %c0_33, %c0_34] : memref<5x168x160xbf16, #tpu.memory_space<vmem>>, vector<1x168x160xbf16>
    %38 = vector.shape_cast %37 : vector<1x168x160xbf16> to vector<168x160xbf16>
    %cst_35 = arith.constant dense<0.000000e+00> : vector<108x160xf32>
    %39 = tpu.matmul %36, %38, %cst_35 {dimension_numbers = #tpu.dot_dimension_numbers<[1], [0], [0], [1], [0, 0, 1, 1], [], []>} : vector<108x168xbf16>, vector<168x160xbf16>, vector<108x160xf32> -> vector<108x160xf32>
    %40 = arith.addf %34, %39 : vector<108x160xf32>
    %c4 = arith.constant 4 : index
    %c0_36 = arith.constant 0 : index
    %41 = vector.load %arg14[%c4, %c0_36] : memref<112x168xf32, #tpu.memory_space<vmem>>, vector<108x168xf32>
    %42 = arith.truncf %41 : vector<108x168xf32> to vector<108x168xbf16>
    %c4_37 = arith.constant 4 : index
    %c0_38 = arith.constant 0 : index
    %c0_39 = arith.constant 0 : index
    %43 = vector.load %arg5[%c4_37, %c0_38, %c0_39] : memref<5x168x160xbf16, #tpu.memory_space<vmem>>, vector<1x168x160xbf16>
    %44 = vector.shape_cast %43 : vector<1x168x160xbf16> to vector<168x160xbf16>
    %cst_40 = arith.constant dense<0.000000e+00> : vector<108x160xf32>
    %45 = tpu.matmul %42, %44, %cst_40 {dimension_numbers = #tpu.dot_dimension_numbers<[1], [0], [0], [1], [0, 0, 1, 1], [], []>} : vector<108x168xbf16>, vector<168x160xbf16>, vector<108x160xf32> -> vector<108x160xf32>
    %46 = arith.addf %40, %45 : vector<108x160xf32>
    %c0_41 = arith.constant 0 : index
    %c0_42 = arith.constant 0 : index
    %47 = vector.load %arg6[%c0_41, %c0_42] : memref<1x160xf32, #tpu.memory_space<vmem>>, vector<1x160xf32>
    %48 = vector.broadcast %47 : vector<1x160xf32> to vector<108x160xf32>
    %49 = arith.addf %46, %48 : vector<108x160xf32>
    %50 = math.tanh %49 : vector<108x160xf32>
    %c0_43 = arith.constant 0 : index
    %c0_44 = arith.constant 0 : index
    %51 = vector.load %arg15[%c0_43, %c0_44] : memref<108x160xf32, #tpu.memory_space<vmem>>, vector<108x160xf32>
    tpu.vector_store %arg15[%c0_43, %c0_44], %50 {strides = array<i32>} : memref<108x160xf32, #tpu.memory_space<vmem>>, vector<108x160xf32>,
    %cst_45 = arith.constant 0.000000e+00 : f32
    %52 = vector.broadcast %cst_45 : f32 to vector<99x120xf32>
    %c0_46 = arith.constant 0 : index
    %c0_47 = arith.constant 0 : index
    %53 = vector.load %arg15[%c0_46, %c0_47] : memref<108x160xf32, #tpu.memory_space<vmem>>, vector<99x160xf32>
    %c1_48 = arith.constant 1 : index
    %c0_49 = arith.constant 0 : index
    %54 = vector.load %arg15[%c1_48, %c0_49] : memref<108x160xf32, #tpu.memory_space<vmem>>, vector<99x160xf32>
    %55 = arith.addf %53, %54 : vector<99x160xf32>
    %56 = arith.truncf %55 : vector<99x160xf32> to vector<99x160xbf16>
    %c0_50 = arith.constant 0 : index
    %c0_51 = arith.constant 0 : index
    %c0_52 = arith.constant 0 : index
    %57 = vector.load %arg7[%c0_50, %c0_51, %c0_52] : memref<5x160x120xbf16, #tpu.memory_space<vmem>>, vector<1x160x120xbf16>
    %58 = vector.shape_cast %57 : vector<1x160x120xbf16> to vector<160x120xbf16>
    %cst_53 = arith.constant dense<0.000000e+00> : vector<99x120xf32>
    %59 = tpu.matmul %56, %58, %cst_53 {dimension_numbers = #tpu.dot_dimension_numbers<[1], [0], [0], [1], [0, 0, 1, 1], [], []>} : vector<99x160xbf16>, vector<160x120xbf16>, vector<99x120xf32> -> vector<99x120xf32>
    %60 = arith.addf %52, %59 : vector<99x120xf32>
    %c2_54 = arith.constant 2 : index
    %c0_55 = arith.constant 0 : index
    %61 = vector.load %arg15[%c2_54, %c0_55] : memref<108x160xf32, #tpu.memory_space<vmem>>, vector<99x160xf32>
    %c3_56 = arith.constant 3 : index
    %c0_57 = arith.constant 0 : index
    %62 = vector.load %arg15[%c3_56, %c0_57] : memref<108x160xf32, #tpu.memory_space<vmem>>, vector<99x160xf32>
    %63 = arith.addf %61, %62 : vector<99x160xf32>
    %64 = arith.truncf %63 : vector<99x160xf32> to vector<99x160xbf16>
    %c1_58 = arith.constant 1 : index
    %c0_59 = arith.constant 0 : index
    %c0_60 = arith.constant 0 : index
    %65 = vector.load %arg7[%c1_58, %c0_59, %c0_60] : memref<5x160x120xbf16, #tpu.memory_space<vmem>>, vector<1x160x120xbf16>
    %66 = vector.shape_cast %65 : vector<1x160x120xbf16> to vector<160x120xbf16>
    %cst_61 = arith.constant dense<0.000000e+00> : vector<99x120xf32>
    %67 = tpu.matmul %64, %66, %cst_61 {dimension_numbers = #tpu.dot_dimension_numbers<[1], [0], [0], [1], [0, 0, 1, 1], [], []>} : vector<99x160xbf16>, vector<160x120xbf16>, vector<99x120xf32> -> vector<99x120xf32>
    %68 = arith.addf %60, %67 : vector<99x120xf32>
    %c4_62 = arith.constant 4 : index
    %c0_63 = arith.constant 0 : index
    %69 = vector.load %arg15[%c4_62, %c0_63] : memref<108x160xf32, #tpu.memory_space<vmem>>, vector<99x160xf32>
    %c5 = arith.constant 5 : index
    %c0_64 = arith.constant 0 : index
    %70 = vector.load %arg15[%c5, %c0_64] : memref<108x160xf32, #tpu.memory_space<vmem>>, vector<99x160xf32>
    %71 = arith.addf %69, %70 : vector<99x160xf32>
    %72 = arith.truncf %71 : vector<99x160xf32> to vector<99x160xbf16>
    %c2_65 = arith.constant 2 : index
    %c0_66 = arith.constant 0 : index
    %c0_67 = arith.constant 0 : index
    %73 = vector.load %arg7[%c2_65, %c0_66, %c0_67] : memref<5x160x120xbf16, #tpu.memory_space<vmem>>, vector<1x160x120xbf16>
    %74 = vector.shape_cast %73 : vector<1x160x120xbf16> to vector<160x120xbf16>
    %cst_68 = arith.constant dense<0.000000e+00> : vector<99x120xf32>
    %75 = tpu.matmul %72, %74, %cst_68 {dimension_numbers = #tpu.dot_dimension_numbers<[1], [0], [0], [1], [0, 0, 1, 1], [], []>} : vector<99x160xbf16>, vector<160x120xbf16>, vector<99x120xf32> -> vector<99x120xf32>
    %76 = arith.addf %68, %75 : vector<99x120xf32>
    %c6 = arith.constant 6 : index
    %c0_69 = arith.constant 0 : index
    %77 = vector.load %arg15[%c6, %c0_69] : memref<108x160xf32, #tpu.memory_space<vmem>>, vector<99x160xf32>
    %c7 = arith.constant 7 : index
    %c0_70 = arith.constant 0 : index
    %78 = vector.load %arg15[%c7, %c0_70] : memref<108x160xf32, #tpu.memory_space<vmem>>, vector<99x160xf32>
    %79 = arith.addf %77, %78 : vector<99x160xf32>
    %80 = arith.truncf %79 : vector<99x160xf32> to vector<99x160xbf16>
    %c3_71 = arith.constant 3 : index
    %c0_72 = arith.constant 0 : index
    %c0_73 = arith.constant 0 : index
    %81 = vector.load %arg7[%c3_71, %c0_72, %c0_73] : memref<5x160x120xbf16, #tpu.memory_space<vmem>>, vector<1x160x120xbf16>
    %82 = vector.shape_cast %81 : vector<1x160x120xbf16> to vector<160x120xbf16>
    %cst_74 = arith.constant dense<0.000000e+00> : vector<99x120xf32>
    %83 = tpu.matmul %80, %82, %cst_74 {dimension_numbers = #tpu.dot_dimension_numbers<[1], [0], [0], [1], [0, 0, 1, 1], [], []>} : vector<99x160xbf16>, vector<160x120xbf16>, vector<99x120xf32> -> vector<99x120xf32>
    %84 = arith.addf %76, %83 : vector<99x120xf32>
    %c8 = arith.constant 8 : index
    %c0_75 = arith.constant 0 : index
    %85 = vector.load %arg15[%c8, %c0_75] : memref<108x160xf32, #tpu.memory_space<vmem>>, vector<99x160xf32>
    %c9 = arith.constant 9 : index
    %c0_76 = arith.constant 0 : index
    %86 = vector.load %arg15[%c9, %c0_76] : memref<108x160xf32, #tpu.memory_space<vmem>>, vector<99x160xf32>
    %87 = arith.addf %85, %86 : vector<99x160xf32>
    %88 = arith.truncf %87 : vector<99x160xf32> to vector<99x160xbf16>
    %c4_77 = arith.constant 4 : index
    %c0_78 = arith.constant 0 : index
    %c0_79 = arith.constant 0 : index
    %89 = vector.load %arg7[%c4_77, %c0_78, %c0_79] : memref<5x160x120xbf16, #tpu.memory_space<vmem>>, vector<1x160x120xbf16>
    %90 = vector.shape_cast %89 : vector<1x160x120xbf16> to vector<160x120xbf16>
    %cst_80 = arith.constant dense<0.000000e+00> : vector<99x120xf32>
    %91 = tpu.matmul %88, %90, %cst_80 {dimension_numbers = #tpu.dot_dimension_numbers<[1], [0], [0], [1], [0, 0, 1, 1], [], []>} : vector<99x160xbf16>, vector<160x120xbf16>, vector<99x120xf32> -> vector<99x120xf32>
    %92 = arith.addf %84, %91 : vector<99x120xf32>
    %c0_81 = arith.constant 0 : index
    %c0_82 = arith.constant 0 : index
    %93 = vector.load %arg8[%c0_81, %c0_82] : memref<1x120xf32, #tpu.memory_space<vmem>>, vector<1x120xf32>
    %94 = vector.broadcast %93 : vector<1x120xf32> to vector<99x120xf32>
    %95 = arith.addf %92, %94 : vector<99x120xf32>
    %96 = math.tanh %95 : vector<99x120xf32>
    %97 = arith.truncf %96 : vector<99x120xf32> to vector<99x120xbf16>
    %c0_83 = arith.constant 0 : index
    %c0_84 = arith.constant 0 : index
    %98 = vector.load %arg9[%c0_83, %c0_84] : memref<120x84xbf16, #tpu.memory_space<vmem>>, vector<120x84xbf16>
    %cst_85 = arith.constant dense<0.000000e+00> : vector<99x84xf32>
    %99 = tpu.matmul %97, %98, %cst_85 {dimension_numbers = #tpu.dot_dimension_numbers<[1], [0], [0], [1], [0, 0, 1, 1], [], []>} : vector<99x120xbf16>, vector<120x84xbf16>, vector<99x84xf32> -> vector<99x84xf32>
    %c0_86 = arith.constant 0 : index
    %c0_87 = arith.constant 0 : index
    %100 = vector.load %arg10[%c0_86, %c0_87] : memref<1x84xf32, #tpu.memory_space<vmem>>, vector<1x84xf32>
    %101 = vector.broadcast %100 : vector<1x84xf32> to vector<99x84xf32>
    %102 = arith.addf %99, %101 : vector<99x84xf32>
    %103 = math.tanh %102 : vector<99x84xf32>
    %104 = arith.truncf %103 : vector<99x84xf32> to vector<99x84xbf16>
    %c0_88 = arith.constant 0 : index
    %c0_89 = arith.constant 0 : index
    %105 = vector.load %arg11[%c0_88, %c0_89] : memref<84x128xbf16, #tpu.memory_space<vmem>>, vector<84x128xbf16>
    %cst_90 = arith.constant dense<0.000000e+00> : vector<99x128xf32>
    %106 = tpu.matmul %104, %105, %cst_90 {dimension_numbers = #tpu.dot_dimension_numbers<[1], [0], [0], [1], [0, 0, 1, 1], [], []>} : vector<99x84xbf16>, vector<84x128xbf16>, vector<99x128xf32> -> vector<99x128xf32>
    %c0_91 = arith.constant 0 : index
    %c0_92 = arith.constant 0 : index
    %107 = vector.load %arg12[%c0_91, %c0_92] : memref<1x128xf32, #tpu.memory_space<vmem>>, vector<1x128xf32>
    %108 = vector.broadcast %107 : vector<1x128xf32> to vector<99x128xf32>
    %109 = arith.addf %106, %108 : vector<99x128xf32>
    %110 = vector.extract_strided_slice %109 {offsets = [0, 0], sizes = [1, 128], strides = [1, 1]} : vector<99x128xf32> to vector<1x128xf32>
    %c0_93 = arith.constant 0 : index
    %c0_94 = arith.constant 0 : index
    %111 = vector.load %arg13[%c0_93, %c0_94] : memref<8x128xf32, #tpu.memory_space<vmem>>, vector<1x128xf32>
    tpu.vector_store %arg13[%c0_93, %c0_94], %110 {strides = array<i32>} : memref<8x128xf32, #tpu.memory_space<vmem>>, vector<1x128xf32>,
    %112 = vector.extract_strided_slice %109 {offsets = [14, 0], sizes = [1, 128], strides = [1, 1]} : vector<99x128xf32> to vector<1x128xf32>
    %c1_95 = arith.constant 1 : index
    %c0_96 = arith.constant 0 : index
    %113 = vector.load %arg13[%c1_95, %c0_96] : memref<8x128xf32, #tpu.memory_space<vmem>>, vector<1x128xf32>
    tpu.vector_store %arg13[%c1_95, %c0_96], %112 {strides = array<i32>} : memref<8x128xf32, #tpu.memory_space<vmem>>, vector<1x128xf32>,
    %114 = vector.extract_strided_slice %109 {offsets = [28, 0], sizes = [1, 128], strides = [1, 1]} : vector<99x128xf32> to vector<1x128xf32>
    %c2_97 = arith.constant 2 : index
    %c0_98 = arith.constant 0 : index
    %115 = vector.load %arg13[%c2_97, %c0_98] : memref<8x128xf32, #tpu.memory_space<vmem>>, vector<1x128xf32>
    tpu.vector_store %arg13[%c2_97, %c0_98], %114 {strides = array<i32>} : memref<8x128xf32, #tpu.memory_space<vmem>>, vector<1x128xf32>,
    %116 = vector.extract_strided_slice %109 {offsets = [42, 0], sizes = [1, 128], strides = [1, 1]} : vector<99x128xf32> to vector<1x128xf32>
    %c3_99 = arith.constant 3 : index
    %c0_100 = arith.constant 0 : index
    %117 = vector.load %arg13[%c3_99, %c0_100] : memref<8x128xf32, #tpu.memory_space<vmem>>, vector<1x128xf32>
    tpu.vector_store %arg13[%c3_99, %c0_100], %116 {strides = array<i32>} : memref<8x128xf32, #tpu.memory_space<vmem>>, vector<1x128xf32>,
    %118 = vector.extract_strided_slice %109 {offsets = [56, 0], sizes = [1, 128], strides = [1, 1]} : vector<99x128xf32> to vector<1x128xf32>
    %c4_101 = arith.constant 4 : index
    %c0_102 = arith.constant 0 : index
    %119 = vector.load %arg13[%c4_101, %c0_102] : memref<8x128xf32, #tpu.memory_space<vmem>>, vector<1x128xf32>
    tpu.vector_store %arg13[%c4_101, %c0_102], %118 {strides = array<i32>} : memref<8x128xf32, #tpu.memory_space<vmem>>, vector<1x128xf32>,
    %120 = vector.extract_strided_slice %109 {offsets = [70, 0], sizes = [1, 128], strides = [1, 1]} : vector<99x128xf32> to vector<1x128xf32>
    %c5_103 = arith.constant 5 : index
    %c0_104 = arith.constant 0 : index
    %121 = vector.load %arg13[%c5_103, %c0_104] : memref<8x128xf32, #tpu.memory_space<vmem>>, vector<1x128xf32>
    tpu.vector_store %arg13[%c5_103, %c0_104], %120 {strides = array<i32>} : memref<8x128xf32, #tpu.memory_space<vmem>>, vector<1x128xf32>,
    %122 = vector.extract_strided_slice %109 {offsets = [84, 0], sizes = [1, 128], strides = [1, 1]} : vector<99x128xf32> to vector<1x128xf32>
    %c6_105 = arith.constant 6 : index
    %c0_106 = arith.constant 0 : index
    %123 = vector.load %arg13[%c6_105, %c0_106] : memref<8x128xf32, #tpu.memory_space<vmem>>, vector<1x128xf32>
    tpu.vector_store %arg13[%c6_105, %c0_106], %122 {strides = array<i32>} : memref<8x128xf32, #tpu.memory_space<vmem>>, vector<1x128xf32>,
    %124 = vector.extract_strided_slice %109 {offsets = [98, 0], sizes = [1, 128], strides = [1, 1]} : vector<99x128xf32> to vector<1x128xf32>
    %c7_107 = arith.constant 7 : index
    %c0_108 = arith.constant 0 : index
    %125 = vector.load %arg13[%c7_107, %c0_108] : memref<8x128xf32, #tpu.memory_space<vmem>>, vector<1x128xf32>
    tpu.vector_store %arg13[%c7_107, %c0_108], %124 {strides = array<i32>} : memref<8x128xf32, #tpu.memory_space<vmem>>, vector<1x128xf32>,
    return
  }
  func.func @transform_0(%arg0: i32) -> (i32, i32) {
    %c0_i32 = arith.constant 0 : i32
    %c0_i32_0 = arith.constant 0 : i32
    return %arg0, %c0_i32 : i32, i32
  }
  func.func @transform_1(%arg0: i32) -> (i32, i32) {
    %c0_i32 = arith.constant 0 : i32
    %c0_i32_0 = arith.constant 0 : i32
    return %arg0, %c0_i32 : i32, i32
  }
  func.func @transform_2(%arg0: i32) -> (i32, i32) {
    %c0_i32 = arith.constant 0 : i32
    %c0_i32_0 = arith.constant 0 : i32
    %c0_i32_1 = arith.constant 0 : i32
    return %c0_i32, %c0_i32_0 : i32, i32
  }
  func.func @transform_3(%arg0: i32) -> (i32, i32) {
    %c0_i32 = arith.constant 0 : i32
    %c0_i32_0 = arith.constant 0 : i32
    %c0_i32_1 = arith.constant 0 : i32
    return %c0_i32, %c0_i32_0 : i32, i32
  }
  func.func @transform_4(%arg0: i32) -> (i32, i32, i32) {
    %c0_i32 = arith.constant 0 : i32
    %c0_i32_0 = arith.constant 0 : i32
    %c0_i32_1 = arith.constant 0 : i32
    %c0_i32_2 = arith.constant 0 : i32
    return %c0_i32, %c0_i32_0, %c0_i32_1 : i32, i32, i32
  }
  func.func @transform_5(%arg0: i32) -> (i32, i32) {
    %c0_i32 = arith.constant 0 : i32
    %c0_i32_0 = arith.constant 0 : i32
    %c0_i32_1 = arith.constant 0 : i32
    return %c0_i32, %c0_i32_0 : i32, i32
  }
  func.func @transform_6(%arg0: i32) -> (i32, i32, i32) {
    %c0_i32 = arith.constant 0 : i32
    %c0_i32_0 = arith.constant 0 : i32
    %c0_i32_1 = arith.constant 0 : i32
    %c0_i32_2 = arith.constant 0 : i32
    return %c0_i32, %c0_i32_0, %c0_i32_1 : i32, i32, i32
  }
  func.func @transform_7(%arg0: i32) -> (i32, i32) {
    %c0_i32 = arith.constant 0 : i32
    %c0_i32_0 = arith.constant 0 : i32
    %c0_i32_1 = arith.constant 0 : i32
    return %c0_i32, %c0_i32_0 : i32, i32
  }
  func.func @transform_8(%arg0: i32) -> (i32, i32) {
    %c0_i32 = arith.constant 0 : i32
    %c0_i32_0 = arith.constant 0 : i32
    %c0_i32_1 = arith.constant 0 : i32
    return %c0_i32, %c0_i32_0 : i32, i32
  }
  func.func @transform_9(%arg0: i32) -> (i32, i32) {
    %c0_i32 = arith.constant 0 : i32
    %c0_i32_0 = arith.constant 0 : i32
    %c0_i32_1 = arith.constant 0 : i32
    return %c0_i32, %c0_i32_0 : i32, i32
  }
  func.func @transform_10(%arg0: i32) -> (i32, i32) {
    %c0_i32 = arith.constant 0 : i32
    %c0_i32_0 = arith.constant 0 : i32
    %c0_i32_1 = arith.constant 0 : i32
    return %c0_i32, %c0_i32_0 : i32, i32
  }
  func.func @transform_11(%arg0: i32) -> (i32, i32) {
    %c0_i32 = arith.constant 0 : i32
    %c0_i32_0 = arith.constant 0 : i32
    %c0_i32_1 = arith.constant 0 : i32
    return %c0_i32, %c0_i32_0 : i32, i32
  }
  func.func @transform_12(%arg0: i32) -> (i32, i32) {
    %c0_i32 = arith.constant 0 : i32
    %c0_i32_0 = arith.constant 0 : i32
    return %arg0, %c0_i32 : i32, i32
  }
}

</mosaic_0001>

<bundles_post_ra>
// kernel: lenet_forward.1
= control target key start
LH: loop header
LB: loop body
LE: loop exit
PB: predicated region body
PF: predicated region fallthrough
CT: control target
= control target key end

     0   :  { %17 = vsyncpa [#allocation5], 0  ;;  %s9490_s0 = inlined_call_operand.vmem [shape: bf16[224,480], index: 0, kind: input, shape index: {}]   ;;  %s9491_s1 = inlined_call_operand.vmem [shape: bf16[224,480], index: 1, kind: input, shape index: {}]   ;;  %s9492_s2 = inlined_call_operand.vmem [shape: bf16[480,168], index: 2, kind: input, shape index: {}]   ;;  %s9493_s3 = inlined_call_operand.vmem [shape: f32[1,168], index: 3, kind: input, shape index: {}]   ;;  %s9494_s4 = inlined_call_operand.vmem [shape: bf16[5,168,160], index: 4, kind: input, shape index: {}]   ;;  %s9495_s5 = inlined_call_operand.vmem [shape: f32[1,160], index: 5, kind: input, shape index: {}]   ;;  %s9496_s6 = inlined_call_operand.vmem [shape: bf16[5,160,120], index: 6, kind: input, shape index: {}]   ;;  %s9497_s7 = inlined_call_operand.vmem [shape: f32[1,120], index: 7, kind: input, shape index: {}]   ;;  %s9498_s8 = inlined_call_operand.vmem [shape: bf16[120,84], index: 8, kind: input, shape index: {}]   ;;  %s9499_s9 = inlined_call_operand.vmem [shape: f32[1,84], index: 9, kind: input, shape index: {}]   ;;  %s9500_s10 = inlined_call_operand.vmem [shape: bf16[84,128], index: 10, kind: input, shape index: {}]   ;;  %s9501_s11 = inlined_call_operand.vmem [shape: f32[1,128], index: 11, kind: input, shape index: {}]   ;;  %s9502_s12 = inlined_call_operand.hbm [shape: f32[16,128], index: 12, kind: output, shape index: {}]  }
   0x1   :  { %19 = vsyncpa [#allocation5 + $0x1], 0  ;;  %s7324_s21 = smov 0   ;;  %s7326_s22 = smov 0  }
   0x2   :  { %s7328_s23 = smov 0   ;;  %s7330_s24 = smov 0  }
   0x3 LB: > { %9513 = sst [smem:[#allocation7_spill]] %s7249_s23  ;;  %s7345_s25 = sadd.s32 4294967295, %s7253_s24   ;;  %s7253_s24 = sphi %s7330_s24, %s9538_s24   ;;  %s7249_s23 = sphi %s7328_s23, %s9535_s23   ;;  %s7245_s22 = sphi %s7326_s22, %s9537_s22   ;;  %s7241_s21 = sphi %s7324_s21, %s9536_s21  }
   0x4   : > { %s5619_s26 = sadd.s32 4294967294, %s7253_s24   ;;  %s7349_s27 = sadd.s32 1, %s7253_s24  }
   0x5   : > { %s294_s28 = sadd.s32 1, %s7249_s23  ;;  %s291_s29 = ssub.s32 %s7253_s24, %s7349_s27 }
   0x6   : > { %p304_p0 = scmp.ne.s32.totalorder %s7249_s23, %s7245_s22  ;;  %p292_p1 = scmp.eq.s32.totalorder %s291_s29, 0 }
   0x7   : > { %p305_p2 = scmp.eq.s32.totalorder %s7345_s25, 1  ;;  %p310_p3 = scmp.ne.s32.totalorder %s7245_s22, %s7241_s21 }
   0x8   : > { %p311_p4 = scmp.eq.s32.totalorder %s5619_s26, 1  ;;  %p5622_p7 = scmp.ge.s32.totalorder %s7253_s24, 1 }
   0x9   : > { %s7360_s30 = scalar_select %p292_p1, %s7249_s23, %s294_s28  }
   0xa   : > { %p7362_p5 = por %p305_p2, %p304_p0  ;;  %p7366_p6 = por %p311_p4, %p310_p3 }
   0xb   : > { %9514 = sst [smem:[#allocation8_spill]] %s7360_s30  ;;  %p379_p8 = scmp.lt.s32.totalorder %s7253_s24, 3 }
   0xd   : > { %p380_p9 = pnand %p5622_p7, %p379_p8 }
   0xf   : > { %383 = sbr.rel (%p380_p9) target bundleno = 1849 (0x739), region = 68 }
  0x16   : > { %v6572_v0 = vld [vmem:[%s9492_s2 + $0x4] ss:$8 sps:$4 sm:$0xff]   ;;  %v6574_v1 = vld [vmem:[%s9492_s2] ss:$8 sps:$4 sm:$0xff]   ;;  %v6575_v2 = vld [vmem:[%s9492_s2 + $0x14] ss:$8 sps:$4 sm:$0xff]  }
  0x17   : > { %1026 = vmatprep.subr.bf16.mxu0 %v6572_v0  ;;  %1414 = vmatprep.subr.bf16.mxu1 %v6572_v0  ;;  %v6577_v3 = vld [vmem:[%s9492_s2 + $0x10] ss:$8 sps:$4 sm:$0xff]   ;;  %v6578_v4 = vld [vmem:[%s9492_s2 + $0x24] ss:$8 sps:$4 sm:$0xff]   ;;  %s428_s16 = smul.u32 14, %s7345_s25  ;;  %vm1004_vm0 = vcmask 785408  }
  0x18   : > { %1027 = vmatpush1.bf16.msra.mxu0 %v6574_v1  ;;  %1415 = vmatpush1.bf16.msra.mxu1 %v6574_v1  ;;  %v6580_v5 = vld [vmem:[%s9492_s2 + $0x20] ss:$8 sps:$4 sm:$0xff]   ;;  %v6581_v6 = vld [vmem:[%s9492_s2 + $0x34] ss:$8 sps:$4 sm:$0xff]   ;;  %v6583_v7 = vld [vmem:[%s9492_s2 + $0x30] ss:$8 sps:$4 sm:$0xff]  }
  0x19   : > { %1028 = vmatprep.subr.bf16.mxu0 %v6575_v2  ;;  %1416 = vmatprep.subr.bf16.mxu1 %v6575_v2  ;;  %p429_p10 = scmp.lt.s32.totalorder %s428_s16, 27  ;;  %v6584_v8 = vld [vmem:[%s9492_s2 + $0x44] ss:$8 sps:$4 sm:$0xff]   ;;  %v6586_v9 = vld [vmem:[%s9492_s2 + $0x40] ss:$8 sps:$4 sm:$0xff]   ;;  %vm2042_vm1 = vcmask 1043456  }
  0x1a   : > { %v6587_v10 = vld [vmem:[%s9492_s2 + $0x54] ss:$8 sps:$4 sm:$0xff]   ;;  %v6589_v11 = vld [vmem:[%s9492_s2 + $0x50] ss:$8 sps:$4 sm:$0xff]   ;;  %v6590_v12 = vld [vmem:[%s9492_s2 + $0x64] ss:$8 sps:$4 sm:$0xff]  }
  0x1b   : > { %s9540_s16 = smov (!%p429_p10, %s428_s16), 27  ;;  %v6592_v14 = vld [vmem:[%s9492_s2 + $0x60] ss:$8 sps:$4 sm:$0xff]   ;;  %v6593_v16 = vld [vmem:[%s9492_s2 + $0x74] ss:$8 sps:$4 sm:$0xff]   ;;  %vm1677_vm2 = vcmask 326656  }
  0x1c   : > { %1029 = vmatpush1.bf16.msra.mxu0 %v6577_v3  ;;  %1417 = vmatpush1.bf16.msra.mxu1 %v6577_v3  ;;  %s6192_s26 = sshll.u32 %s9540_s16, 4  ;;  %v6595_v17 = vld [vmem:[%s9492_s2 + $0x70] ss:$8 sps:$4 sm:$0xff]   ;;  %v6596_v18 = vld [vmem:[%s9492_s2 + $0x84] ss:$8 sps:$4 sm:$0xff]   ;;  %vm2426_vm4 = vcmask 1046528  }
  0x1d   : > { %1030 = vmatprep.subr.bf16.mxu0 %v6578_v4  ;;  %1418 = vmatprep.subr.bf16.mxu1 %v6578_v4  ;;  %s7412_s23 = scalar_lea.vmem %s9490_s0, %s6192_s26  ;;  %s7420_s20 = scalar_lea.vmem %s9491_s1, %s6192_s26  ;;  %v6598_v19 = vld [vmem:[%s9492_s2 + $0x80] ss:$8 sps:$4 sm:$0xff]   ;;  %v6599_v20 = vld [vmem:[%s9492_s2 + $0x94] ss:$8 sps:$4 sm:$0xff]   ;;  %v6601_v21 = vld [vmem:[%s9492_s2 + $0x90] ss:$8 sps:$4 sm:$0xff]  }
  0x1e   : > { %v6622_v13 = vld [vmem:[%s7412_s23 + $0x4] ss:$16 sps:$4 sm:$0xff]   ;;  %v6604_v23 = vld [vmem:[%s9492_s2 + $0xa0] ss:$8 sps:$4 sm:$0xff]   ;;  %v6607_v25 = vld [vmem:[%s9492_s2 + $0xb0] ss:$8 sps:$4 sm:$0xff]  }
  0x1f   : > { %v6625_v15 = vld [vmem:[%s7420_s20 + $0x4] ss:$16 sps:$4 sm:$0xff]   ;;  %1058 = vmatprep.mubr.bf16.mxu0 %v6622_v13  ;;  %v6610_v27 = vld [vmem:[%s9492_s2 + $0xc0] ss:$8 sps:$4 sm:$0xff]   ;;  %v6613_v29 = vld [vmem:[%s9492_s2 + $0xd0] ss:$8 sps:$4 sm:$0xff]  }
  0x20   : > { %1031 = vmatpush1.bf16.msra.mxu0 %v6580_v5  ;;  %1419 = vmatpush1.bf16.msra.mxu1 %v6580_v5  ;;  %v6602_v22 = vld [vmem:[%s9492_s2 + $0xa4] ss:$8 sps:$4 sm:$0xff]   ;;  %v6605_v24 = vld [vmem:[%s9492_s2 + $0xb4] ss:$8 sps:$4 sm:$0xff]   ;;  %v6616_v31 = vld [vmem:[%s9492_s2 + $0xe0] ss:$8 sps:$4 sm:$0xff]  }
  0x21   : > { %1032 = vmatprep.subr.bf16.mxu0 %v6581_v6  ;;  %1420 = vmatprep.subr.bf16.mxu1 %v6581_v6  ;;  %v6608_v26 = vld [vmem:[%s9492_s2 + $0xc4] ss:$8 sps:$4 sm:$0xff]   ;;  %v6611_v28 = vld [vmem:[%s9492_s2 + $0xd4] ss:$8 sps:$4 sm:$0xff]   ;;  %v6619_v33 = vld [vmem:[%s9492_s2 + $0xf0] ss:$8 sps:$4 sm:$0xff]  }
  0x22   : > { %1446 = vmatprep.mubr.bf16.mxu1 %v6625_v15  ;;  %v6614_v30 = vld [vmem:[%s9492_s2 + $0xe4] ss:$8 sps:$4 sm:$0xff]   ;;  %v6617_v32 = vld [vmem:[%s9492_s2 + $0xf4] ss:$8 sps:$4 sm:$0xff]   ;;  %v6620_v35 = vld [vmem:[%s7412_s23] ss:$16 sps:$4 sm:$0xff]  }
  0x23   : > { %v6628_v34 = vld [vmem:[%s9492_s2 + $0x104] ss:$8 sps:$4 sm:$0xff]   ;;  %v6623_v36 = vld [vmem:[%s7420_s20] ss:$16 sps:$4 sm:$0xff]   ;;  %v6631_v38 = vld [vmem:[%s9492_s2 + $0x114] ss:$8 sps:$4 sm:$0xff]  }
  0x24   : > { %1033 = vmatpush1.bf16.msra.mxu0 %v6583_v7  ;;  %1421 = vmatpush1.bf16.msra.mxu1 %v6583_v7  ;;  %v6626_v37 = vld [vmem:[%s9492_s2 + $0x100] ss:$8 sps:$4 sm:$0xff]   ;;  %v6632_v39 = vld [vmem:[%s7412_s23 + $0x24] ss:$16 sps:$4 sm:$0xff]   ;;  %v6629_v41 = vld [vmem:[%s9492_s2 + $0x110] ss:$8 sps:$4 sm:$0xff]  }
  0x25   : > { %1034 = vmatprep.subr.bf16.mxu0 %v6584_v8  ;;  %1422 = vmatprep.subr.bf16.mxu1 %v6584_v8  ;;  %v6634_v40 = vld [vmem:[%s7420_s20 + $0x24] ss:$16 sps:$4 sm:$0xff]   ;;  %v6636_v43 = vld [vmem:[%s7412_s23 + $0x20] ss:$16 sps:$4 sm:$0xff]   ;;  %vm1798_vm3 = vsmask.f32 7424 }
  0x26   : > { %v6639_v42 = vld [vmem:[%s9492_s2 + $0x124] ss:$8 sps:$4 sm:$0xff]   ;;  %v6640_v44 = vld [vmem:[%s7420_s20 + $0x20] ss:$16 sps:$4 sm:$0xff]   ;;  %v6643_v46 = vld [vmem:[%s9492_s2 + $0x134] ss:$8 sps:$4 sm:$0xff]  }
  0x27   : > { %v6637_v45 = vld [vmem:[%s9492_s2 + $0x120] ss:$8 sps:$4 sm:$0xff]   ;;  %v6644_v47 = vld [vmem:[%s7412_s23 + $0x44] ss:$16 sps:$4 sm:$0xff]   ;;  %v6641_v49 = vld [vmem:[%s9492_s2 + $0x130] ss:$8 sps:$4 sm:$0xff]  }
  0x28   : > { %1035 = vmatpush1.bf16.msra.mxu0 %v6586_v9  ;;  %1423 = vmatpush1.bf16.msra.mxu1 %v6586_v9  ;;  %v6646_v48 = vld [vmem:[%s7420_s20 + $0x44] ss:$16 sps:$4 sm:$0xff]   ;;  %v6648_v51 = vld [vmem:[%s7412_s23 + $0x40] ss:$16 sps:$4 sm:$0xff]   ;;  %vm2753_vm5 = vsmask.f32 6400 }
  0x29   : > { %1036 = vmatprep.subr.bf16.mxu0 %v6587_v10  ;;  %1424 = vmatprep.subr.bf16.mxu1 %v6587_v10  ;;  %v6651_v50 = vld [vmem:[%s9492_s2 + $0x144] ss:$8 sps:$4 sm:$0xff]   ;;  %v6652_v52 = vld [vmem:[%s7420_s20 + $0x40] ss:$16 sps:$4 sm:$0xff]   ;;  %v6655_v54 = vld [vmem:[%s9492_s2 + $0x154] ss:$8 sps:$4 sm:$0xff]  }
  0x2a   : > { %v6649_v53 = vld [vmem:[%s9492_s2 + $0x140] ss:$8 sps:$4 sm:$0xff]   ;;  %v6653_v55 = vld [vmem:[%s9492_s2 + $0x150] ss:$8 sps:$4 sm:$0xff]   ;;  %v6656_v56 = vld [vmem:[%s7412_s23 + $0x64] ss:$16 sps:$4 sm:$0xff]  }
  0x2b   : > { %v6658_v57 = vld [vmem:[%s7420_s20 + $0x64] ss:$16 sps:$4 sm:$0xff]   ;;  %v6660_v59 = vld [vmem:[%s7412_s23 + $0x60] ss:$16 sps:$4 sm:$0xff]   ;;  %vm3132_vm6 = vcmask 1045504   ;;  %vm3498_vm7 = vcmask 261120  }
  0x2c   : > { %1037 = vmatpush1.bf16.msra.mxu0 %v6589_v11  ;;  %1425 = vmatpush1.bf16.msra.mxu1 %v6589_v11  ;;  %v6663_v58 = vld [vmem:[%s9492_s2 + $0x164] ss:$8 sps:$4 sm:$0xff]   ;;  %v6664_v60 = vld [vmem:[%s7420_s20 + $0x60] ss:$16 sps:$4 sm:$0xff]   ;;  %v6667_v62 = vld [vmem:[%s9492_s2 + $0x174] ss:$8 sps:$4 sm:$0xff]  }
  0x2d   : > { %1038 = vmatprep.subr.bf16.mxu0 %v6590_v12  ;;  %1426 = vmatprep.subr.bf16.mxu1 %v6590_v12  ;;  %v6661_v61 = vld [vmem:[%s9492_s2 + $0x160] ss:$8 sps:$4 sm:$0xff]   ;;  %v6668_v63 = vld [vmem:[%s7412_s23 + $0x84] ss:$16 sps:$4 sm:$0xff]   ;;  %v6665_v1 = vld [vmem:[%s9492_s2 + $0x170] ss:$8 sps:$4 sm:$0xff]  }
  0x2e   : > { %v6670_v0 = vld [vmem:[%s7420_s20 + $0x84] ss:$16 sps:$4 sm:$0xff]   ;;  %v6672_v3 = vld [vmem:[%s7412_s23 + $0x80] ss:$16 sps:$4 sm:$0xff]   ;;  %vm4663_vm8 = vcmask 1044480   ;;  %vm3525_vm9 = vcmask 257024  }
  0x2f   : > { %v6675_v2 = vld [vmem:[%s9492_s2 + $0x184] ss:$8 sps:$4 sm:$0xff]   ;;  %v6676_v4 = vld [vmem:[%s7420_s20 + $0x80] ss:$16 sps:$4 sm:$0xff]   ;;  %v6679_v6 = vld [vmem:[%s9492_s2 + $0x194] ss:$8 sps:$4 sm:$0xff]  }
  0x30   : > { %1039 = vmatpush1.bf16.msra.mxu0 %v6592_v14  ;;  %1427 = vmatpush1.bf16.msra.mxu1 %v6592_v14  ;;  %v6673_v5 = vld [vmem:[%s9492_s2 + $0x180] ss:$8 sps:$4 sm:$0xff]   ;;  %v6680_v7 = vld [vmem:[%s7412_s23 + $0xa4] ss:$16 sps:$4 sm:$0xff]   ;;  %v6677_v9 = vld [vmem:[%s9492_s2 + $0x190] ss:$8 sps:$4 sm:$0xff]  }
  0x31   : > { %1040 = vmatprep.subr.bf16.mxu0 %v6593_v16  ;;  %1428 = vmatprep.subr.bf16.mxu1 %v6593_v16  ;;  %v6682_v8 = vld [vmem:[%s7420_s20 + $0xa4] ss:$16 sps:$4 sm:$0xff]   ;;  %v6684_v11 = vld [vmem:[%s7412_s23 + $0xa0] ss:$16 sps:$4 sm:$0xff]   ;;  %vm7257_vm10 = vmmov 0   ;;  %vm5233_vm11 = vcmask 982016  }
  0x32   : > { %v6687_v10 = vld [vmem:[%s9492_s2 + $0x1a4] ss:$8 sps:$4 sm:$0xff]   ;;  %v6688_v12 = vld [vmem:[%s7420_s20 + $0xa0] ss:$16 sps:$4 sm:$0xff]   ;;  %v6691_v14 = vld [vmem:[%s9492_s2 + $0x1b4] ss:$8 sps:$4 sm:$0xff]  }
  0x33   : > { %v6685_v13 = vld [vmem:[%s9492_s2 + $0x1a0] ss:$8 sps:$4 sm:$0xff]   ;;  %v6692_v15 = vld [vmem:[%s7412_s23 + $0xc4] ss:$16 sps:$4 sm:$0xff]   ;;  %vm5439_vm12 = vcmask 1041408   ;;  %vm5417_vm13 = vcmask 687104  }
  0x34   : > { %1041 = vmatpush1.bf16.msra.mxu0 %v6595_v17  ;;  %1429 = vmatpush1.bf16.msra.mxu1 %v6595_v17  ;;  %v6694_v16 = vld [vmem:[%s7420_s20 + $0xc4] ss:$16 sps:$4 sm:$0xff]   ;;  %v6689_v17 = vld [vmem:[%s9492_s2 + $0x1b0] ss:$8 sps:$4 sm:$0xff]   ;;  %s425_s29 = sand.u32 1, %s7245_s22  }
  0x35   : > { %1042 = vmatprep.subr.bf16.mxu0 %v6596_v18  ;;  %1430 = vmatprep.subr.bf16.mxu1 %v6596_v18  ;;  %v6699_v18 = vld [vmem:[%s9492_s2 + $0x1c4] ss:$8 sps:$4 sm:$0xff]   ;;  %s5623_s15 = sshll.u32 %s425_s29, 3  ;;  %s5535_s28 = scalar_lea.sflag [#allocation5], %s425_s29 }
  0x38   : > { %1043 = vmatpush1.bf16.msra.mxu0 %v6598_v19  ;;  %1431 = vmatpush1.bf16.msra.mxu1 %v6598_v19  ;;  %v6696_v19 = vld [vmem:[%s7412_s23 + $0xc0] ss:$16 sps:$4 sm:$0xff]  }
  0x39   : > { %1044 = vmatprep.subr.bf16.mxu0 %v6599_v20  ;;  %1432 = vmatprep.subr.bf16.mxu1 %v6599_v20  ;;  %v6700_v20 = vld [vmem:[%s7420_s20 + $0xc0] ss:$16 sps:$4 sm:$0xff]  }
  0x3c   : > { %1045 = vmatpush1.bf16.msra.mxu0 %v6601_v21  ;;  %1433 = vmatpush1.bf16.msra.mxu1 %v6601_v21  ;;  %v6697_v21 = vld [vmem:[%s9492_s2 + $0x1c0] ss:$8 sps:$4 sm:$0xff]  }
  0x3d   : > { %1046 = vmatprep.subr.bf16.mxu0 %v6602_v22  ;;  %1434 = vmatprep.subr.bf16.mxu1 %v6602_v22  ;;  %v6703_v22 = vld [vmem:[%s9492_s2 + $0x1d4] ss:$8 sps:$4 sm:$0xff]  }
  0x40   : > { %1047 = vmatpush1.bf16.msra.mxu0 %v6604_v23  ;;  %1435 = vmatpush1.bf16.msra.mxu1 %v6604_v23  ;;  %v6706_v23 = vld [vmem:[%s7412_s23 + $0xc] ss:$16 sps:$4 sm:$0xff]  }
  0x41   : > { %1048 = vmatprep.subr.bf16.mxu0 %v6605_v24  ;;  %1436 = vmatprep.subr.bf16.mxu1 %v6605_v24  ;;  %v6709_v24 = vld [vmem:[%s7420_s20 + $0xc] ss:$16 sps:$4 sm:$0xff]  }
  0x44   : > { %1049 = vmatpush1.bf16.msra.mxu0 %v6607_v25  ;;  %1437 = vmatpush1.bf16.msra.mxu1 %v6607_v25  ;;  %v6701_v25 = vld [vmem:[%s9492_s2 + $0x1d0] ss:$8 sps:$4 sm:$0xff]  }
  0x45   : > { %1050 = vmatprep.subr.bf16.mxu0 %v6608_v26  ;;  %1438 = vmatprep.subr.bf16.mxu1 %v6608_v26  ;;  %v6748_v26 = vld [vmem:[%s9494_s4 + $0xac] ss:$8 sps:$4 sm:$0xff]  }
  0x48   : > { %1051 = vmatpush1.bf16.msra.mxu0 %v6610_v27  ;;  %1439 = vmatpush1.bf16.msra.mxu1 %v6610_v27  ;;  %v6704_v27 = vld [vmem:[%s7412_s23 + $0x8] ss:$16 sps:$4 sm:$0xff]  }
  0x49   : > { %1052 = vmatprep.subr.bf16.mxu0 %v6611_v28  ;;  %1440 = vmatprep.subr.bf16.mxu1 %v6611_v28  ;;  %v6707_v28 = vld [vmem:[%s7420_s20 + $0x8] ss:$16 sps:$4 sm:$0xff]  }
  0x4c   : > { %1053 = vmatpush1.bf16.msra.mxu0 %v6613_v29  ;;  %1441 = vmatpush1.bf16.msra.mxu1 %v6613_v29  ;;  %v6710_v29 = vld [vmem:[%s7412_s23 + $0x2c] ss:$16 sps:$4 sm:$0xff]  }
  0x4d   : > { %1054 = vmatprep.subr.bf16.mxu0 %v6614_v30  ;;  %1442 = vmatprep.subr.bf16.mxu1 %v6614_v30  ;;  %v6712_v30 = vld [vmem:[%s7420_s20 + $0x2c] ss:$16 sps:$4 sm:$0xff]  }
  0x50   : > { %1055 = vmatpush1.bf16.msra.mxu0 %v6616_v31  ;;  %1443 = vmatpush1.bf16.msra.mxu1 %v6616_v31  ;;  %v6746_v31 = vld [vmem:[%s9494_s4 + $0xa8] ss:$8 sps:$4 sm:$0xff]  }
  0x51   : > { %1056 = vmatprep.subr.bf16.mxu0 %v6617_v32  ;;  %1444 = vmatprep.subr.bf16.mxu1 %v6617_v32  ;;  %v6751_v32 = vld [vmem:[%s9494_s4 + $0xbc] ss:$8 sps:$4 sm:$0xff]  }
  0x54   : > { %1057 = vmatpush1.bf16.msra.mxu0 %v6619_v33  ;;  %1445 = vmatpush1.bf16.msra.mxu1 %v6619_v33  ;;  %v6749_v33 = vld [vmem:[%s9494_s4 + $0xb8] ss:$8 sps:$4 sm:$0xff]  }
  0x55   : > { %1129 = vmatprep.subr.bf16.mxu0 %v6628_v34  ;;  %1517 = vmatprep.subr.bf16.mxu1 %v6628_v34  ;;  %v6754_v34 = vld [vmem:[%s9494_s4 + $0xcc] ss:$8 sps:$4 sm:$0xff]  }
  0x57   : > { %1059 = vmatmul.mubr.bf16.vlgmr.msra.gmra.mrb[0].mxu0 %v6620_v35  ;;  %1447 = vmatmul.mubr.bf16.vlgmr.msra.gmra.mrb[0].mxu1 %v6623_v36  ;;  %v6714_v35 = vld [vmem:[%s7412_s23 + $0x28] ss:$16 sps:$4 sm:$0xff]  }
  0x58   : > { %1130 = vmatpush1.bf16.msra.mxu0 %v6626_v37  ;;  %1518 = vmatpush1.bf16.msra.mxu1 %v6626_v37  ;;  %v6715_v36 = vld [vmem:[%s7420_s20 + $0x28] ss:$16 sps:$4 sm:$0xff]   ;;  %v6716_v37 = vld [vmem:[%s7412_s23 + $0x4c] ss:$16 sps:$4 sm:$0xff]  }
  0x59   : > { %1131 = vmatprep.subr.bf16.mxu0 %v6631_v38  ;;  %1519 = vmatprep.subr.bf16.mxu1 %v6631_v38  ;;  %v6718_v38 = vld [vmem:[%s7420_s20 + $0x4c] ss:$16 sps:$4 sm:$0xff]  }
  0x5a   : > { %1068 = vmatprep.mubr.bf16.mxu0 %v6632_v39  ;;  %1456 = vmatprep.mubr.bf16.mxu1 %v6634_v40  ;;  %v6752_v39 = vld [vmem:[%s9494_s4 + $0xc8] ss:$8 sps:$4 sm:$0xff]  }
  0x5b   : > { %v6720_v40 = vld [vmem:[%s7412_s23 + $0x48] ss:$16 sps:$4 sm:$0xff]  }
  0x5c   : > { %1132 = vmatpush1.bf16.msra.mxu0 %v6629_v41  ;;  %1520 = vmatpush1.bf16.msra.mxu1 %v6629_v41  ;;  %v6721_v41 = vld [vmem:[%s7420_s20 + $0x48] ss:$16 sps:$4 sm:$0xff]  }
  0x5d   : > { %1133 = vmatprep.subr.bf16.mxu0 %v6639_v42  ;;  %1521 = vmatprep.subr.bf16.mxu1 %v6639_v42  ;;  %v6722_v42 = vld [vmem:[%s7412_s23 + $0x6c] ss:$16 sps:$4 sm:$0xff]  }
  0x5f   : > { %1069 = vmatmul.mubr.bf16.gmra.mrb[4].mxu0 %v6636_v43  ;;  %1457 = vmatmul.mubr.bf16.gmra.mrb[4].mxu1 %v6640_v44  ;;  %v6724_v43 = vld [vmem:[%s7420_s20 + $0x6c] ss:$16 sps:$4 sm:$0xff]   ;;  %v6726_v44 = vld [vmem:[%s7412_s23 + $0x68] ss:$16 sps:$4 sm:$0xff]  }
  0x60   : > { %1134 = vmatpush1.bf16.msra.mxu0 %v6637_v45  ;;  %1522 = vmatpush1.bf16.msra.mxu1 %v6637_v45  ;;  %v6727_v45 = vld [vmem:[%s7420_s20 + $0x68] ss:$16 sps:$4 sm:$0xff]  }
  0x61   : > { %1135 = vmatprep.subr.bf16.mxu0 %v6643_v46  ;;  %1523 = vmatprep.subr.bf16.mxu1 %v6643_v46  ;;  %v6728_v46 = vld [vmem:[%s7412_s23 + $0x8c] ss:$16 sps:$4 sm:$0xff]  }
  0x62   : > { %1078 = vmatprep.mubr.bf16.mxu0 %v6644_v47  ;;  %1466 = vmatprep.mubr.bf16.mxu1 %v6646_v48  ;;  %v6730_v47 = vld [vmem:[%s7420_s20 + $0x8c] ss:$16 sps:$4 sm:$0xff]   ;;  %v6732_v48 = vld [vmem:[%s7412_s23 + $0x88] ss:$16 sps:$4 sm:$0xff]  }
  0x64   : > { %1136 = vmatpush1.bf16.msra.mxu0 %v6641_v49  ;;  %1524 = vmatpush1.bf16.msra.mxu1 %v6641_v49  ;;  %v6733_v49 = vld [vmem:[%s7420_s20 + $0x88] ss:$16 sps:$4 sm:$0xff]  }
  0x65   : > { %1137 = vmatprep.subr.bf16.mxu0 %v6651_v50  ;;  %1525 = vmatprep.subr.bf16.mxu1 %v6651_v50  ;;  %v6734_v50 = vld [vmem:[%s7412_s23 + $0xac] ss:$16 sps:$4 sm:$0xff]  }
  0x67   : > { %1079 = vmatmul.mubr.bf16.gmra.mrb[8].mxu0 %v6648_v51  ;;  %1467 = vmatmul.mubr.bf16.gmra.mrb[8].mxu1 %v6652_v52  ;;  %v6736_v51 = vld [vmem:[%s7420_s20 + $0xac] ss:$16 sps:$4 sm:$0xff]   ;;  %v6738_v52 = vld [vmem:[%s7412_s23 + $0xa8] ss:$16 sps:$4 sm:$0xff]  }
  0x68   : > { %1138 = vmatpush1.bf16.msra.mxu0 %v6649_v53  ;;  %1526 = vmatpush1.bf16.msra.mxu1 %v6649_v53  ;;  %v6739_v53 = vld [vmem:[%s7420_s20 + $0xa8] ss:$16 sps:$4 sm:$0xff]  }
  0x69   : > { %1139 = vmatprep.subr.bf16.mxu0 %v6655_v54  ;;  %1527 = vmatprep.subr.bf16.mxu1 %v6655_v54  ;;  %v6740_v54 = vld [vmem:[%s7412_s23 + $0xcc] ss:$16 sps:$4 sm:$0xff]  }
  0x6a   : > { %1088 = vmatprep.mubr.bf16.mxu0 %v6656_v56  ;;  %1476 = vmatprep.mubr.bf16.mxu1 %v6658_v57  ;;  %v6744_v56 = vld [vmem:[%s7412_s23 + $0xc8] ss:$16 sps:$4 sm:$0xff]   ;;  %s9431_s23 = scalar_lea.vmem [#allocation4], %s5623_s15  ;;  %s7258_s15 = smov [#allocation4]  }
  0x6b   : > { %v6745_v57 = vld [vmem:[%s7420_s20 + $0xc8] ss:$16 sps:$4 sm:$0xff]   ;;  %s5548_s18 = sshll.u32 %s9431_s23, 4  ;;  %s7195_s26 = sshll.u32 %s7258_s15, 4  ;;  %s9447_s18 = int_to_ptr.vmem [resolvable:$true] %s5548_s18  ;;  %s7196_s26 = int_to_ptr.vmem [resolvable:$false] %s7195_s26 }
  0x6c   : > { %1140 = vmatpush1.bf16.msra.mxu0 %v6653_v55  ;;  %1528 = vmatpush1.bf16.msra.mxu1 %v6653_v55  ;;  %v6742_v55 = vld [vmem:[%s7420_s20 + $0xcc] ss:$16 sps:$4 sm:$0xff]   ;;  %s6189_s20 = sshll.u32 %s7345_s25, 7  ;;  %s7191_s25 = scalar_lea.vmem %s9447_s18, 128 }
  0x6d   : > { %1141 = vmatprep.subr.bf16.mxu0 %v6663_v58  ;;  %1529 = vmatprep.subr.bf16.mxu1 %v6663_v58  ;;  %v6757_v58 = vld [vmem:[%s9494_s4 + $0xdc] ss:$8 sps:$4 sm:$0xff]   ;;  %s9445_s30 = scalar_lea.hbm %s9502_s12, %s6189_s20  ;;  %p7192_p11 = scmp.ne.s32.totalorder %s9447_s18, %s7191_s25 }
  0x6e   : > { %s7197_s17 = scalar_lea.vmem %s7196_s26, 256  ;;  %p7198_p0 = scmp.lt.s32.totalorder %s9447_s18, %s7196_s26 }
  0x6f   : > { %1089 = vmatmul.mubr.bf16.gmra.mrb[12].mxu0 %v6660_v59  ;;  %1477 = vmatmul.mubr.bf16.gmra.mrb[12].mxu1 %v6664_v60  ;;  %v6755_v59 = vld [vmem:[%s9494_s4 + $0xd8] ss:$8 sps:$4 sm:$0xff]   ;;  %v6760_v60 = vld [vmem:[%s9494_s4 + $0xec] ss:$8 sps:$4 sm:$0xff]   ;;  %p7193_p12 = pnand %p7192_p11, %p7362_p5  ;;  %p7199_p1 = scmp.lt.s32.totalorder %s7197_s17, %s7191_s25 }
  0x70   : > { %1142 = vmatpush1.bf16.msra.mxu0 %v6661_v61  ;;  %1530 = vmatpush1.bf16.msra.mxu1 %v6661_v61  ;;  %v6758_v61 = vld [vmem:[%s9494_s4 + $0xe8] ss:$8 sps:$4 sm:$0xff]  }
  0x71   : > { %1143 = vmatprep.subr.bf16.mxu0 %v6667_v62  ;;  %1531 = vmatprep.subr.bf16.mxu1 %v6667_v62  ;;  %v6763_v62 = vld [vmem:[%s9494_s4 + $0xfc] ss:$8 sps:$4 sm:$0xff]   ;;  %p7194_p13 = pneg %p7193_p12  ;;  %p7200_p2 = por %p7199_p1, %p7198_p0 }
  0x72   : > { %1098 = vmatprep.mubr.bf16.mxu0 %v6668_v63  ;;  %1486 = vmatprep.mubr.bf16.mxu1 %v6670_v0  ;;  %v6761_v63 = vld [vmem:[%s9494_s4 + $0xf8] ss:$8 sps:$4 sm:$0xff]   ;;  %v6766_v0 = vld [vmem:[%s9494_s4 + $0x10c] ss:$8 sps:$4 sm:$0xff]  }
  0x73   : > { %p7201_p3 = pnand %p7200_p2, %p7194_p13 }
  0x74   : > { %1144 = vmatpush1.bf16.msra.mxu0 %v6665_v1  ;;  %1532 = vmatpush1.bf16.msra.mxu1 %v6665_v1  ;;  %v6764_v1 = vld [vmem:[%s9494_s4 + $0x108] ss:$8 sps:$4 sm:$0xff]  }
  0x75   : > { %1145 = vmatprep.subr.bf16.mxu0 %v6675_v2  ;;  %1533 = vmatprep.subr.bf16.mxu1 %v6675_v2  ;;  %v6769_v2 = vld [vmem:[%s9494_s4 + $0x11c] ss:$8 sps:$4 sm:$0xff]  }
  0x77   : > { %1099 = vmatmul.mubr.bf16.gmra.mrb[16].mxu0 %v6672_v3  ;;  %1487 = vmatmul.mubr.bf16.gmra.mrb[16].mxu1 %v6676_v4  ;;  %v6767_v3 = vld [vmem:[%s9494_s4 + $0x118] ss:$8 sps:$4 sm:$0xff]   ;;  %v6772_v4 = vld [vmem:[%s9494_s4 + $0x12c] ss:$8 sps:$4 sm:$0xff]  }
  0x78   : > { %1146 = vmatpush1.bf16.msra.mxu0 %v6673_v5  ;;  %1534 = vmatpush1.bf16.msra.mxu1 %v6673_v5  ;;  %v6770_v5 = vld [vmem:[%s9494_s4 + $0x128] ss:$8 sps:$4 sm:$0xff]  }
  0x79   : > { %1147 = vmatprep.subr.bf16.mxu0 %v6679_v6  ;;  %1535 = vmatprep.subr.bf16.mxu1 %v6679_v6  ;;  %v6775_v6 = vld [vmem:[%s9494_s4 + $0x13c] ss:$8 sps:$4 sm:$0xff]  }
  0x7a   : > { %1108 = vmatprep.mubr.bf16.mxu0 %v6680_v7  ;;  %1496 = vmatprep.mubr.bf16.mxu1 %v6682_v8  ;;  %v6773_v7 = vld [vmem:[%s9494_s4 + $0x138] ss:$8 sps:$4 sm:$0xff]   ;;  %v5778_v8 = vld [vmem:[%s9494_s4 + $0x148] sm:$0xff] }
  0x7c   : > { %1148 = vmatpush1.bf16.msra.mxu0 %v6677_v9  ;;  %1536 = vmatpush1.bf16.msra.mxu1 %v6677_v9  ;;  %v5800_v9 = vcombine.high %v5778_v8, %v5778_v8 }
  0x7d   : > { %1149 = vmatprep.subr.bf16.mxu0 %v6687_v10  ;;  %1537 = vmatprep.subr.bf16.mxu1 %v6687_v10  ;;  %v5799_v10 = vcombine.low %v5778_v8, %v5778_v8 }
  0x7f   : > { %1109 = vmatmul.mubr.bf16.gmra.mrb[20].mxu0 %v6684_v11  ;;  %1497 = vmatmul.mubr.bf16.gmra.mrb[20].mxu1 %v6688_v12  ;;  %v2044_v11 = vsel %vm2042_vm1, %v5799_v10, 0  ;;  %v6780_v12 = vld [vmem:[%s9494_s4 + $0x4] ss:$8 sps:$4 sm:$0xff]  }
  0x80   : > { %1150 = vmatpush1.bf16.msra.mxu0 %v6685_v13  ;;  %1538 = vmatpush1.bf16.msra.mxu1 %v6685_v13  ;;  %v561_v13 = vlaneseq }
  0x81   : > { %1151 = vmatprep.subr.bf16.mxu0 %v6691_v14  ;;  %1539 = vmatprep.subr.bf16.mxu1 %v6691_v14 }
  0x82   : > { %1118 = vmatprep.mubr.bf16.mxu0 %v6692_v15  ;;  %1506 = vmatprep.mubr.bf16.mxu1 %v6694_v16  ;;  %v7701_v14 = vshrl.u32 %v561_v13, 7  ;;  %v559_v16 = vld [vmem:[%s9493_s3] sm:$0x3] }
  0x84   : > { %1152 = vmatpush1.bf16.msra.mxu0 %v6689_v17  ;;  %1540 = vmatpush1.bf16.msra.mxu1 %v6689_v17  ;;  %v9505_v15 = vsub.s32 0, %v7701_v14  ;;  %v9504_v17 = vsub.s32 1, %v7701_v14 }
  0x85   : > { %1153 = vmatprep.subr.bf16.mxu0 %v6699_v18  ;;  %1541 = vmatprep.subr.bf16.mxu1 %v6699_v18 }
  0x86   : > { %v7710_v18 = vrot.slane %v559_v16, %v9505_v15 }
  0x87   : > { %1119 = vmatmul.mubr.bf16.gmra.mrb[24].mxu0 %v6696_v19  ;;  %1507 = vmatmul.mubr.bf16.gmra.mrb[24].mxu1 %v6700_v20  ;;  %v7714_v19 = vrot.slane %v559_v16, %v9504_v17 }
  0x88   : > { %1154 = vmatpush1.bf16.msra.mxu0 %v6697_v21  ;;  %1542 = vmatpush1.bf16.msra.mxu1 %v6697_v21 }
  0x89   : > { %1155 = vmatprep.subr.bf16.mxu0 %v6703_v22  ;;  %1543 = vmatprep.subr.bf16.mxu1 %v6703_v22 }
  0x8a   : > { %5716 = vmatprep.mubr.msk.bf16.mxu0 %vm1004_vm0, %v6706_v23  ;;  %5751 = vmatprep.mubr.msk.bf16.mxu1 %vm1004_vm0, %v6709_v24 }
  0x8c   : > { %1156 = vmatpush1.bf16.msra.mxu0 %v6701_v25  ;;  %1544 = vmatpush1.bf16.msra.mxu1 %v6701_v25 }
  0x8d   : > { %2049 = vmatprep.subr.bf16.mxu0 %v6748_v26 }
  0x8f   : > { %1162 = vmatmul.mubr.bf16.vlgmr.msra.gmra.mrb[0].mxu0 %v6704_v27  ;;  %1550 = vmatmul.mubr.bf16.vlgmr.msra.gmra.mrb[0].mxu1 %v6707_v28 }
  0x90   : > { %5717 = vmatprep.mubr.msk.bf16.mxu0 %vm1004_vm0, %v6710_v29  ;;  %5752 = vmatprep.mubr.msk.bf16.mxu1 %vm1004_vm0, %v6712_v30 }
  0x91   : > { %2050 = vmatpush1.bf16.msra.mxu0 %v6746_v31 }
  0x92   : > { %2051 = vmatprep.subr.bf16.mxu0 %v6751_v32 }
  0x95   : > { %2052 = vmatpush1.bf16.msra.mxu0 %v6749_v33 }
  0x96   : > { %2053 = vmatprep.subr.bf16.mxu0 %v6754_v34 }
  0x97   : > { %1172 = vmatmul.mubr.bf16.gmra.mrb[4].mxu0 %v6714_v35  ;;  %1560 = vmatmul.mubr.bf16.gmra.mrb[4].mxu1 %v6715_v36 }
  0x98   : > { %5718 = vmatprep.mubr.msk.bf16.mxu0 %vm1004_vm0, %v6716_v37  ;;  %5753 = vmatprep.mubr.msk.bf16.mxu1 %vm1004_vm0, %v6718_v38 }
  0x99   : > { %2054 = vmatpush1.bf16.msra.mxu0 %v6752_v39 }
  0x9a   : > { %2055 = vmatprep.subr.bf16.mxu0 %v6757_v58 }
  0x9d   : > { %2056 = vmatpush1.bf16.msra.mxu0 %v6755_v59 }
  0x9e   : > { %2057 = vmatprep.subr.bf16.mxu0 %v6760_v60 }
  0x9f   : > { %1182 = vmatmul.mubr.bf16.gmra.mrb[8].mxu0 %v6720_v40  ;;  %1570 = vmatmul.mubr.bf16.gmra.mrb[8].mxu1 %v6721_v41 }
  0xa0   : > { %5719 = vmatprep.mubr.msk.bf16.mxu0 %vm1004_vm0, %v6722_v42  ;;  %5754 = vmatprep.mubr.msk.bf16.mxu1 %vm1004_vm0, %v6724_v43 }
  0xa1   : > { %2058 = vmatpush1.bf16.msra.mxu0 %v6758_v61 }
  0xa2   : > { %2059 = vmatprep.subr.bf16.mxu0 %v6763_v62 }
  0xa5   : > { %2060 = vmatpush1.bf16.msra.mxu0 %v6761_v63 }
  0xa6   : > { %2061 = vmatprep.subr.bf16.mxu0 %v6766_v0 }
  0xa7   : > { %1192 = vmatmul.mubr.bf16.gmra.mrb[12].mxu0 %v6726_v44  ;;  %1580 = vmatmul.mubr.bf16.gmra.mrb[12].mxu1 %v6727_v45 }
  0xa8   : > { %5720 = vmatprep.mubr.msk.bf16.mxu0 %vm1004_vm0, %v6728_v46  ;;  %5755 = vmatprep.mubr.msk.bf16.mxu1 %vm1004_vm0, %v6730_v47 }
  0xa9   : > { %2062 = vmatpush1.bf16.msra.mxu0 %v6764_v1 }
  0xaa   : > { %2063 = vmatprep.subr.bf16.mxu0 %v6769_v2 }
  0xad   : > { %2064 = vmatpush1.bf16.msra.mxu0 %v6767_v3 }
  0xae   : > { %2065 = vmatprep.subr.bf16.mxu0 %v6772_v4 }
  0xaf   : > { %1202 = vmatmul.mubr.bf16.gmra.mrb[16].mxu0 %v6732_v48  ;;  %1590 = vmatmul.mubr.bf16.gmra.mrb[16].mxu1 %v6733_v49 }
  0xb0   : > { %5721 = vmatprep.mubr.msk.bf16.mxu0 %vm1004_vm0, %v6734_v50  ;;  %5756 = vmatprep.mubr.msk.bf16.mxu1 %vm1004_vm0, %v6736_v51 }
  0xb1   : > { %2066 = vmatpush1.bf16.msra.mxu0 %v6770_v5 }
  0xb2   : > { %2067 = vmatprep.subr.bf16.mxu0 %v6775_v6 }
  0xb5   : > { %2068 = vmatpush1.bf16.msra.mxu0 %v6773_v7 }
  0xb6   : > { %5801 = vmatprep.subr.msk.bf16.mxu0 %vm2042_vm1, %v5800_v9 }
  0xb7   : > { %1212 = vmatmul.mubr.bf16.gmra.mrb[20].mxu0 %v6738_v52  ;;  %1600 = vmatmul.mubr.bf16.gmra.mrb[20].mxu1 %v6739_v53 }
  0xb8   : > { %5722 = vmatprep.mubr.msk.bf16.mxu0 %vm1004_vm0, %v6740_v54  ;;  %5757 = vmatprep.mubr.msk.bf16.mxu1 %vm1004_vm0, %v6742_v55 }
  0xb9   : > { %2070 = vmatpush1.bf16.msra.mxu0 %v2044_v11 }
  0xba   : > { %2279 = vmatprep.subr.bf16.mxu0 %v6780_v12 }
  0xbf   : > { %1222 = vmatmul.mubr.bf16.gmra.mrb[24].mxu0 %v6744_v56  ;;  %1610 = vmatmul.mubr.bf16.gmra.mrb[24].mxu1 %v6745_v57 }
 0x162   : > { %v1163_v20 = vpop.f32.mrb[0].mxu0  ;;  %v1551_v21 = vpop.f32.mrb[0].mxu1 }
 0x163   : > { %v6306_v22 = vadd.f32 %v1163_v20, %v7710_v18  ;;  %v6334_v23 = vadd.f32 %v1551_v21, %v7710_v18  ;;  %v1165_v24 = vpop.f32.mrb[1].mxu0  ;;  %v1553_v25 = vpop.f32.mrb[1].mxu1 }
 0x164   : > { %v6307_v26 = vadd.f32 %v1165_v24, %v7714_v19  ;;  %v6335_v27 = vadd.f32 %v1553_v25, %v7714_v19  ;;  %v1167_v28 = vpop.f32.mrb[2].mxu0  ;;  %v1555_v29 = vpop.f32.mrb[2].mxu1 }
 0x165   : > { %6970 = vtanh.f32 %v6306_v22  ;;  %v6308_v30 = vadd.f32 %v1167_v28, %v7710_v18  ;;  %v1169_v31 = vpop.f32.mrb[3].mxu0  ;;  %v1557_v32 = vpop.f32.mrb[3].mxu1  ;;  %v6336_v33 = vadd.f32 %v1555_v29, %v7710_v18 }
 0x166   : > { %6972 = vtanh.f32 %v6334_v23  ;;  %v6309_v34 = vadd.f32 %v1169_v31, %v7714_v19  ;;  %v6337_v35 = vadd.f32 %v1557_v32, %v7714_v19 }
 0x167   : > { %6974 = vtanh.f32 %v6307_v26 }
 0x168   : > { %6976 = vtanh.f32 %v6335_v27 }
 0x169   : > { %6978 = vtanh.f32 %v6308_v30 }
 0x16a   : > { %6980 = vtanh.f32 %v6336_v33  ;;  %v1173_v36 = vpop.f32.mrb[4].mxu0  ;;  %v1561_v37 = vpop.f32.mrb[4].mxu1 }
 0x16b   : > { %6982 = vtanh.f32 %v6309_v34  ;;  %v6310_v38 = vadd.f32 %v1173_v36, %v7710_v18  ;;  %v6338_v39 = vadd.f32 %v1561_v37, %v7710_v18  ;;  %v1175_v40 = vpop.f32.mrb[5].mxu0  ;;  %v1563_v41 = vpop.f32.mrb[5].mxu1 }
 0x16c   : > { %6984 = vtanh.f32 %v6337_v35  ;;  %v6311_v42 = vadd.f32 %v1175_v40, %v7714_v19  ;;  %v6339_v43 = vadd.f32 %v1563_v41, %v7714_v19  ;;  %v1177_v44 = vpop.f32.mrb[6].mxu0  ;;  %v1565_v45 = vpop.f32.mrb[6].mxu1 }
 0x16d   : > { %6986 = vtanh.f32 %v6310_v38  ;;  %v6312_v46 = vadd.f32 %v1177_v44, %v7710_v18  ;;  %v1179_v47 = vpop.f32.mrb[7].mxu0  ;;  %v1567_v48 = vpop.f32.mrb[7].mxu1  ;;  %v6340_v49 = vadd.f32 %v1565_v45, %v7710_v18 }
 0x16e   : > { %6988 = vtanh.f32 %v6338_v39  ;;  %v6313_v51 = vadd.f32 %v1179_v47, %v7714_v19  ;;  %v6341_v53 = vadd.f32 %v1567_v48, %v7714_v19 }
 0x16f   : > { %v6971_v50 = vpop.eup %6970  ;;  %6990 = vtanh.f32 %v6311_v42 }
 0x170   : > { %v6973_v52 = vpop.eup %6972  ;;  %6992 = vtanh.f32 %v6339_v43 }
 0x171   : > { %v6975_v54 = vpop.eup %6974  ;;  %v7732_v55 = vadd.f32 %v6973_v52, %v6971_v50  ;;  %6994 = vtanh.f32 %v6312_v46 }
 0x172   : > { %v6977_v56 = vpop.eup %6976  ;;  %6996 = vtanh.f32 %v6340_v49  ;;  %v1183_v57 = vpop.f32.mrb[8].mxu0 }
 0x173   : > { %v1571_v58 = vpop.f32.mrb[8].mxu1  ;;  %v6979_v59 = vpop.eup %6978  ;;  %1676 = vst [vmem:[#allocation2] sm:$0xff] %v7732_v55  ;;  %v1649_v60 = vadd.f32 %v6977_v56, %v6975_v54  ;;  %6998 = vtanh.f32 %v6313_v51  ;;  %v6314_v61 = vadd.f32 %v1183_v57, %v7710_v18 }
 0x174   : > { %v6342_v62 = vadd.f32 %v1571_v58, %v7710_v18  ;;  %v1185_v63 = vpop.f32.mrb[9].mxu0  ;;  %v1573_v0 = vpop.f32.mrb[9].mxu1  ;;  %7000 = vtanh.f32 %v6341_v53 }
 0x175   : > { %v6981_v1 = vpop.eup %6980  ;;  %v6315_v2 = vadd.f32 %v1185_v63, %v7714_v19  ;;  %v6343_v3 = vadd.f32 %v1573_v0, %v7714_v19  ;;  %v1187_v4 = vpop.f32.mrb[10].mxu0  ;;  %1678 = vst.msk [vmem:[#allocation2 + $0x8] sm:$0xff] %vm1677_vm2, %v1649_v60  ;;  %7002 = vtanh.f32 %v6314_v61 }
 0x176   : > { %v1575_v5 = vpop.f32.mrb[10].mxu1  ;;  %v6983_v6 = vpop.eup %6982  ;;  %v7740_v7 = vadd.f32 %v6981_v1, %v6979_v59  ;;  %v6316_v8 = vadd.f32 %v1187_v4, %v7710_v18  ;;  %7004 = vtanh.f32 %v6342_v62 }
 0x177   : > { %v1189_v9 = vpop.f32.mrb[11].mxu0  ;;  %v1577_v10 = vpop.f32.mrb[11].mxu1  ;;  %v6344_v12 = vadd.f32 %v1575_v5, %v7710_v18  ;;  %7006 = vtanh.f32 %v6315_v2 }
 0x178   : > { %v6985_v11 = vpop.eup %6984  ;;  %1679 = vst [vmem:[#allocation2 + $0x10] sm:$0xff] %v7740_v7  ;;  %v6317_v20 = vadd.f32 %v1189_v9, %v7714_v19  ;;  %7008 = vtanh.f32 %v6343_v3  ;;  %v6345_v23 = vadd.f32 %v1577_v10, %v7714_v19 }
 0x179   : > { %v6987_v13 = vpop.eup %6986  ;;  %v1651_v16 = vadd.f32 %v6985_v11, %v6983_v6  ;;  %7010 = vtanh.f32 %v6316_v8 }
 0x17a   : > { %v6989_v22 = vpop.eup %6988  ;;  %7012 = vtanh.f32 %v6344_v12  ;;  %v1193_v27 = vpop.f32.mrb[12].mxu0  ;;  %v1768_v29 = vld [vmem:[#allocation2] sm:$0xfe] }
 0x17b   : > { %v6991_v24 = vpop.eup %6990  ;;  %1680 = vst.msk [vmem:[#allocation2 + $0x18] sm:$0xff] %vm1677_vm2, %v1651_v16  ;;  %v1652_v25 = vadd.f32 %v6989_v22, %v6987_v13  ;;  %v1581_v28 = vpop.f32.mrb[12].mxu1  ;;  %7014 = vtanh.f32 %v6317_v20  ;;  %v6318_v32 = vadd.f32 %v1193_v27, %v7710_v18  ;;  %v7757_v46 = vpack.c.bf16 %v7740_v7, %v1768_v29 }
 0x17c   : > { %v6993_v26 = vpop.eup %6992  ;;  %v6346_v33 = vadd.f32 %v1581_v28, %v7710_v18  ;;  %v1195_v34 = vpop.f32.mrb[13].mxu0  ;;  %7016 = vtanh.f32 %v6345_v23  ;;  %v1769_v59 = vld [vmem:[#allocation2 + $0x8] sm:$0xfe] }
 0x17d   : > { %v6995_v30 = vpop.eup %6994  ;;  %v1653_v31 = vadd.f32 %v6993_v26, %v6991_v24  ;;  %v1583_v35 = vpop.f32.mrb[13].mxu1  ;;  %v6319_v37 = vadd.f32 %v1195_v34, %v7714_v19  ;;  %7018 = vtanh.f32 %v6318_v32  ;;  %v1802_v60 = vshll.u32 %v7757_v46, 16 }
 0x17e   : > { %v6997_v36 = vpop.eup %6996  ;;  %v6347_v38 = vadd.f32 %v1583_v35, %v7714_v19  ;;  %v1197_v39 = vpop.f32.mrb[14].mxu0  ;;  %7020 = vtanh.f32 %v6346_v33 }
 0x17f   : > { %v1585_v40 = vpop.f32.mrb[14].mxu1  ;;  %v6999_v41 = vpop.eup %6998  ;;  %1682 = vst.msk [vmem:[#allocation2 + $0x28] sm:$0xff] %vm1677_vm2, %v1653_v31  ;;  %v1654_v42 = vadd.f32 %v6997_v36, %v6995_v30  ;;  %v6320_v43 = vadd.f32 %v1197_v39, %v7710_v18  ;;  %7022 = vtanh.f32 %v6319_v37  ;;  %v1804_v24 = vrot.slane %v1802_v60, 1 }
 0x180   : > { %v1199_v44 = vpop.f32.mrb[15].mxu0  ;;  %v1587_v45 = vpop.f32.mrb[15].mxu1  ;;  %v6348_v48 = vadd.f32 %v1585_v40, %v7710_v18  ;;  %7024 = vtanh.f32 %v6347_v38  ;;  %v1800_v36 = vshrl.u32 %v7757_v46, 16 }
 0x181   : > { %v7001_v47 = vpop.eup %7000  ;;  %v6321_v51 = vadd.f32 %v1199_v44, %v7714_v19  ;;  %v7761_v52 = vpack.c.bf16 %v1654_v42, %v1652_v25  ;;  %v6349_v54 = vadd.f32 %v1587_v45, %v7714_v19  ;;  %7026 = vtanh.f32 %v6320_v43 }
 0x182   : > { %v7003_v49 = vpop.eup %7002  ;;  %v1655_v50 = vadd.f32 %v7001_v47, %v6999_v41  ;;  %v7764_v56 = vld [vmem:[#allocation2 + $0x18] sm:$0xff]  ;;  %7028 = vtanh.f32 %v6348_v48  ;;  %v1203_v62 = vpop.f32.mrb[16].mxu0  ;;  %v1805_v47 = vor.u32 %v1804_v24, %v1800_v36 }
 0x183   : > { %v7005_v53 = vpop.eup %7004  ;;  %v1591_v63 = vpop.f32.mrb[16].mxu1  ;;  %v7769_v0 = vpack.c.bf16 %v7764_v56, %v1769_v59  ;;  %7030 = vtanh.f32 %v6321_v51  ;;  %v6322_v3 = vadd.f32 %v1203_v62, %v7710_v18  ;;  %v1807_v28 = vshll.u32 %v7761_v52, 16  ;;  %v6783_v24 = vld [vmem:[%s9494_s4 + $0x14] ss:$8 sps:$4 sm:$0xff]  }
 0x184   : > { %v7007_v57 = vpop.eup %7006  ;;  %1684 = vst.msk [vmem:[#allocation2 + $0x38] sm:$0xff] %vm1677_vm2, %v1655_v50  ;;  %v1656_v58 = vadd.f32 %v7005_v53, %v7003_v49  ;;  %v6350_v4 = vadd.f32 %v1591_v63, %v7710_v18  ;;  %v1205_v5 = vpop.f32.mrb[17].mxu0  ;;  %7032 = vtanh.f32 %v6349_v54 }
 0x185   : > { %v7009_v61 = vpop.eup %7008  ;;  %v1593_v6 = vpop.f32.mrb[17].mxu1  ;;  %v6323_v9 = vadd.f32 %v1205_v5, %v7714_v19  ;;  %7034 = vtanh.f32 %v6322_v3  ;;  %v1814_v27 = vshll.u32 %v7769_v0, 16  ;;  %v1812_v41 = vshrl.u32 %v7769_v0, 16 }
 0x186   : > { %v7011_v1 = vpop.eup %7010  ;;  %v1657_v2 = vadd.f32 %v7009_v61, %v7007_v57  ;;  %v6351_v10 = vadd.f32 %v1593_v6, %v7714_v19  ;;  %v1207_v11 = vpop.f32.mrb[18].mxu0  ;;  %7036 = vtanh.f32 %v6350_v4  ;;  %v1710_v34 = vld [vmem:[#allocation2 + $0x28] sm:$0xff]  ;;  %v1809_v46 = vrot.slane %v1807_v28, 1 }
 0x187   : > { %v7013_v8 = vpop.eup %7012  ;;  %v1595_v12 = vpop.f32.mrb[18].mxu1  ;;  %v6324_v20 = vadd.f32 %v1207_v11, %v7710_v18  ;;  %7038 = vtanh.f32 %v6323_v9  ;;  %v1816_v45 = vrot.slane %v1814_v27, 1  ;;  %v1823_v4 = vshrl.u32 %v7761_v52, 16 }
 0x188   : > { %v7015_v13 = vpop.eup %7014  ;;  %1686 = vst.msk [vmem:[#allocation2 + $0x48] sm:$0xff] %vm1677_vm2, %v1657_v2  ;;  %v1658_v16 = vadd.f32 %v7013_v8, %v7011_v1  ;;  %v1209_v22 = vpop.f32.mrb[19].mxu0  ;;  %v6352_v26 = vadd.f32 %v1595_v12, %v7710_v18  ;;  %7040 = vtanh.f32 %v6351_v10 }
 0x189   : > { %v1597_v23 = vpop.f32.mrb[19].mxu1  ;;  %v7017_v25 = vpop.eup %7016  ;;  %v6325_v31 = vadd.f32 %v1209_v22, %v7714_v19  ;;  %7042 = vtanh.f32 %v6324_v20  ;;  %v1817_v8 = vor.u32 %v1816_v45, %v1812_v41 }
 0x18a   : > { %v7019_v29 = vpop.eup %7018  ;;  %v1659_v30 = vadd.f32 %v7017_v25, %v7015_v13  ;;  %v6353_v33 = vadd.f32 %v1597_v23, %v7714_v19  ;;  %v7783_v37 = vpack.c.bf16 %v1658_v16, %v1656_v58  ;;  %7044 = vtanh.f32 %v6352_v26  ;;  %v1213_v43 = vpop.f32.mrb[20].mxu0  ;;  %v6778_v16 = vld [vmem:[%s9494_s4] ss:$8 sps:$4 sm:$0xff]  }
 0x18b   : > { %v7021_v32 = vpop.eup %7020  ;;  %v1712_v35 = vld [vmem:[#allocation2 + $0x38] sm:$0xff]  ;;  %v1601_v44 = vpop.f32.mrb[20].mxu1  ;;  %7046 = vtanh.f32 %v6325_v31  ;;  %v6326_v50 = vadd.f32 %v1213_v43, %v7710_v18  ;;  %v1810_v13 = vsel %vm1798_vm3, %v1805_v47, %v1809_v46 }
 0x18c   : > { %v7023_v38 = vpop.eup %7022  ;;  %1688 = vst.msk [vmem:[#allocation2 + $0x58] sm:$0xff] %vm1677_vm2, %v1659_v30  ;;  %v1660_v39 = vadd.f32 %v7021_v32, %v7019_v29  ;;  %v7786_v40 = vpack.c.bf16 %v1712_v35, %v1710_v34  ;;  %v6354_v51 = vadd.f32 %v1601_v44, %v7710_v18  ;;  %v1215_v53 = vpop.f32.mrb[21].mxu0  ;;  %7048 = vtanh.f32 %v6353_v33  ;;  %v6781_v47 = vld [vmem:[%s9494_s4 + $0x10] ss:$8 sps:$4 sm:$0xff]  }
 0x18d   : > { %v7025_v42 = vpop.eup %7024  ;;  %v1603_v54 = vpop.f32.mrb[21].mxu1  ;;  %v6327_v58 = vadd.f32 %v1215_v53, %v7714_v19  ;;  %7050 = vtanh.f32 %v6326_v50  ;;  %v1827_v32 = vshll.u32 %v7783_v37, 16 }
 0x18e   : > { %v7027_v48 = vpop.eup %7026  ;;  %v1661_v49 = vadd.f32 %v7025_v42, %v7023_v38  ;;  %v6355_v59 = vadd.f32 %v1603_v54, %v7714_v19  ;;  %v1217_v60 = vpop.f32.mrb[22].mxu0  ;;  %v1819_v62 = vshll.u32 %v7786_v40, 16  ;;  %7052 = vtanh.f32 %v6354_v51  ;;  %v6786_v54 = vld [vmem:[%s9494_s4 + $0x24] ss:$8 sps:$4 sm:$0xff]  }
 0x18f   : > { %v7029_v57 = vpop.eup %7028  ;;  %v1605_v61 = vpop.f32.mrb[22].mxu1  ;;  %v6328_v1 = vadd.f32 %v1217_v60, %v7710_v18  ;;  %7054 = vtanh.f32 %v6327_v58  ;;  %v1714_v25 = vld [vmem:[#allocation2 + $0x48] sm:$0xff]  ;;  %v1831_v36 = vshrl.u32 %v7786_v40, 16  ;;  %v1825_v38 = vor.u32 %v1823_v4, %v1809_v46 }
 0x190   : > { %v7031_v63 = vpop.eup %7030  ;;  %1690 = vst.msk [vmem:[#allocation2 + $0x68] sm:$0xff] %vm1677_vm2, %v1661_v49  ;;  %v1662_v0 = vadd.f32 %v7029_v57, %v7027_v48  ;;  %v1219_v2 = vpop.f32.mrb[23].mxu0  ;;  %v6356_v6 = vadd.f32 %v1605_v61, %v7710_v18  ;;  %v1821_v9 = vrot.slane %v1819_v62, 1  ;;  %7056 = vtanh.f32 %v6355_v59 }
 0x191   : > { %v1607_v3 = vpop.f32.mrb[23].mxu1  ;;  %v7033_v5 = vpop.eup %7032  ;;  %v6329_v12 = vadd.f32 %v1219_v2, %v7714_v19  ;;  %7058 = vtanh.f32 %v6328_v1 }
 0x192   : > { %v7035_v10 = vpop.eup %7034  ;;  %v1663_v11 = vadd.f32 %v7033_v5, %v7031_v63  ;;  %v1822_v22 = vsel %vm1798_vm3, %v1817_v8, %v1821_v9  ;;  %v6357_v23 = vadd.f32 %v1607_v3, %v7714_v19  ;;  %v7812_v27 = vpack.c.bf16 %v1662_v0, %v1660_v39  ;;  %v1223_v34 = vpop.f32.mrb[24].mxu0 }
 0x193   : > { %v7037_v20 = vpop.eup %7036  ;;  %v1716_v26 = vld [vmem:[#allocation2 + $0x58] sm:$0xff]  ;;  %5802 = vmatprep.mubr.msk.bf16.mxu0 %vm1677_vm2, %v1822_v22  ;;  %7060 = vtanh.f32 %v6356_v6  ;;  %v1611_v35 = vpop.f32.mrb[24].mxu1  ;;  %v6330_v42 = vadd.f32 %v1223_v34, %v7710_v18  ;;  %v1829_v63 = vrot.slane %v1827_v32, 1  ;;  %v1833_v2 = vor.u32 %v1831_v36, %v1821_v9 }
 0x194   : > { %v7039_v29 = vpop.eup %7038  ;;  %1692 = vst.msk [vmem:[#allocation2 + $0x78] sm:$0xff] %vm1677_vm2, %v1663_v11  ;;  %v1664_v30 = vadd.f32 %v7037_v20, %v7035_v10  ;;  %v7816_v31 = vpack.c.bf16 %v1716_v26, %v1714_v25  ;;  %2082 = vmatmul.mubr.bf16.vlgmr.msra.gmra.mrb[28].mxu0 %v1810_v13  ;;  %7062 = vtanh.f32 %v6329_v12  ;;  %v6358_v43 = vadd.f32 %v1611_v35, %v7710_v18  ;;  %v1225_v44 = vpop.f32.mrb[25].mxu0  ;;  %v6784_v10 = vld [vmem:[%s9494_s4 + $0x20] ss:$8 sps:$4 sm:$0xff]   ;;  %v6789_v20 = vld [vmem:[%s9494_s4 + $0x34] ss:$8 sps:$4 sm:$0xff]  }
 0x195   : > { %v7041_v33 = vpop.eup %7040  ;;  %2280 = vmatpush1.bf16.msra.mxu0 %v6778_v16  ;;  %v1613_v45 = vpop.f32.mrb[25].mxu1  ;;  %7064 = vtanh.f32 %v6357_v23  ;;  %v6331_v49 = vadd.f32 %v1225_v44, %v7714_v19  ;;  %v1843_v11 = vshll.u32 %v7812_v27, 16  ;;  %v1830_v25 = vsel %vm1798_vm3, %v1825_v38, %v1829_v63  ;;  %v6787_v35 = vld [vmem:[%s9494_s4 + $0x30] ss:$8 sps:$4 sm:$0xff]  }
 0x196   : > { %v7043_v39 = vpop.eup %7042  ;;  %v1665_v41 = vadd.f32 %v7041_v33, %v7039_v29  ;;  %v6359_v46 = vadd.f32 %v1613_v45, %v7714_v19  ;;  %2281 = vmatprep.subr.bf16.mxu0 %v6783_v24  ;;  %v1227_v50 = vpop.f32.mrb[26].mxu0  ;;  %v1835_v53 = vshll.u32 %v7816_v31, 16  ;;  %7066 = vtanh.f32 %v6330_v42 }
 0x197   : > { %v7045_v48 = vpop.eup %7044  ;;  %v1615_v51 = vpop.f32.mrb[26].mxu1  ;;  %v6332_v59 = vadd.f32 %v1227_v50, %v7710_v18  ;;  %7068 = vtanh.f32 %v6358_v43  ;;  %v1718_v13 = vld [vmem:[#allocation2 + $0x68] sm:$0xff]  ;;  %v1839_v38 = vshrl.u32 %v7783_v37, 16  ;;  %v1845_v42 = vrot.slane %v1843_v11, 1 }
 0x198   : > { %v7047_v57 = vpop.eup %7046  ;;  %1694 = vst.msk [vmem:[#allocation2 + $0x88] sm:$0xff] %vm1677_vm2, %v1665_v41  ;;  %v1666_v58 = vadd.f32 %v7045_v48, %v7043_v39  ;;  %v1229_v60 = vpop.f32.mrb[27].mxu0  ;;  %v6360_v1 = vadd.f32 %v1615_v51, %v7710_v18  ;;  %v1837_v3 = vrot.slane %v1835_v53, 1  ;;  %7070 = vtanh.f32 %v6331_v49  ;;  %v2383_v39 = vld [vmem:[#allocation2 + $0x8] sm:$0xfc] }
 0x199   : > { %v1617_v61 = vpop.f32.mrb[27].mxu1  ;;  %v7049_v0 = vpop.eup %7048  ;;  %2282 = vmatpush1.bf16.msra.mxu0 %v6781_v47  ;;  %v6333_v8 = vadd.f32 %v1229_v60, %v7714_v19  ;;  %7072 = vtanh.f32 %v6359_v46  ;;  %v6792_v43 = vld [vmem:[%s9494_s4 + $0x44] ss:$8 sps:$4 sm:$0xff]   ;;  %v2387_v44 = vpack.c.bf16 %v7764_v56, %v2383_v39  ;;  %v2431_v46 = vrot.slane %v7786_v40, 1  ;;  %v6790_v60 = vld [vmem:[%s9494_s4 + $0x40] ss:$8 sps:$4 sm:$0xff]  }
 0x19a   : > { %v7051_v5 = vpop.eup %7050  ;;  %v1667_v6 = vadd.f32 %v7049_v0, %v7047_v57  ;;  %v1838_v18 = vsel %vm1798_vm3, %v1833_v2, %v1837_v3  ;;  %v6361_v9 = vadd.f32 %v1617_v61, %v7714_v19  ;;  %2283 = vmatprep.subr.bf16.mxu0 %v6786_v54  ;;  %v7852_v22 = vpack.c.bf16 %v1666_v58, %v1664_v30 }
 0x19b   : > { %v7053_v12 = vpop.eup %7052  ;;  %v1720_v16 = vld [vmem:[#allocation2 + $0x78] sm:$0xff]  ;;  %7074 = vtanh.f32 %v6332_v59  ;;  %5803 = vmatprep.mubr.msk.bf16.mxu0 %vm1677_vm2, %v1838_v18  ;;  %v1847_v30 = vshrl.u32 %v7816_v31, 16  ;;  %v1841_v51 = vor.u32 %v1839_v38, %v1829_v63  ;;  %v2430_v54 = vrot.slane %v2387_v44, 1 }
 0x19c   : > { %v7055_v23 = vpop.eup %7054  ;;  %1696 = vst.msk [vmem:[#allocation2 + $0x98] sm:$0xff] %vm1677_vm2, %v1667_v6  ;;  %v1668_v24 = vadd.f32 %v7053_v12, %v7051_v5  ;;  %v7857_v26 = vpack.c.bf16 %v1720_v16, %v1718_v13  ;;  %7076 = vtanh.f32 %v6360_v1  ;;  %2092 = vmatmul.mubr.bf16.gmra.mrb[32].mxu0 %v1830_v25  ;;  %v1859_v61 = vshll.u32 %v7852_v22, 16 }
 0x19d   : > { %v7057_v19 = vpop.eup %7056  ;;  %7078 = vtanh.f32 %v6333_v8  ;;  %2284 = vmatpush1.bf16.msra.mxu0 %v6784_v10  ;;  %v1849_v48 = vor.u32 %v1847_v30, %v1837_v3  ;;  %v6795_v3 = vld [vmem:[%s9494_s4 + $0x54] ss:$8 sps:$4 sm:$0xff]   ;;  %v7891_v5 = vsel %vm2426_vm4, %v2430_v54, %v2431_v46  ;;  %v2435_v6 = vrot.slane %v7816_v31, 1 }
 0x19e   : > { %v7059_v29 = vpop.eup %7058  ;;  %v1669_v33 = vadd.f32 %v7057_v19, %v7055_v23  ;;  %v1851_v34 = vshll.u32 %v7857_v26, 16  ;;  %7080 = vtanh.f32 %v6361_v9  ;;  %2285 = vmatprep.subr.bf16.mxu0 %v6789_v20  ;;  %v1846_v12 = vsel %vm1798_vm3, %v1841_v51, %v1845_v42  ;;  %v2723_v51 = vld [vmem:[#allocation2] sm:$0xf8] }
 0x19f   : > { %v7061_v41 = vpop.eup %7060  ;;  %v1722_v63 = vld [vmem:[#allocation2 + $0x88] sm:$0xff]  ;;  %v1855_v13 = vshrl.u32 %v7812_v27, 16  ;;  %v7902_v16 = vsel %vm2426_vm4, %v2431_v46, %v2435_v6  ;;  %v2439_v20 = vrot.slane %v7857_v26, 1  ;;  %v1863_v25 = vshrl.u32 %v7857_v26, 16 }
 0x1a0   : > { %v7063_v45 = vpop.eup %7062  ;;  %1698 = vst.msk [vmem:[#allocation2 + $0xa8] sm:$0xff] %vm1677_vm2, %v1669_v33  ;;  %v1670_v47 = vadd.f32 %v7061_v41, %v7059_v29  ;;  %v1853_v49 = vrot.slane %v1851_v34, 1  ;;  %v7909_v29 = vrot.slane %v1859_v61, 1  ;;  %v6793_v33 = vld [vmem:[%s9494_s4 + $0x50] ss:$8 sps:$4 sm:$0xff]  }
 0x1a1   : > { %v7065_v50 = vpop.eup %7064  ;;  %2286 = vmatpush1.bf16.msra.mxu0 %v6787_v35  ;;  %v7917_v35 = vld [vmem:[%s9494_s4 + $0xa0] sm:$0xff] }
 0x1a2   : > { %v7067_v57 = vpop.eup %7066  ;;  %v1671_v58 = vadd.f32 %v7065_v50, %v7063_v45  ;;  %v1854_v59 = vsel %vm1798_vm3, %v1849_v48, %v1853_v49  ;;  %v7884_v0 = vpack.c.bf16 %v1670_v47, %v1668_v24  ;;  %2287 = vmatprep.subr.bf16.mxu0 %v6792_v43  ;;  %v6798_v41 = vld [vmem:[%s9494_s4 + $0x64] ss:$8 sps:$4 sm:$0xff]   ;;  %v7923_v43 = vsel %vm2426_vm4, %v2435_v6, %v2439_v20 }
 0x1a3   : > { %v7069_v1 = vpop.eup %7068  ;;  %5804 = vmatprep.mubr.msk.bf16.mxu0 %vm1677_vm2, %v1854_v59  ;;  %v1724_v2 = vld [vmem:[#allocation2 + $0x98] sm:$0xff]  ;;  %v1865_v48 = vor.u32 %v1863_v25, %v1853_v49  ;;  %v1857_v50 = vor.u32 %v1855_v13, %v1845_v42  ;;  %v6796_v42 = vld [vmem:[%s9494_s4 + $0x60] ss:$8 sps:$4 sm:$0xff]  }
 0x1a4   : > { %v7071_v8 = vpop.eup %7070  ;;  %1700 = vst.msk [vmem:[#allocation2 + $0xb8] sm:$0xff] %vm1677_vm2, %v1671_v58  ;;  %v7895_v10 = vadd.f32 %v7069_v1, %v7067_v57  ;;  %v7898_v18 = vpack.c.bf16 %v1724_v2, %v1722_v63  ;;  %2102 = vmatmul.mubr.bf16.gmra.mrb[36].mxu0 %v1846_v12  ;;  %v2762_v57 = vrot.slane %v1823_v4, 1  ;;  %v5829_v58 = vcombine.low %v7917_v35, %v7917_v35  ;;  %v6801_v4 = vld [vmem:[%s9494_s4 + $0x74] ss:$8 sps:$4 sm:$0xff]  }
 0x1a5   : > { %v7073_v9 = vpop.eup %7072  ;;  %2288 = vmatpush1.bf16.msra.mxu0 %v6790_v60  ;;  %v2724_v60 = vld [vmem:[#allocation2 + $0x8] sm:$0xf8]  ;;  %v1862_v63 = vsel %vm1798_vm3, %v1857_v50, %v7909_v29  ;;  %v2774_v12 = vrot.slane %v1831_v36, 1  ;;  %v6799_v50 = vld [vmem:[%s9494_s4 + $0x70] ss:$8 sps:$4 sm:$0xff]  }
 0x1a6   : > { %v7075_v23 = vpop.eup %7074  ;;  %v1673_v24 = vadd.f32 %v7073_v9, %v7071_v8  ;;  %v1867_v19 = vshll.u32 %v7898_v18, 16  ;;  %2289 = vmatprep.subr.bf16.mxu0 %v6795_v3  ;;  %v2443_v44 = vrot.slane %v7898_v18, 1  ;;  %v2728_v2 = vpack.c.bf16 %v7764_v56, %v2724_v60 }
 0x1a7   : > { %v7077_v39 = vpop.eup %7076  ;;  %v1726_v3 = vld [vmem:[#allocation2 + $0xa8] sm:$0xff]  ;;  %v9506_v8 = vshll.u32 %v7884_v0, 16  ;;  %v2775_v9 = vrot.slane %v1819_v62, 2 }
 0x1a8   : > { %v7079_v45 = vpop.eup %7078  ;;  %1702 = vst.msk [vmem:[#allocation2 + $0xc8] sm:$0xff] %vm1677_vm2, %v1673_v24  ;;  %v1674_v47 = vadd.f32 %v7077_v39, %v7075_v23  ;;  %v1869_v46 = vrot.slane %v1867_v19, 1  ;;  %v7938_v59 = vsel %vm2426_vm4, %v2439_v20, %v2443_v44  ;;  %v2727_v20 = vpack.c.bf16 %v7740_v7, %v2723_v51 }
 0x1a9   : > { %v7081_v54 = vpop.eup %7080  ;;  %2290 = vmatpush1.bf16.msra.mxu0 %v6793_v33  ;;  %v2767_v24 = vshrl.u32 %v2728_v2, 16  ;;  %v2770_v33 = vshll.u32 %v2728_v2, 16  ;;  %v2763_v39 = vrot.slane %v1807_v28, 2  ;;  %v1877_v60 = vrot.slane %v9506_v8, 1 }
 0x1aa   : > { %1703 = vst [vmem:[#allocation2 + $0xd0] sm:$0xff] %v1674_v47  ;;  %v1675_v49 = vadd.f32 %v7081_v54, %v7079_v45  ;;  %v1870_v1 = vsel %vm1798_vm3, %v1865_v48, %v1869_v46  ;;  %2291 = vmatprep.subr.bf16.mxu0 %v6798_v41  ;;  %v1879_v41 = vshrl.u32 %v7898_v18, 16  ;;  %v7963_v45 = vor.u32 %v2775_v9, %v2774_v12 }
 0x1ab   : > { %5805 = vmatprep.mubr.msk.bf16.mxu0 %vm1677_vm2, %v1870_v1  ;;  %v1728_v6 = vld [vmem:[#allocation2 + $0xb8] sm:$0xff]  ;;  %v2755_v36 = vshrl.u32 %v2727_v20, 16  ;;  %v2758_v47 = vshll.u32 %v2727_v20, 16  ;;  %v1871_v48 = vshrl.u32 %v7852_v22, 16  ;;  %v2769_v54 = vrot.slane %v2767_v24, 1 }
 0x1ac   : > { %1704 = vst.msk [vmem:[#allocation2 + $0xd8] sm:$0xff] %vm1677_vm2, %v1675_v49  ;;  %v7958_v23 = vpack.c.bf16 %v1728_v6, %v1726_v3  ;;  %2112 = vmatmul.mubr.bf16.gmra.mrb[40].mxu0 %v1862_v63  ;;  %v1881_v28 = vor.u32 %v1879_v41, %v1869_v46  ;;  %v6804_v49 = vld [vmem:[%s9494_s4 + $0x84] ss:$8 sps:$4 sm:$0xff]   ;;  %v2772_v1 = vrot.slane %v2770_v33, 2  ;;  %v7978_v63 = vor.u32 %v2763_v39, %v2762_v57  ;;  %v6802_v20 = vld [vmem:[%s9494_s4 + $0x80] ss:$8 sps:$4 sm:$0xff]  }
 0x1ad   : > { %2292 = vmatpush1.bf16.msra.mxu0 %v6796_v42  ;;  %v2757_v3 = vrot.slane %v2755_v36, 1  ;;  %v2760_v6 = vrot.slane %v2758_v47, 2  ;;  %v2274_v39 = vsel %vm2042_vm1, %v5829_v58, 0  ;;  %v6805_v58 = vld [vmem:[%s9494_s4 + $0x90] ss:$8 sps:$4 sm:$0xff]  }
 0x1ae   : > { %v9507_v62 = vshll.u32 %v7958_v23, 16  ;;  %v2447_v51 = vrot.slane %v7958_v23, 1  ;;  %2293 = vmatprep.subr.bf16.mxu0 %v6801_v4  ;;  %v2773_v12 = vor.u32 %v2772_v1, %v2769_v54  ;;  %v1873_v4 = vor.u32 %v1871_v48, %v7909_v29 }
 0x1af   : > { %v7999_v24 = vld [vmem:[#allocation2 + $0xc8] sm:$0xff]  ;;  %v5830_v29 = vcombine.high %v7917_v35, %v7917_v35  ;;  %v1887_v35 = vshrl.u32 %v7884_v0, 16 }
 0x1b0   : > { %v1885_v42 = vrot.slane %v9507_v62, 1  ;;  %v7983_v2 = vsel %vm2426_vm4, %v2443_v44, %v2447_v51  ;;  %v6807_v44 = vld [vmem:[%s9494_s4 + $0x94] ss:$8 sps:$4 sm:$0xff]   ;;  %v8006_v47 = vsel %vm2753_vm5, %v2773_v12, %v7963_v45  ;;  %v1878_v54 = vsel %vm1798_vm3, %v1873_v4, %v1877_v60 }
 0x1b1   : > { %v1770_v46 = vld [vmem:[#allocation2 + $0xd0] sm:$0x1f]  ;;  %2294 = vmatpush1.bf16.msra.mxu0 %v6799_v50  ;;  %v2761_v50 = vor.u32 %v2760_v6, %v2757_v3  ;;  %v2783_v12 = vrot.slane %v1835_v53, 2  ;;  %v1889_v17 = vor.u32 %v1887_v35, %v1877_v60  ;;  %v2779_v60 = vrot.slane %v1827_v32, 2 }
 0x1b2   : > { %v1886_v9 = vsel %vm1798_vm3, %v1881_v28, %v1885_v42  ;;  %v7990_v57 = vpack.c.bf16 %v1770_v46, %v7895_v10  ;;  %2295 = vmatprep.subr.bf16.mxu0 %v6804_v49  ;;  %v2782_v49 = vrot.slane %v1847_v30, 1  ;;  %v8017_v46 = vld [vmem:[#allocation2 + $0x8] sm:$0xff]  ;;  %v1895_v30 = vshrl.u32 %v7958_v23, 16  ;;  %v6812_v32 = vld [vmem:[%s9494_s4 + $0x154] ss:$8 sps:$4 sm:$0xff]  }
 0x1b3   : > { %5806 = vmatprep.mubr.msk.bf16.mxu0 %vm1677_vm2, %v1886_v9  ;;  %v1771_v33 = vld [vmem:[#allocation2 + $0xd8] sm:$0x1f]  ;;  %v8022_v6 = vsel %vm2753_vm5, %v2761_v50, %v7978_v63  ;;  %v2778_v50 = vrot.slane %v1839_v38, 1 }
 0x1b4   : > { %v2385_v36 = vld [vmem:[#allocation2 + $0xd8] sm:$0x3f]  ;;  %v1775_v28 = vpack.c.bf16 %v1771_v33, %v7999_v24  ;;  %v1891_v1 = vshll.u32 %v7990_v57, 16  ;;  %2122 = vmatmul.mubr.bf16.gmra.mrb[44].mxu0 %v1878_v54  ;;  %v1734_v33 = vpack.c.bf16 %v7764_v56, %v8017_v46  ;;  %v3099_v54 = vld [vmem:[#allocation2 + $0x8] sm:$0xf0]  ;;  %v1897_v53 = vor.u32 %v1895_v30, %v1885_v42 }
 0x1b5   : > { %v2389_v3 = vpack.c.bf16 %v2385_v36, %v7999_v24  ;;  %2296 = vmatpush1.bf16.msra.mxu0 %v6802_v20  ;;  %v3103_v15 = vpack.c.bf16 %v7764_v56, %v3099_v54  ;;  %v2784_v62 = vor.u32 %v2783_v12, %v2782_v49  ;;  %v2726_v49 = vld [vmem:[#allocation2 + $0xd8] sm:$0x7f]  ;;  %v2802_v54 = vrot.slane %v1887_v35, 1 }
 0x1b6   : > { %v1899_v9 = vshll.u32 %v1775_v28, 16  ;;  %v8027_v4 = vrot.slane %v1891_v1, 1  ;;  %2297 = vmatprep.subr.bf16.mxu0 %v6807_v44  ;;  %v1906_v8 = vshrl.u32 %v1775_v28, 16  ;;  %v2790_v44 = vrot.slane %v1863_v25, 1 }
 0x1b7   : > { %v8031_v36 = vrot.slane %v2389_v3, 1  ;;  %v8049_v42 = vsel %vm2753_vm5, %v7963_v45, %v2784_v62  ;;  %v2780_v25 = vor.u32 %v2779_v60, %v2778_v50  ;;  %v2798_v45 = vrot.slane %v1879_v41, 1 }
 0x1b8   : > { %v1901_v21 = vrot.slane %v1899_v9, 1  ;;  %v1894_v20 = vsel %vm1798_vm3, %v1889_v17, %v8027_v4  ;;  %v2791_v17 = vrot.slane %v1851_v34, 2  ;;  %v2795_v28 = vrot.slane %v1859_v61, 2  ;;  %v2725_v9 = vld [vmem:[#allocation2 + $0xd0] sm:$0x7f] }
 0x1b9   : > { %v8040_v1 = vsel %vm2426_vm4, %v2447_v51, %v8031_v36  ;;  %2298 = vmatpush1.bf16.msra.mxu0 %v6805_v58  ;;  %v2799_v51 = vrot.slane %v1867_v19, 2  ;;  %v2806_v58 = vrot.slane %v1895_v30, 1  ;;  %v9517_v41 = vshll.u32 %v7958_v23, 16 }
 0x1ba   : > { %v1902_v38 = vsel %vm1798_vm3, %v1897_v53, %v1901_v21  ;;  %v1908_v3 = vor.u32 %v1906_v8, %v1901_v21  ;;  %5831 = vmatprep.subr.msk.bf16.mxu0 %vm2042_vm1, %v5830_v29  ;;  %v2786_v21 = vrot.slane %v1855_v13, 1  ;;  %v2787_v8 = vrot.slane %v1843_v11, 2 }
 0x1bb   : > { %5807 = vmatprep.mubr.msk.bf16.mxu0 %vm1677_vm2, %v1902_v38  ;;  %v2792_v34 = vor.u32 %v2791_v17, %v2790_v44  ;;  %v2794_v29 = vrot.slane %v1871_v48, 1  ;;  %v8072_v13 = vsel %vm2753_vm5, %v7978_v63, %v2780_v25  ;;  %v2807_v12 = vrot.slane %v9517_v41, 2 }
 0x1bc   : > { %2132 = vmatmul.mubr.bf16.gmra.mrb[48].mxu0 %v1894_v20  ;;  %v2788_v11 = vor.u32 %v2787_v8, %v2786_v21  ;;  %v2800_v48 = vor.u32 %v2799_v51, %v2798_v45  ;;  %v9518_v30 = vshll.u32 %v7884_v0, 16  ;;  %v2730_v20 = vpack.c.bf16 %v2726_v49, %v7999_v24 }
 0x1bd   : > { %5808 = vmatprep.mubr.msk.bf16.mxu0 %vm1677_vm2, %v1908_v3  ;;  %2300 = vmatpush1.bf16.msra.mxu0 %v2274_v39  ;;  %v8078_v19 = vsel %vm2753_vm5, %v2784_v62, %v2792_v34  ;;  %v2796_v61 = vor.u32 %v2795_v28, %v2794_v29  ;;  %v2808_v63 = vor.u32 %v2807_v12, %v2806_v58  ;;  %v1903_v60 = vshrl.u32 %v7990_v57, 16 }
 0x1be   : > { %2592 = vmatprep.subr.bf16.mxu0 %v6812_v32  ;;  %v8081_v50 = vsel %vm2753_vm5, %v2780_v25, %v2788_v11  ;;  %v2803_v53 = vrot.slane %v9518_v30, 2  ;;  %v8088_v39 = vsel %vm2753_vm5, %v2792_v34, %v2800_v48  ;;  %v2729_v35 = vpack.c.bf16 %v2725_v9, %v7895_v10  ;;  %v3101_v9 = vld [vmem:[#allocation2 + $0xd8] sm:$0xff] }
 0x1bf   : > { %v8091_v62 = vsel %vm2753_vm5, %v2788_v11, %v2796_v61  ;;  %v8095_v44 = vsel %vm2753_vm5, %v2800_v48, %v2808_v63  ;;  %v2820_v3 = vshrl.u32 %v2730_v20, 16  ;;  %v2823_v17 = vshll.u32 %v2730_v20, 16  ;;  %v6810_v30 = vld [vmem:[%s9494_s4 + $0x150] ss:$8 sps:$4 sm:$0xff]  }
 0x1c0   : > { %v2804_v38 = vor.u32 %v2803_v53, %v2802_v54  ;;  %v2811_v32 = vshrl.u32 %v2729_v35, 16  ;;  %v2814_v25 = vshll.u32 %v2729_v35, 16  ;;  %v3136_v21 = vrot.slane %v3103_v15, 2  ;;  %v6815_v53 = vld [vmem:[%s9494_s4 + $0x164] ss:$8 sps:$4 sm:$0xff]  }
 0x1c1   : > { %v3137_v8 = vrot.slane %v7786_v40, 2  ;;  %v1905_v57 = vor.u32 %v1903_v60, %v8027_v4  ;;  %v2822_v34 = vrot.slane %v2820_v3, 1  ;;  %v2825_v51 = vrot.slane %v2823_v17, 2  ;;  %v6818_v3 = vld [vmem:[%s9494_s4 + $0x174] ss:$8 sps:$4 sm:$0xff]  }
 0x1c2   : > { %v8100_v45 = vsel %vm2753_vm5, %v2796_v61, %v2804_v38  ;;  %v2813_v29 = vrot.slane %v2811_v32, 1  ;;  %v2816_v28 = vrot.slane %v2814_v25, 2  ;;  %v3141_v11 = vrot.slane %v7816_v31, 2  ;;  %v6824_v17 = vld [vmem:[%s9494_s4 + $0x194] ss:$8 sps:$4 sm:$0xff]  }
 0x1c3   : > { %v8103_v49 = vsel %vm3132_vm6, %v3136_v21, %v3137_v8  ;;  %v8106_v58 = vor.u32 %v2825_v51, %v2822_v34  ;;  %v3145_v15 = vrot.slane %v7857_v26, 2  ;;  %v3149_v12 = vrot.slane %v7898_v18, 2  ;;  %v6822_v32 = vld [vmem:[%s9494_s4 + $0x190] ss:$8 sps:$4 sm:$0xff]   ;;  %v6825_v25 = vld [vmem:[%s9494_s4 + $0x1a0] ss:$8 sps:$4 sm:$0xff]  }
 0x1c4   : > { %2142 = vmatmul.mubr.bf16.gmra.mrb[52].mxu0 %v1905_v57  ;;  %v8113_v4 = vor.u32 %v2816_v28, %v2813_v29  ;;  %v8116_v41 = vsel %vm3132_vm6, %v3137_v8, %v3141_v11  ;;  %v3105_v54 = vpack.c.bf16 %v3101_v9, %v7999_v24  ;;  %v9519_v60 = vpack.c.bf16 %v7740_v7, %v7732_v55  ;;  %v6816_v55 = vld [vmem:[%s9494_s4 + $0x170] ss:$8 sps:$4 sm:$0xff]   ;;  %v6821_v7 = vld [vmem:[%s9494_s4 + $0x184] ss:$8 sps:$4 sm:$0xff]   ;;  %v6830_v21 = vld [vmem:[%s9494_s4 + $0x1b4] ss:$8 sps:$4 sm:$0xff]  }
 0x1c5   : > { %5832 = vmatprep.mubr.msk.bf16.mxu0 %vm1677_vm2, %v1734_v33  ;;  %v8121_v48 = vsel %vm2753_vm5, %v2808_v63, %v8106_v58  ;;  %v8124_v61 = vsel %vm3132_vm6, %v3141_v11, %v3145_v15  ;;  %v8131_v46 = vsel %vm3132_vm6, %v3145_v15, %v3149_v12  ;;  %v3153_v33 = vrot.slane %v7958_v23, 2  ;;  %v6828_v8 = vld [vmem:[%s9494_s4 + $0x1b0] ss:$8 sps:$4 sm:$0xff]   ;;  %v6831_v57 = vld [vmem:[%s9494_s4 + $0x1c0] ss:$8 sps:$4 sm:$0xff]  }
 0x1c6   : > { %v8128_v56 = vsel %vm2753_vm5, %v2804_v38, %v8113_v4  ;;  %v8144_v20 = vrot.slane %v3105_v54, 2  ;;  %v6813_v38 = vld [vmem:[%s9494_s4 + $0x160] ss:$8 sps:$4 sm:$0xff]   ;;  %v6836_v34 = vld [vmem:[%s9494_s4 + $0x1d4] ss:$8 sps:$4 sm:$0xff]  }
 0x1c7   : > { %v8139_v63 = vsel %vm3132_vm6, %v3149_v12, %v3153_v33  ;;  %v6834_v51 = vld [vmem:[%s9494_s4 + $0x1d0] ss:$8 sps:$4 sm:$0xff]   ;;  %v6837_v28 = vld [vmem:[%s9494_s4 + $0x1e0] ss:$8 sps:$4 sm:$0xff]  }
 0x1c8   : > { %v8151_v35 = vsel %vm3132_vm6, %v3153_v33, %v8144_v20  ;;  %v5859_v29 = vld [vmem:[%s9494_s4 + $0x1f0] sm:$0xff]  ;;  %v1732_v12 = vld [vmem:[#allocation2 + $0xd8] sm:$0xf]  ;;  %v6844_v33 = vld [vmem:[%s9494_s4 + $0x1fc] ss:$8 sps:$4 sm:$0xff]  }
 0x1c9   : > { %v5881_v11 = vcombine.high %v5859_v29, %v5859_v29  ;;  %v5880_v15 = vcombine.low %v5859_v29, %v5859_v29  ;;  %v1731_v54 = vld [vmem:[#allocation2 + $0xd0] sm:$0xf]  ;;  %v2441_v29 = vrot.slane %v7852_v22, 1 }
 0x1cb   : > { %v2587_v9 = vsel %vm2042_vm1, %v5880_v15, 0  ;;  %v6863_v15 = vld [vmem:[%s9494_s4 + $0x268] ss:$8 sps:$4 sm:$0xff]  }
 0x1cc   : > { %2312 = vmatmul.mubr.bf16.vlgmr.msra.gmra.mrb[28].mxu0 %v9519_v60  ;;  %v8232_v60 = vld [vmem:[#allocation2 + $0x10] sm:$0xff] }
 0x1cd   : > { %5833 = vmatprep.mubr.msk.bf16.mxu0 %vm1677_vm2, %v7786_v40  ;;  %2593 = vmatpush1.bf16.msra.mxu0 %v6810_v30  ;;  %v6819_v40 = vld [vmem:[%s9494_s4 + $0x180] ss:$8 sps:$4 sm:$0xff]   ;;  %v1745_v30 = vpack.c.bf16 %v1731_v54, %v7895_v10 }
 0x1ce   : > { %2594 = vmatprep.subr.bf16.mxu0 %v6815_v53  ;;  %v2382_v53 = vld [vmem:[#allocation2] sm:$0xfc] }
 0x1d1   : > { %2595 = vmatpush1.bf16.msra.mxu0 %v6813_v38  ;;  %v2386_v38 = vpack.c.bf16 %v8232_v60, %v2382_v53  ;;  %v5910_v53 = vld [vmem:[%s9494_s4 + $0x298] sm:$0xff] }
 0x1d2   : > { %2596 = vmatprep.subr.bf16.mxu0 %v6818_v3 }
 0x1d3   : > { %v2427_v3 = vrot.slane %v2386_v38, 1  ;;  %v6906_v38 = vld [vmem:[%s9496_s6 + $0x50] sm:$0xff]  }
 0x1d4   : > { %2322 = vmatmul.mubr.bf16.gmra.mrb[32].mxu0 %v7761_v52 }
 0x1d5   : > { %5834 = vmatprep.mubr.msk.bf16.mxu0 %vm1677_vm2, %v7816_v31  ;;  %2597 = vmatpush1.bf16.msra.mxu0 %v6816_v55  ;;  %v6827_v31 = vld [vmem:[%s9494_s4 + $0x1a4] ss:$8 sps:$4 sm:$0xff]   ;;  %v6842_v55 = vld [vmem:[%s9494_s4 + $0x1f8] ss:$8 sps:$4 sm:$0xff]  }
 0x1d6   : > { %2598 = vmatprep.subr.bf16.mxu0 %v6821_v7  ;;  %v6847_v7 = vld [vmem:[%s9494_s4 + $0x20c] ss:$8 sps:$4 sm:$0xff]  }
 0x1d9   : > { %2599 = vmatpush1.bf16.msra.mxu0 %v6819_v40 }
 0x1da   : > { %2600 = vmatprep.subr.bf16.mxu0 %v6824_v17  ;;  %v6850_v17 = vld [vmem:[%s9494_s4 + $0x21c] ss:$8 sps:$4 sm:$0xff]  }
 0x1dc   : > { %2332 = vmatmul.mubr.bf16.gmra.mrb[36].mxu0 %v7783_v37 }
 0x1dd   : > { %5835 = vmatprep.mubr.msk.bf16.mxu0 %vm1677_vm2, %v7857_v26  ;;  %2601 = vmatpush1.bf16.msra.mxu0 %v6822_v32  ;;  %v6833_v26 = vld [vmem:[%s9494_s4 + $0x1c4] ss:$8 sps:$4 sm:$0xff]   ;;  %v2433_v32 = vrot.slane %v7783_v37, 1 }
 0x1de   : > { %2602 = vmatprep.subr.bf16.mxu0 %v6827_v31  ;;  %v6848_v31 = vld [vmem:[%s9494_s4 + $0x218] ss:$8 sps:$4 sm:$0xff]  }
 0x1e1   : > { %2603 = vmatpush1.bf16.msra.mxu0 %v6825_v25 }
 0x1e2   : > { %2604 = vmatprep.subr.bf16.mxu0 %v6830_v21  ;;  %v6851_v21 = vld [vmem:[%s9494_s4 + $0x228] ss:$8 sps:$4 sm:$0xff]  }
 0x1e4   : > { %2342 = vmatmul.mubr.bf16.gmra.mrb[40].mxu0 %v7812_v27 }
 0x1e5   : > { %5836 = vmatprep.mubr.msk.bf16.mxu0 %vm1677_vm2, %v7898_v18  ;;  %2605 = vmatpush1.bf16.msra.mxu0 %v6828_v8  ;;  %v6839_v18 = vld [vmem:[%s9494_s4 + $0x1e4] ss:$8 sps:$4 sm:$0xff]  }
 0x1e6   : > { %2606 = vmatprep.subr.bf16.mxu0 %v6833_v26  ;;  %v6856_v8 = vld [vmem:[%s9494_s4 + $0x23c] ss:$8 sps:$4 sm:$0xff]   ;;  %v2437_v26 = vrot.slane %v7812_v27, 1 }
 0x1e9   : > { %2607 = vmatpush1.bf16.msra.mxu0 %v6831_v57  ;;  %v6854_v57 = vld [vmem:[%s9494_s4 + $0x238] ss:$8 sps:$4 sm:$0xff]  }
 0x1ea   : > { %2608 = vmatprep.subr.bf16.mxu0 %v6836_v34  ;;  %v2438_v34 = vsel %vm2426_vm4, %v2433_v32, %v2437_v26 }
 0x1ec   : > { %2352 = vmatmul.mubr.bf16.gmra.mrb[44].mxu0 %v7852_v22 }
 0x1ed   : > { %5837 = vmatprep.mubr.msk.bf16.mxu0 %vm1677_vm2, %v7958_v23  ;;  %2609 = vmatpush1.bf16.msra.mxu0 %v6834_v51  ;;  %v1746_v23 = vpack.c.bf16 %v1732_v12, %v7999_v24  ;;  %v2428_v24 = vrot.slane %v7761_v52, 1  ;;  %v6857_v51 = vld [vmem:[%s9494_s4 + $0x248] ss:$8 sps:$4 sm:$0xff]   ;;  %v6868_v12 = vld [vmem:[%s9494_s4 + $0x27c] ss:$8 sps:$4 sm:$0xff]  }
 0x1ee   : > { %2610 = vmatprep.subr.bf16.mxu0 %v6839_v18  ;;  %v6862_v18 = vld [vmem:[%s9494_s4 + $0x25c] ss:$8 sps:$4 sm:$0xff]  }
 0x1ef   : > { %v2429_v40 = vsel %vm2426_vm4, %v2427_v3, %v2428_v24  ;;  %v2434_v25 = vsel %vm2426_vm4, %v2428_v24, %v2433_v32  ;;  %v6869_v24 = vld [vmem:[%s9494_s4 + $0x288] ss:$8 sps:$4 sm:$0xff]   ;;  %v5932_v3 = vcombine.high %v5910_v53, %v5910_v53 }
 0x1f0   : > { %v6874_v32 = vld [vmem:[%s9494_s4 + $0x2a0] ss:$8 sps:$4 sm:$0xff]  }
 0x1f1   : > { %2611 = vmatpush1.bf16.msra.mxu0 %v6837_v28  ;;  %v6860_v28 = vld [vmem:[%s9494_s4 + $0x258] ss:$8 sps:$4 sm:$0xff]  }
 0x1f2   : > { %5882 = vmatprep.subr.msk.bf16.mxu0 %vm2042_vm1, %v5881_v11  ;;  %v2442_v11 = vsel %vm2426_vm4, %v2437_v26, %v2441_v29  ;;  %v6892_v26 = vld [vmem:[%s9494_s4 + $0x300] ss:$8 sps:$4 sm:$0xff]  }
 0x1f4   : > { %2362 = vmatmul.mubr.bf16.gmra.mrb[48].mxu0 %v7884_v0 }
 0x1f5   : > { %5838 = vmatprep.mubr.msk.bf16.mxu0 %vm1677_vm2, %v1746_v23  ;;  %2613 = vmatpush1.bf16.msra.mxu0 %v2587_v9  ;;  %v2445_v9 = vrot.slane %v7884_v0, 1  ;;  %v6866_v23 = vld [vmem:[%s9494_s4 + $0x278] ss:$8 sps:$4 sm:$0xff]  }
 0x1f6   : > { %2967 = vmatprep.subr.bf16.mxu0 %v6844_v33  ;;  %v2384_v33 = vld [vmem:[#allocation2 + $0xd0] sm:$0x3f] }
 0x1f7   : > { %v2446_v54 = vsel %vm2426_vm4, %v2441_v29, %v2445_v9 }
 0x1fc   : > { %2372 = vmatmul.mubr.bf16.gmra.mrb[52].mxu0 %v1745_v30  ;;  %v2388_v30 = vpack.c.bf16 %v2384_v33, %v7895_v10  ;;  %v6915_v33 = vld [vmem:[%s9496_s6 + $0x98] sm:$0xff]  }
 0x1fd   : > { %5883 = vmatprep.mubr.msk.bf16.mxu0 %vm1677_vm2, %v7891_v5  ;;  %v6845_v5 = vld [vmem:[%s9494_s4 + $0x208] ss:$8 sps:$4 sm:$0xff]  }
 0x204   : > { %2625 = vmatmul.mubr.bf16.vlgmr.msra.gmra.mrb[28].mxu0 %v2429_v40  ;;  %v2449_v40 = vrot.slane %v2388_v30, 1  ;;  %v9521_v30 = vsub.s32 1, %v7701_v14 }
 0x205   : > { %5884 = vmatprep.mubr.msk.bf16.mxu0 %vm1677_vm2, %v7902_v16  ;;  %2968 = vmatpush1.bf16.msra.mxu0 %v6842_v55  ;;  %v6853_v16 = vld [vmem:[%s9494_s4 + $0x22c] ss:$8 sps:$4 sm:$0xff]   ;;  %v5931_v55 = vcombine.low %v5910_v53, %v5910_v53 }
 0x206   : > { %2969 = vmatprep.subr.bf16.mxu0 %v6847_v7  ;;  %v9510_v7 = vmov 0  }
 0x207   : > { %3907 = vmatprep.subr.bf16.mxu1 %v9510_v7 }
 0x208   : > { %3908 = vmatpush1.bf16.msra.mxu1 %v6906_v38 }
 0x209   : > { %2970 = vmatpush1.bf16.msra.mxu0 %v6845_v5  ;;  %3909 = vmatprep.subr.bf16.mxu1 %v9510_v7  ;;  %v6876_v5 = vld [vmem:[%s9494_s4 + $0x2a4] ss:$8 sps:$4 sm:$0xff]  }
 0x20a   : > { %2971 = vmatprep.subr.bf16.mxu0 %v6850_v17  ;;  %v2450_v17 = vsel %vm2426_vm4, %v2445_v9, %v2449_v40  ;;  %v6914_v9 = vld [vmem:[%s9496_s6 + $0x90] sm:$0xff]  }
 0x20c   : > { %2635 = vmatmul.mubr.bf16.gmra.mrb[32].mxu0 %v2434_v25  ;;  %v6888_v25 = vld [vmem:[%s9494_s4 + $0x2e4] ss:$8 sps:$4 sm:$0xff]  }
 0x20d   : > { %5885 = vmatprep.mubr.msk.bf16.mxu0 %vm1677_vm2, %v7923_v43  ;;  %2972 = vmatpush1.bf16.msra.mxu0 %v6848_v31  ;;  %v6859_v43 = vld [vmem:[%s9494_s4 + $0x24c] ss:$8 sps:$4 sm:$0xff]  }
 0x20e   : > { %2973 = vmatprep.subr.bf16.mxu0 %v6853_v16  ;;  %v6879_v31 = vld [vmem:[%s9494_s4 + $0x2b4] ss:$8 sps:$4 sm:$0xff]   ;;  %v6880_v16 = vld [vmem:[%s9494_s4 + $0x2c0] ss:$8 sps:$4 sm:$0xff]  }
 0x211   : > { %2974 = vmatpush1.bf16.msra.mxu0 %v6851_v21  ;;  %v6886_v21 = vld [vmem:[%s9494_s4 + $0x2e0] ss:$8 sps:$4 sm:$0xff]  }
 0x212   : > { %2975 = vmatprep.subr.bf16.mxu0 %v6856_v8  ;;  %v6894_v8 = vld [vmem:[%s9494_s4 + $0x304] ss:$8 sps:$4 sm:$0xff]  }
 0x214   : > { %2645 = vmatmul.mubr.bf16.gmra.mrb[36].mxu0 %v2438_v34  ;;  %v6901_v34 = vld [vmem:[%s9494_s4 + $0x330] ss:$8 sps:$4 sm:$0xff]  }
 0x215   : > { %5886 = vmatprep.mubr.msk.bf16.mxu0 %vm1677_vm2, %v7938_v59  ;;  %2976 = vmatpush1.bf16.msra.mxu0 %v6854_v57  ;;  %v6865_v59 = vld [vmem:[%s9494_s4 + $0x26c] ss:$8 sps:$4 sm:$0xff]  }
 0x216   : > { %2977 = vmatprep.subr.bf16.mxu0 %v6859_v43  ;;  %v6900_v57 = vld [vmem:[%s9494_s4 + $0x324] ss:$8 sps:$4 sm:$0xff]   ;;  %v6898_v43 = vld [vmem:[%s9494_s4 + $0x320] ss:$8 sps:$4 sm:$0xff]  }
 0x219   : > { %2978 = vmatpush1.bf16.msra.mxu0 %v6857_v51 }
 0x21a   : > { %2979 = vmatprep.subr.bf16.mxu0 %v6862_v18 }
 0x21c   : > { %2655 = vmatmul.mubr.bf16.gmra.mrb[40].mxu0 %v2442_v11 }
 0x21d   : > { %5887 = vmatprep.mubr.msk.bf16.mxu0 %vm1677_vm2, %v7983_v2  ;;  %2980 = vmatpush1.bf16.msra.mxu0 %v6860_v28  ;;  %v6871_v2 = vld [vmem:[%s9494_s4 + $0x28c] ss:$8 sps:$4 sm:$0xff]   ;;  %v3134_v28 = vrot.slane %v7761_v52, 2  ;;  %v3147_v52 = vrot.slane %v7852_v22, 2 }
 0x21e   : > { %2981 = vmatprep.subr.bf16.mxu0 %v6865_v59 }
 0x221   : > { %2982 = vmatpush1.bf16.msra.mxu0 %v6863_v15  ;;  %v6912_v15 = vld [vmem:[%s9496_s6 + $0x80] sm:$0xff]  }
 0x222   : > { %2983 = vmatprep.subr.bf16.mxu0 %v6868_v12  ;;  %v6913_v12 = vld [vmem:[%s9496_s6 + $0x88] sm:$0xff]  }
 0x224   : > { %2665 = vmatmul.mubr.bf16.gmra.mrb[44].mxu0 %v2446_v54 }
 0x225   : > { %5888 = vmatprep.mubr.msk.bf16.mxu0 %vm1677_vm2, %v8040_v1  ;;  %2984 = vmatpush1.bf16.msra.mxu0 %v6866_v23  ;;  %v2962_v1 = vsel %vm2042_vm1, %v5931_v55, 0  ;;  %v3429_v23 = vld [vmem:[%s9495_s5] sm:$0x3] }
 0x226   : > { %2985 = vmatprep.subr.bf16.mxu0 %v6871_v2  ;;  %v9520_v2 = vsub.s32 0, %v7701_v14  ;;  %v8484_v53 = vrot.slane %v3429_v23, %v9521_v30 }
 0x228   : > { %v8480_v54 = vrot.slane %v3429_v23, %v9520_v2 }
 0x229   : > { %2986 = vmatpush1.bf16.msra.mxu0 %v6869_v24 }
 0x22a   : > { %5933 = vmatprep.subr.msk.bf16.mxu0 %vm2042_vm1, %v5932_v3 }
 0x22c   : > { %2675 = vmatmul.mubr.bf16.gmra.mrb[48].mxu0 %v2450_v17 }
 0x22d   : > { %5889 = vmatprep.mubr.msk.bf16.mxu0 %vm1677_vm2, %v8031_v36  ;;  %2988 = vmatpush1.bf16.msra.mxu0 %v2962_v1  ;;  %v6877_v36 = vld [vmem:[%s9494_s4 + $0x2b0] ss:$8 sps:$4 sm:$0xff]  }
 0x22e   : > { %3298 = vmatprep.subr.bf16.mxu0 %v6876_v5 }
 0x234   : > { %2685 = vmatmul.mubr.bf16.gmra.mrb[52].mxu0 %v2449_v40 }
 0x235   : > { %5934 = vmatprep.mubr.msk.bf16.mxu0 %vm1677_vm2, %v8006_v47  ;;  %v6882_v47 = vld [vmem:[%s9494_s4 + $0x2c4] ss:$8 sps:$4 sm:$0xff]  }
 0x23c   : > { %3000 = vmatmul.mubr.bf16.vlgmr.msra.gmra.mrb[28].mxu0 %v8022_v6  ;;  %v6885_v6 = vld [vmem:[%s9494_s4 + $0x2d4] ss:$8 sps:$4 sm:$0xff]  }
 0x23d   : > { %5935 = vmatprep.mubr.msk.bf16.mxu0 %vm1677_vm2, %v8049_v42  ;;  %3299 = vmatpush1.bf16.msra.mxu0 %v6874_v32  ;;  %v6883_v42 = vld [vmem:[%s9494_s4 + $0x2d0] ss:$8 sps:$4 sm:$0xff]  }
 0x23e   : > { %3300 = vmatprep.subr.bf16.mxu0 %v6879_v31 }
 0x241   : > { %3301 = vmatpush1.bf16.msra.mxu0 %v6877_v36 }
 0x242   : > { %3302 = vmatprep.subr.bf16.mxu0 %v6882_v47 }
 0x244   : > { %3010 = vmatmul.mubr.bf16.gmra.mrb[32].mxu0 %v8072_v13  ;;  %v6891_v13 = vld [vmem:[%s9494_s4 + $0x2f4] ss:$8 sps:$4 sm:$0xff]  }
 0x245   : > { %5936 = vmatprep.mubr.msk.bf16.mxu0 %vm1677_vm2, %v8078_v19  ;;  %3303 = vmatpush1.bf16.msra.mxu0 %v6880_v16  ;;  %v6889_v19 = vld [vmem:[%s9494_s4 + $0x2f0] ss:$8 sps:$4 sm:$0xff]  }
 0x246   : > { %3304 = vmatprep.subr.bf16.mxu0 %v6885_v6 }
 0x249   : > { %3305 = vmatpush1.bf16.msra.mxu0 %v6883_v42 }
 0x24a   : > { %3306 = vmatprep.subr.bf16.mxu0 %v6888_v25 }
 0x24c   : > { %3020 = vmatmul.mubr.bf16.gmra.mrb[36].mxu0 %v8081_v50  ;;  %v6897_v50 = vld [vmem:[%s9494_s4 + $0x314] ss:$8 sps:$4 sm:$0xff]  }
 0x24d   : > { %5937 = vmatprep.mubr.msk.bf16.mxu0 %vm1677_vm2, %v8088_v39  ;;  %3307 = vmatpush1.bf16.msra.mxu0 %v6886_v21  ;;  %v6895_v39 = vld [vmem:[%s9494_s4 + $0x310] ss:$8 sps:$4 sm:$0xff]  }
 0x24e   : > { %3308 = vmatprep.subr.bf16.mxu0 %v6891_v13 }
 0x251   : > { %3309 = vmatpush1.bf16.msra.mxu0 %v6889_v19 }
 0x252   : > { %3310 = vmatprep.subr.bf16.mxu0 %v6894_v8 }
 0x254   : > { %3030 = vmatmul.mubr.bf16.gmra.mrb[40].mxu0 %v8091_v62  ;;  %v6903_v62 = vld [vmem:[%s9494_s4 + $0x334] ss:$8 sps:$4 sm:$0xff]  }
 0x255   : > { %5938 = vmatprep.mubr.msk.bf16.mxu0 %vm1677_vm2, %v8095_v44  ;;  %3311 = vmatpush1.bf16.msra.mxu0 %v6892_v26  ;;  %v5961_v44 = vld [vmem:[%s9494_s4 + $0x340] sm:$0xff] }
 0x256   : > { %3312 = vmatprep.subr.bf16.mxu0 %v6897_v50  ;;  %v5983_v51 = vcombine.high %v5961_v44, %v5961_v44  ;;  %v5982_v18 = vcombine.low %v5961_v44, %v5961_v44 }
 0x258   : > { %v3293_v29 = vsel %vm2042_vm1, %v5982_v18, 0 }
 0x259   : > { %3313 = vmatpush1.bf16.msra.mxu0 %v6895_v39 }
 0x25a   : > { %3314 = vmatprep.subr.bf16.mxu0 %v6900_v57 }
 0x25c   : > { %3040 = vmatmul.mubr.bf16.gmra.mrb[44].mxu0 %v8100_v45  ;;  %v3098_v45 = vld [vmem:[#allocation2] sm:$0xf0] }
 0x25d   : > { %5939 = vmatprep.mubr.msk.bf16.mxu0 %vm1677_vm2, %v8121_v48  ;;  %3315 = vmatpush1.bf16.msra.mxu0 %v6898_v43  ;;  %v3102_v48 = vpack.c.bf16 %v8232_v60, %v3098_v45  ;;  %v3100_v60 = vld [vmem:[#allocation2 + $0xd0] sm:$0xff] }
 0x25e   : > { %3316 = vmatprep.subr.bf16.mxu0 %v6903_v62 }
 0x25f   : > { %v3133_v59 = vrot.slane %v3102_v48, 2 }
 0x261   : > { %3317 = vmatpush1.bf16.msra.mxu0 %v6901_v34  ;;  %v3135_v11 = vsel %vm3132_vm6, %v3133_v59, %v3134_v28 }
 0x262   : > { %5984 = vmatprep.subr.msk.bf16.mxu0 %vm2042_vm1, %v5983_v51 }
 0x264   : > { %3050 = vmatmul.mubr.bf16.gmra.mrb[48].mxu0 %v8128_v56 }
 0x265   : > { %5940 = vmatprep.mubr.msk.bf16.mxu0 %vm1677_vm2, %v8106_v58  ;;  %3319 = vmatpush1.bf16.msra.mxu0 %v3293_v29  ;;  %v3139_v58 = vrot.slane %v7783_v37, 2  ;;  %v3151_v37 = vrot.slane %v7884_v0, 2  ;;  %v6907_v0 = vld [vmem:[%s9496_s6 + $0x58] sm:$0xff]  }
 0x266   : > { %3910 = vmatpush1.bf16.msra.mxu1 %v6907_v0 }
 0x267   : > { %v3140_v56 = vsel %vm3132_vm6, %v3134_v28, %v3139_v58  ;;  %3911 = vmatprep.subr.bf16.mxu1 %v9510_v7 }
 0x26c   : > { %3060 = vmatmul.mubr.bf16.gmra.mrb[52].mxu0 %v8113_v4 }
 0x26d   : > { %5985 = vmatprep.mubr.msk.bf16.mxu0 %vm1677_vm2, %v8103_v49  ;;  %v3143_v49 = vrot.slane %v7812_v27, 2  ;;  %v3104_v27 = vpack.c.bf16 %v3100_v60, %v7895_v10  ;;  %v6908_v10 = vld [vmem:[%s9496_s6 + $0x60] sm:$0xff]  }
 0x26e   : > { %3912 = vmatpush1.bf16.msra.mxu1 %v6908_v10 }
 0x26f   : > { %v3144_v4 = vsel %vm3132_vm6, %v3139_v58, %v3143_v49  ;;  %3913 = vmatprep.subr.bf16.mxu1 %v9510_v7 }
 0x274   : > { %3331 = vmatmul.mubr.bf16.vlgmr.msra.gmra.mrb[28].mxu0 %v3135_v11 }
 0x275   : > { %5986 = vmatprep.mubr.msk.bf16.mxu0 %vm1677_vm2, %v8116_v41  ;;  %v3148_v41 = vsel %vm3132_vm6, %v3143_v49, %v3147_v52 }
 0x27c   : > { %3341 = vmatmul.mubr.bf16.gmra.mrb[32].mxu0 %v3140_v56 }
 0x27d   : > { %5987 = vmatprep.mubr.msk.bf16.mxu0 %vm1677_vm2, %v8124_v61  ;;  %v3152_v61 = vsel %vm3132_vm6, %v3147_v52, %v3151_v37 }
 0x284   : > { %3351 = vmatmul.mubr.bf16.gmra.mrb[36].mxu0 %v3144_v4 }
 0x285   : > { %5988 = vmatprep.mubr.msk.bf16.mxu0 %vm1677_vm2, %v8131_v46  ;;  %v3155_v46 = vrot.slane %v3104_v27, 2 }
 0x287   : > { %v3156_v22 = vsel %vm3132_vm6, %v3151_v37, %v3155_v46 }
 0x28c   : > { %3361 = vmatmul.mubr.bf16.gmra.mrb[40].mxu0 %v3148_v41 }
 0x28d   : > { %5989 = vmatprep.mubr.msk.bf16.mxu0 %vm1677_vm2, %v8139_v63  ;;  %v6909_v63 = vld [vmem:[%s9496_s6 + $0x68] sm:$0xff]  }
 0x28e   : > { %3914 = vmatpush1.bf16.msra.mxu1 %v6909_v63 }
 0x28f   : > { %3915 = vmatprep.subr.bf16.mxu1 %v9510_v7 }
 0x294   : > { %3371 = vmatmul.mubr.bf16.gmra.mrb[44].mxu0 %v3152_v61 }
 0x295   : > { %5990 = vmatprep.mubr.msk.bf16.mxu0 %vm1677_vm2, %v8151_v35  ;;  %v6911_v35 = vld [vmem:[%s9496_s6 + $0x78] sm:$0xff]  }
 0x29c   : > { %3381 = vmatmul.mubr.bf16.gmra.mrb[48].mxu0 %v3156_v22 }
 0x29d   : > { %5991 = vmatprep.mubr.msk.bf16.mxu0 %vm1677_vm2, %v8144_v20  ;;  %v6910_v20 = vld [vmem:[%s9496_s6 + $0x70] sm:$0xff]  }
 0x29e   : > { %3916 = vmatpush1.bf16.msra.mxu1 %v6910_v20 }
 0x29f   : > { %3917 = vmatprep.subr.bf16.mxu1 %v9510_v7 }
 0x2a2   : > { %3918 = vmatpush1.bf16.msra.mxu1 %v6911_v35 }
 0x2a3   : > { %3919 = vmatprep.subr.bf16.mxu1 %v9510_v7 }
 0x2a4   : > { %3391 = vmatmul.mubr.bf16.gmra.mrb[52].mxu0 %v3155_v46 }
 0x2a6   : > { %3920 = vmatpush1.bf16.msra.mxu1 %v6912_v15 }
 0x2a7   : > { %3921 = vmatprep.subr.bf16.mxu1 %v9510_v7 }
 0x2aa   : > { %3922 = vmatpush1.bf16.msra.mxu1 %v6913_v12 }
 0x2ab   : > { %3923 = vmatprep.subr.bf16.mxu1 %v9510_v7 }
 0x2ae   : > { %3924 = vmatpush1.bf16.msra.mxu1 %v6914_v9 }
 0x2af   : > { %3925 = vmatprep.subr.bf16.mxu1 %v9510_v7 }
 0x2b2   : > { %3926 = vmatpush1.bf16.msra.mxu1 %v6915_v33 }
 0x2b3   : > { %4076 = vmatprep.subr.bf16.mxu1 %v9510_v7 }
 0x347   : > { %v3332_v38 = vpop.f32.mrb[28].mxu0 }
 0x348   : > { %v3441_v24 = vadd.f32 %v8480_v54, %v3332_v38  ;;  %v3334_v3 = vpop.f32.mrb[29].mxu0 }
 0x349   : > { %v3442_v55 = vadd.f32 %v8484_v53, %v3334_v3  ;;  %v3336_v40 = vpop.f32.mrb[30].mxu0 }
 0x34a   : > { %7082 = vtanh.f32 %v3441_v24  ;;  %v3443_v1 = vadd.f32 %v8480_v54, %v3336_v40  ;;  %v3338_v5 = vpop.f32.mrb[31].mxu0 }
 0x34b   : > { %7084 = vtanh.f32 %v3442_v55  ;;  %v3444_v17 = vadd.f32 %v8484_v53, %v3338_v5 }
 0x34c   : > { %7086 = vtanh.f32 %v3443_v1 }
 0x34d   : > { %7088 = vtanh.f32 %v3444_v17 }
 0x34f   : > { %v3342_v32 = vpop.f32.mrb[32].mxu0 }
 0x350   : > { %v3445_v14 = vadd.f32 %v8480_v54, %v3342_v32  ;;  %v3344_v31 = vpop.f32.mrb[33].mxu0 }
 0x351   : > { %v3446_v36 = vadd.f32 %v8484_v53, %v3344_v31  ;;  %v3346_v47 = vpop.f32.mrb[34].mxu0 }
 0x352   : > { %7090 = vtanh.f32 %v3445_v14  ;;  %v3447_v16 = vadd.f32 %v8480_v54, %v3346_v47  ;;  %v3348_v6 = vpop.f32.mrb[35].mxu0 }
 0x353   : > { %7092 = vtanh.f32 %v3446_v36  ;;  %v3448_v42 = vadd.f32 %v8484_v53, %v3348_v6 }
 0x354   : > { %v7083_v25 = vpop.eup %7082  ;;  %7094 = vtanh.f32 %v3447_v16 }
 0x355   : > { %v7085_v21 = vpop.eup %7084  ;;  %3497 = vst [vmem:[#allocation3] sm:$0xff] %v7083_v25  ;;  %7096 = vtanh.f32 %v3448_v42 }
 0x356   : > { %v7087_v13 = vpop.eup %7086  ;;  %3499 = vst.msk [vmem:[#allocation3 + $0x8] sm:$0xff] %vm3498_vm7, %v7085_v21 }
 0x357   : > { %v7089_v19 = vpop.eup %7088  ;;  %3500 = vst [vmem:[#allocation3 + $0x10] sm:$0xff] %v7087_v13  ;;  %v3352_v8 = vpop.f32.mrb[36].mxu0  ;;  %v8500_v45 = vrot.slane %v7087_v13, 1 }
 0x358   : > { %3501 = vst.msk [vmem:[#allocation3 + $0x18] sm:$0xff] %vm3498_vm7, %v7089_v19  ;;  %v3449_v26 = vadd.f32 %v8480_v54, %v3352_v8  ;;  %v3354_v50 = vpop.f32.mrb[37].mxu0 }
 0x359   : > { %v3450_v39 = vadd.f32 %v8484_v53, %v3354_v50  ;;  %v3356_v57 = vpop.f32.mrb[38].mxu0 }
 0x35a   : > { %7098 = vtanh.f32 %v3449_v26  ;;  %v3451_v43 = vadd.f32 %v8480_v54, %v3356_v57  ;;  %v3358_v62 = vpop.f32.mrb[39].mxu0 }
 0x35b   : > { %7100 = vtanh.f32 %v3450_v39  ;;  %v3452_v44 = vadd.f32 %v8484_v53, %v3358_v62 }
 0x35c   : > { %v7091_v34 = vpop.eup %7090  ;;  %7102 = vtanh.f32 %v3451_v43  ;;  %v3724_v51 = vld [vmem:[#allocation3] sm:$0xf8] }
 0x35d   : > { %v3553_v18 = vld [vmem:[#allocation3] sm:$0xfe]  ;;  %v7093_v29 = vpop.eup %7092  ;;  %3502 = vst [vmem:[#allocation3 + $0x20] sm:$0xff] %v7091_v34  ;;  %7104 = vtanh.f32 %v3452_v44  ;;  %v3590_v48 = vrot.slane %v7091_v34, 1  ;;  %v3732_v28 = vrot.slane %v3724_v51, 1 }
 0x35e   : > { %v7095_v59 = vpop.eup %7094  ;;  %3503 = vst.msk [vmem:[#allocation3 + $0x28] sm:$0xff] %vm3498_vm7, %v7093_v29  ;;  %v3584_v11 = vrot.slane %v3553_v18, 1  ;;  %v3720_v52 = vld [vmem:[#allocation3] sm:$0xfc]  ;;  %v4169_v12 = vld [vmem:[#allocation3 + $0x8] sm:$0xe0] }
 0x35f   : > { %v7097_v58 = vpop.eup %7096  ;;  %3504 = vst [vmem:[#allocation3 + $0x30] sm:$0xff] %v7095_v59  ;;  %v3362_v56 = vpop.f32.mrb[40].mxu0  ;;  %v3591_v49 = vsel %vm2426_vm4, %v8500_v45, %v3590_v48  ;;  %v3594_v4 = vrot.slane %v7095_v59, 1  ;;  %v3733_v41 = vsel %vm2426_vm4, %v3732_v28, %v8500_v45  ;;  %v8509_v61 = vld [vmem:[#allocation3 + $0x18] sm:$0xff]  ;;  %v3725_v23 = vld [vmem:[#allocation3 + $0x8] sm:$0xf8] }
 0x360   : > { %3505 = vst.msk [vmem:[#allocation3 + $0x38] sm:$0xff] %vm3498_vm7, %v7097_v58  ;;  %v3453_v37 = vadd.f32 %v8480_v54, %v3362_v56  ;;  %v3364_v60 = vpop.f32.mrb[41].mxu0  ;;  %v8511_v27 = vadd.f32 %v7087_v13, %v3591_v49  ;;  %v8513_v46 = vadd.f32 %v3733_v41, %v3720_v52  ;;  %v3586_v63 = vsel %vm2426_vm4, %v3584_v11, %v8500_v45  ;;  %v4168_v24 = vld [vmem:[#allocation3] sm:$0xe0]  ;;  %v4165_v18 = vld [vmem:[#allocation3 + $0x8] sm:$0xf0] }
 0x361   : > { %v3454_v22 = vadd.f32 %v8484_v53, %v3364_v60  ;;  %v3366_v0 = vpop.f32.mrb[42].mxu0  ;;  %v3595_v10 = vsel %vm2426_vm4, %v3590_v48, %v3594_v4  ;;  %v8522_v33 = vrot.slane %v8509_v61, 1  ;;  %v8526_v38 = vadd.f32 %v7083_v25, %v3586_v63 }
 0x362   : > { %7106 = vtanh.f32 %v3453_v37  ;;  %v3455_v20 = vadd.f32 %v8480_v54, %v3366_v0  ;;  %v3368_v35 = vpop.f32.mrb[43].mxu0  ;;  %v3664_v15 = vadd.f32 %v7091_v34, %v3595_v10  ;;  %v3752_v2 = vpack.c.bf16 %v8511_v27, %v8513_v46  ;;  %v4164_v37 = vld [vmem:[#allocation3] sm:$0xf0] }
 0x363   : > { %7108 = vtanh.f32 %v3454_v22  ;;  %v3456_v9 = vadd.f32 %v8484_v53, %v3368_v35  ;;  %v4178_v1 = vrot.slane %v4169_v12, 1  ;;  %v3734_v32 = vrot.slane %v3725_v23, 1 }
 0x364   : > { %v7099_v30 = vpop.eup %7098  ;;  %7110 = vtanh.f32 %v3455_v20  ;;  %v4176_v25 = vrot.slane %v4168_v24, 1 }
 0x365   : > { %v7101_v3 = vpop.eup %7100  ;;  %3506 = vst [vmem:[#allocation3 + $0x40] sm:$0xff] %v7099_v30  ;;  %7112 = vtanh.f32 %v3456_v9  ;;  %v3532_v55 = vld [vmem:[#allocation3 + $0x28] sm:$0xff]  ;;  %v3598_v40 = vrot.slane %v7099_v30, 1  ;;  %v4179_v42 = vsel %vm2426_vm4, %v4178_v1, %v8522_v33  ;;  %v3735_v34 = vsel %vm2426_vm4, %v3734_v32, %v8522_v33 }
 0x366   : > { %v7103_v5 = vpop.eup %7102  ;;  %3507 = vst.msk [vmem:[#allocation3 + $0x48] sm:$0xff] %vm3498_vm7, %v7101_v3  ;;  %v8529_v17 = vrot.slane %v3532_v55, 1  ;;  %v4191_v48 = vadd.f32 %v4179_v42, %v4165_v18  ;;  %v4177_v28 = vsel %vm2426_vm4, %v4176_v25, %v8500_v45  ;;  %v3793_v18 = vrot.slane %v3752_v2, 1 }
 0x367   : > { %v7105_v31 = vpop.eup %7104  ;;  %3508 = vst [vmem:[#allocation3 + $0x50] sm:$0xff] %v7103_v5  ;;  %v3372_v36 = vpop.f32.mrb[44].mxu0  ;;  %v3534_v47 = vld [vmem:[#allocation3 + $0x38] sm:$0xff]  ;;  %v3599_v16 = vsel %vm2426_vm4, %v3594_v4, %v3598_v40  ;;  %v3602_v6 = vrot.slane %v7103_v5, 1  ;;  %v3721_v4 = vld [vmem:[#allocation3 + $0x8] sm:$0xfc]  ;;  %v8563_v0 = vadd.f32 %v4177_v28, %v4164_v37 }
 0x368   : > { %3509 = vst.msk [vmem:[#allocation3 + $0x58] sm:$0xff] %vm3498_vm7, %v7105_v31  ;;  %v3457_v21 = vadd.f32 %v8480_v54, %v3372_v36  ;;  %v3374_v13 = vpop.f32.mrb[45].mxu0  ;;  %v3593_v19 = vsel %vm2426_vm4, %v8522_v33, %v8529_v17  ;;  %v3596_v8 = vrot.slane %v3534_v47, 1  ;;  %v3666_v26 = vadd.f32 %v7095_v59, %v3599_v16 }
 0x369   : > { %v3458_v50 = vadd.f32 %v8484_v53, %v3374_v13  ;;  %v3376_v39 = vpop.f32.mrb[46].mxu0  ;;  %v8543_v57 = vadd.f32 %v3593_v19, %v8509_v61  ;;  %v3603_v43 = vsel %vm2426_vm4, %v3598_v40, %v3602_v6  ;;  %v3747_v22 = vadd.f32 %v3735_v34, %v3721_v4 }
 0x36a   : > { %7114 = vtanh.f32 %v3457_v21  ;;  %v3459_v62 = vadd.f32 %v8480_v54, %v3376_v39  ;;  %v3378_v44 = vpop.f32.mrb[47].mxu0  ;;  %v8549_v51 = vpack.c.bf16 %v3666_v26, %v3664_v15  ;;  %v3597_v11 = vsel %vm2426_vm4, %v8529_v17, %v3596_v8  ;;  %v4473_v21 = vld [vmem:[#allocation3 + $0x8] sm:$0x80] }
 0x36b   : > { %7116 = vtanh.f32 %v3458_v50  ;;  %v3460_v29 = vadd.f32 %v8484_v53, %v3378_v44  ;;  %v3668_v58 = vadd.f32 %v7099_v30, %v3603_v43  ;;  %v4197_v41 = vpack.c.bf16 %v8543_v57, %v4191_v48 }
 0x36c   : > { %v7107_v59 = vpop.eup %7106  ;;  %7118 = vtanh.f32 %v3459_v62  ;;  %v8566_v20 = vadd.f32 %v3597_v11, %v3532_v55  ;;  %v3753_v24 = vpack.c.bf16 %v8543_v57, %v3747_v22 }
 0x36d   : > { %v7109_v56 = vpop.eup %7108  ;;  %3510 = vst [vmem:[#allocation3 + $0x60] sm:$0xff] %v7107_v59  ;;  %7120 = vtanh.f32 %v3460_v29  ;;  %v8556_v49 = vld [vmem:[#allocation3 + $0x48] sm:$0xff]  ;;  %v3606_v52 = vrot.slane %v7107_v59, 1  ;;  %v4232_v26 = vrot.slane %v4197_v41, 2  ;;  %v6916_v29 = vld [vmem:[%s9496_s6] sm:$0xff]  }
 0x36e   : > { %v8559_v60 = vpop.eup %7110  ;;  %3511 = vst.msk [vmem:[#allocation3 + $0x68] sm:$0xff] %vm3498_vm7, %v7109_v56  ;;  %v3600_v45 = vrot.slane %v8556_v49, 1  ;;  %v3796_v19 = vrot.slane %v3753_v24, 1 }
 0x36f   : > { %v7113_v10 = vpop.eup %7112  ;;  %3512 = vst [vmem:[#allocation3 + $0x70] sm:$0xff] %v8559_v60  ;;  %v3382_v63 = vpop.f32.mrb[48].mxu0  ;;  %v3538_v35 = vld [vmem:[#allocation3 + $0x58] sm:$0xff]  ;;  %v3607_v15 = vsel %vm2426_vm4, %v3602_v6, %v3606_v52  ;;  %v3610_v12 = vrot.slane %v8559_v60, 1 }
 0x370   : > { %3513 = vst.msk [vmem:[#allocation3 + $0x78] sm:$0xff] %vm3498_vm7, %v7113_v10  ;;  %v3461_v9 = vadd.f32 %v8480_v54, %v3382_v63  ;;  %v3384_v23 = vpop.f32.mrb[49].mxu0  ;;  %v3601_v30 = vsel %vm2426_vm4, %v3596_v8, %v3600_v45  ;;  %v3670_v3 = vadd.f32 %v7103_v5, %v3607_v15  ;;  %v3604_v6 = vrot.slane %v3538_v35, 1 }
 0x371   : > { %v3462_v40 = vadd.f32 %v8484_v53, %v3384_v23  ;;  %v3386_v1 = vpop.f32.mrb[50].mxu0  ;;  %v8575_v55 = vadd.f32 %v3601_v30, %v3534_v47  ;;  %v3611_v32 = vsel %vm2426_vm4, %v3606_v52, %v3610_v12  ;;  %v3794_v47 = vrot.slane %v8549_v51, 1 }
 0x372   : > { %7122 = vtanh.f32 %v3461_v9  ;;  %v3463_v36 = vadd.f32 %v8480_v54, %v3386_v1  ;;  %v3388_v16 = vpop.f32.mrb[51].mxu0  ;;  %v8581_v42 = vpack.c.bf16 %v3670_v3, %v3668_v58  ;;  %v3672_v8 = vadd.f32 %v7107_v59, %v3611_v32 }
 0x373   : > { %7124 = vtanh.f32 %v3462_v40  ;;  %v3464_v5 = vadd.f32 %v8484_v53, %v3388_v16  ;;  %v8586_v25 = vpack.c.bf16 %v8575_v55, %v8566_v20  ;;  %v3605_v48 = vsel %vm2426_vm4, %v3600_v45, %v3604_v6 }
 0x374   : > { %v7115_v13 = vpop.eup %7114  ;;  %7126 = vtanh.f32 %v3463_v36  ;;  %v4507_v59 = vrot.slane %v4473_v21, 1  ;;  %v3795_v45 = vsel %vm2426_vm4, %v3793_v18, %v3794_v47  ;;  %v3799_v32 = vrot.slane %v8581_v42, 1 }
 0x375   : > { %v7117_v50 = vpop.eup %7116  ;;  %3514 = vst [vmem:[#allocation3 + $0x80] sm:$0xff] %v7115_v13  ;;  %7128 = vtanh.f32 %v3464_v5  ;;  %v3797_v39 = vrot.slane %v8586_v25, 1  ;;  %v8590_v43 = vld [vmem:[#allocation3 + $0x68] sm:$0xff]  ;;  %v3614_v62 = vrot.slane %v7115_v13, 1  ;;  %v4233_v44 = vrot.slane %v8586_v25, 2 }
 0x376   : > { %v8593_v34 = vpop.eup %7118  ;;  %3515 = vst.msk [vmem:[#allocation3 + $0x88] sm:$0xff] %vm3498_vm7, %v7117_v50  ;;  %v3608_v28 = vrot.slane %v8590_v43, 1 }
 0x377   : > { %v7121_v11 = vpop.eup %7120  ;;  %3516 = vst [vmem:[#allocation3 + $0x90] sm:$0xff] %v8593_v34  ;;  %v3392_v58 = vpop.f32.mrb[52].mxu0  ;;  %v3798_v56 = vsel %vm2426_vm4, %v3796_v19, %v3797_v39  ;;  %v8608_v4 = vld [vmem:[#allocation3 + $0x78] sm:$0xff]  ;;  %v3615_v46 = vsel %vm2426_vm4, %v3610_v12, %v3614_v62  ;;  %v3618_v2 = vrot.slane %v8593_v34, 1  ;;  %v8615_v52 = vsel %vm3132_vm6, %v4232_v26, %v4233_v44  ;;  %v4445_v19 = vld [vmem:[#allocation3 + $0x8] sm:$0xc0] }
 0x378   : > { %3517 = vst.msk [vmem:[#allocation3 + $0x98] sm:$0xff] %vm3498_vm7, %v7121_v11  ;;  %v3465_v41 = vadd.f32 %v8480_v54, %v3392_v58  ;;  %v3394_v37 = vpop.f32.mrb[53].mxu0  ;;  %6022 = vmatprep.mubr.msk.bf16.mxu1 %vm3498_vm7, %v3798_v56  ;;  %v3609_v22 = vsel %vm2426_vm4, %v3604_v6, %v3608_v28  ;;  %v3674_v10 = vadd.f32 %v8559_v60, %v3615_v46  ;;  %v6917_v60 = vld [vmem:[%s9496_s6 + $0x8] sm:$0xff]   ;;  %v3612_v3 = vrot.slane %v8608_v4, 1 }
 0x379   : > { %v3466_v63 = vadd.f32 %v8484_v53, %v3394_v37  ;;  %v3396_v15 = vpop.f32.mrb[54].mxu0  ;;  %3940 = vmatmul.mubr.bf16.vlgmr.msra.gmra.mrb[28].mxu1 %v3795_v45  ;;  %v8627_v12 = vadd.f32 %v3605_v48, %v8556_v49  ;;  %v8629_v9 = vadd.f32 %v3609_v22, %v3538_v35  ;;  %v3619_v23 = vsel %vm2426_vm4, %v3614_v62, %v3618_v2 }
 0x37a   : > { %7130 = vtanh.f32 %v3465_v41  ;;  %v3467_v30 = vadd.f32 %v8480_v54, %v3396_v15  ;;  %v3398_v24 = vpop.f32.mrb[55].mxu0  ;;  %4077 = vmatpush1.bf16.msra.mxu1 %v6916_v29  ;;  %v8637_v40 = vpack.c.bf16 %v3674_v10, %v3672_v8  ;;  %v4509_v54 = vsel %vm2426_vm4, %v4507_v59, %v8522_v33 }
 0x37b   : > { %7132 = vtanh.f32 %v3466_v63  ;;  %v3468_v49 = vadd.f32 %v8484_v53, %v3398_v24  ;;  %4078 = vmatprep.subr.bf16.mxu1 %v9510_v7  ;;  %v8643_v35 = vpack.c.bf16 %v8629_v9, %v8627_v12  ;;  %v3676_v36 = vadd.f32 %v7115_v13, %v3619_v23  ;;  %v6918_v13 = vld [vmem:[%s9496_s6 + $0x10] sm:$0xff]  }
 0x37c   : > { %v7123_v1 = vpop.eup %7122  ;;  %7134 = vtanh.f32 %v3467_v30  ;;  %v3613_v26 = vsel %vm2426_vm4, %v3608_v28, %v3612_v3  ;;  %v4587_v62 = vadd.f32 %v4509_v54, %v4445_v19  ;;  %v4668_v37 = vrot.slane %v8586_v25, 3 }
 0x37d   : > { %v7125_v16 = vpop.eup %7124  ;;  %3518 = vst [vmem:[#allocation3 + $0xa0] sm:$0xff] %v7123_v1  ;;  %7136 = vtanh.f32 %v3468_v49  ;;  %v3801_v6 = vrot.slane %v8643_v35, 1  ;;  %v8649_v53 = vld [vmem:[#allocation3 + $0x88] sm:$0xff]  ;;  %v3622_v5 = vrot.slane %v7123_v1, 1  ;;  %v4237_v21 = vrot.slane %v8643_v35, 2 }
 0x37e   : > { %v8652_v8 = vpop.eup %7126  ;;  %3519 = vst.msk [vmem:[#allocation3 + $0xa8] sm:$0xff] %vm3498_vm7, %v7125_v16  ;;  %4079 = vmatpush1.bf16.msra.mxu1 %v6917_v60  ;;  %v3616_v50 = vrot.slane %v8649_v53, 1  ;;  %v4615_v46 = vpack.c.bf16 %v8543_v57, %v4587_v62  ;;  %v3803_v63 = vrot.slane %v8637_v40, 1 }
 0x37f   : > { %v7129_v18 = vpop.eup %7128  ;;  %3520 = vst [vmem:[#allocation3 + $0xb0] sm:$0xff] %v8652_v8  ;;  %v3802_v29 = vsel %vm2426_vm4, %v3797_v39, %v3801_v6  ;;  %4080 = vmatprep.subr.bf16.mxu1 %v9510_v7  ;;  %v3546_v48 = vld [vmem:[#allocation3 + $0x98] sm:$0xff]  ;;  %v3623_v59 = vsel %vm2426_vm4, %v3618_v2, %v3622_v5  ;;  %v8667_v11 = vrot.slane %v8652_v8, 1  ;;  %v8672_v28 = vsel %vm3132_vm6, %v4233_v44, %v4237_v21 }
 0x380   : > { %3521 = vst.msk [vmem:[#allocation3 + $0xb8] sm:$0xff] %vm3498_vm7, %v7129_v18  ;;  %6023 = vmatprep.mubr.msk.bf16.mxu1 %vm3498_vm7, %v3802_v29  ;;  %v3800_v39 = vsel %vm2426_vm4, %v3794_v47, %v3799_v32  ;;  %v3617_v58 = vsel %vm2426_vm4, %v3612_v3, %v3616_v50  ;;  %v3678_v56 = vadd.f32 %v8593_v34, %v3623_v59  ;;  %v6919_v47 = vld [vmem:[%s9496_s6 + $0x18] sm:$0xff]   ;;  %v3620_v34 = vrot.slane %v3546_v48, 1  ;;  %v6921_v59 = vld [vmem:[%s9496_s6 + $0x28] sm:$0xff]  }
 0x381   : > { %3948 = vmatmul.mubr.bf16.gmra.mrb[32].mxu1 %v3800_v39  ;;  %v8685_v44 = vadd.f32 %v3613_v26, %v8590_v43  ;;  %v8688_v2 = vadd.f32 %v3617_v58, %v8608_v4  ;;  %v3627_v41 = vsel %vm2426_vm4, %v3622_v5, %v8667_v11  ;;  %v4667_v43 = vrot.slane %v4615_v46, 3 }
 0x382   : > { %4081 = vmatpush1.bf16.msra.mxu1 %v6918_v13  ;;  %v8696_v45 = vpack.c.bf16 %v3678_v56, %v3676_v36  ;;  %v8698_v22 = vadd.f32 %v7123_v1, %v3627_v41  ;;  %v3621_v54 = vsel %vm2426_vm4, %v3616_v50, %v3620_v34  ;;  %v6920_v36 = vld [vmem:[%s9496_s6 + $0x20] sm:$0xff]   ;;  %v4672_v58 = vrot.slane %v8643_v35, 3 }
 0x383   : > { %v8702_v4 = vpack.c.bf16 %v8688_v2, %v8685_v44  ;;  %4082 = vmatprep.subr.bf16.mxu1 %v9510_v7  ;;  %v8709_v15 = vsel %vm4663_vm8, %v4667_v43, %v4668_v37  ;;  %v8746_v18 = vadd.f32 %v3621_v54, %v8649_v53 }
 0x384   : > { %v8705_v10 = vpop.eup %7130  ;;  %v3807_v53 = vrot.slane %v8696_v45, 1 }
 0x385   : > { %v7133_v23 = vpop.eup %7132  ;;  %3522 = vst [vmem:[#allocation3 + $0xc0] sm:$0xff] %v8705_v10  ;;  %v3805_v30 = vrot.slane %v8702_v4, 1  ;;  %v3548_v24 = vld [vmem:[#allocation3 + $0xa8] sm:$0xff]  ;;  %v4241_v60 = vrot.slane %v8702_v4, 2  ;;  %v4180_v3 = vrot.slane %v8705_v10, 1 }
 0x386   : > { %v7135_v49 = vpop.eup %7134  ;;  %3523 = vst.msk [vmem:[#allocation3 + $0xc8] sm:$0xff] %vm3498_vm7, %v7133_v23  ;;  %4083 = vmatpush1.bf16.msra.mxu1 %v6919_v47  ;;  %v3624_v1 = vrot.slane %v3548_v24, 1  ;;  %v8771_v47 = vsel %vm4663_vm8, %v4668_v37, %v4672_v58  ;;  %v6922_v37 = vld [vmem:[%s9496_s6 + $0x30] sm:$0xff]  }
 0x387   : > { %v7137_v16 = vpop.eup %7136  ;;  %3524 = vst [vmem:[#allocation3 + $0xd0] sm:$0xf] %v7135_v49  ;;  %v3806_v5 = vsel %vm2426_vm4, %v3801_v6, %v3805_v30  ;;  %4084 = vmatprep.subr.bf16.mxu1 %v9510_v7  ;;  %v8722_v19 = vld [vmem:[#allocation3 + $0xb8] sm:$0xff]  ;;  %v8727_v13 = vsel %vm3132_vm6, %v4237_v21, %v4241_v60  ;;  %v4181_v26 = vsel %vm2426_vm4, %v8667_v11, %v4180_v3 }
 0x388   : > { %3526 = vst.msk [vmem:[#allocation3 + $0xd8] sm:$0xf] %vm3525_vm9, %v7137_v16  ;;  %6024 = vmatprep.mubr.msk.bf16.mxu1 %vm3498_vm7, %v3806_v5  ;;  %v3804_v6 = vsel %vm2426_vm4, %v3799_v32, %v3803_v63  ;;  %v3625_v50 = vsel %vm2426_vm4, %v3620_v34, %v3624_v1  ;;  %v8740_v62 = vrot.slane %v8722_v19, 1  ;;  %v8743_v21 = vadd.f32 %v8652_v8, %v4181_v26 }
 0x389   : > { %3956 = vmatmul.mubr.bf16.gmra.mrb[36].mxu1 %v3804_v6  ;;  %v8748_v29 = vadd.f32 %v3625_v50, %v3546_v48  ;;  %v3808_v26 = vsel %vm2426_vm4, %v3803_v63, %v3807_v53 }
 0x38a   : > { %4085 = vmatpush1.bf16.msra.mxu1 %v6920_v36  ;;  %v3629_v32 = vsel %vm2426_vm4, %v3624_v1, %v8740_v62  ;;  %v4198_v39 = vpack.c.bf16 %v8743_v21, %v8698_v22 }
 0x38b   : > { %9522 = vst [vmem:[#allocation9_spill] sm:$0xff] %v8748_v29  ;;  %v8760_v56 = vpack.c.bf16 %v8748_v29, %v8746_v18  ;;  %4086 = vmatprep.subr.bf16.mxu1 %v9510_v7  ;;  %v8764_v48 = vadd.f32 %v3629_v32, %v3548_v24 }
 0x38c   : > { %v3726_v46 = vld [vmem:[#allocation3 + $0xc0] sm:$0x3f] }
 0x38d   : > { %v8766_v41 = vld [vmem:[#allocation3 + $0xc0] sm:$0xf]  ;;  %v3809_v23 = vrot.slane %v8760_v56, 1  ;;  %v3727_v49 = vld [vmem:[#allocation3 + $0xc8] sm:$0x3f]  ;;  %v3736_v54 = vrot.slane %v3726_v46, 1 }
 0x38e   : > { %4087 = vmatpush1.bf16.msra.mxu1 %v6921_v59  ;;  %v3738_v1 = vrot.slane %v3727_v49, 1  ;;  %v9509_v36 = vrot.slane %v8766_v41, 1  ;;  %v3723_v50 = vld [vmem:[#allocation3 + $0xc8] sm:$0x1f]  ;;  %v3722_v24 = vld [vmem:[#allocation3 + $0xc0] sm:$0x1f] }
 0x38f   : > { %v3810_v5 = vsel %vm2426_vm4, %v3805_v30, %v3809_v23  ;;  %v3737_v6 = vsel %vm2426_vm4, %v8667_v11, %v3736_v54  ;;  %4088 = vmatprep.subr.bf16.mxu1 %v9510_v7  ;;  %v4680_v21 = vrot.slane %v8760_v56, 3  ;;  %v4471_v31 = vld [vmem:[#allocation3 + $0xd8] sm:$0x1] }
 0x390   : > { %6025 = vmatprep.mubr.msk.bf16.mxu1 %vm3498_vm7, %v3810_v5  ;;  %v3739_v59 = vsel %vm2426_vm4, %v8740_v62, %v3738_v1  ;;  %v3748_v32 = vadd.f32 %v8652_v8, %v3737_v6  ;;  %v3751_v46 = vadd.f32 %v3738_v1, %v3723_v50  ;;  %v3631_v30 = vsel %vm2426_vm4, %v8667_v11, %v9509_v36  ;;  %v6923_v6 = vld [vmem:[%s9496_s6 + $0x38] sm:$0xff]   ;;  %v8807_v1 = vld [vmem:[#allocation3 + $0xc8] sm:$0xff]  ;;  %v8886_v36 = vld [vmem:[#allocation3 + $0xc0] sm:$0xff] }
 0x391   : > { %3964 = vmatmul.mubr.bf16.gmra.mrb[40].mxu1 %v3808_v26  ;;  %v3749_v63 = vadd.f32 %v3739_v59, %v8722_v19  ;;  %v8801_v49 = vadd.f32 %v8652_v8, %v3631_v30  ;;  %v4166_v8 = vld [vmem:[#allocation3 + $0xc0] sm:$0x7f]  ;;  %v3750_v59 = vadd.f32 %v3736_v54, %v3722_v24  ;;  %v8815_v30 = vrot.slane %v8807_v1, 1  ;;  %v8899_v29 = vld [vmem:[#allocation3 + $0xd8] sm:$0xf] }
 0x392   : > { %v3754_v16 = vpack.c.bf16 %v3748_v32, %v8698_v22  ;;  %v3757_v5 = vpack.c.bf16 %v3751_v46, %v3751_v46  ;;  %4089 = vmatpush1.bf16.msra.mxu1 %v6922_v37  ;;  %v4245_v37 = vrot.slane %v8760_v56, 2  ;;  %v4194_v43 = vadd.f32 %v4180_v3, %v4166_v8 }
 0x393   : > { %v3755_v50 = vpack.c.bf16 %v3749_v63, %v8764_v48  ;;  %4090 = vmatprep.subr.bf16.mxu1 %v9510_v7  ;;  %v6924_v63 = vld [vmem:[%s9496_s6 + $0x40] sm:$0xff]   ;;  %v4183_v24 = vsel %vm2426_vm4, %v8740_v62, %v8815_v30 }
 0x394   : > { %v3811_v26 = vrot.slane %v3754_v16, 1  ;;  %v3817_v46 = vrot.slane %v3757_v5, 1  ;;  %v8827_v54 = vsel %vm3132_vm6, %v4241_v60, %v4245_v37  ;;  %v3756_v5 = vpack.c.bf16 %v3750_v59, %v3750_v59  ;;  %v6925_v60 = vld [vmem:[%s9496_s6 + $0x48] sm:$0xff]  }
 0x395   : > { %v3813_v32 = vrot.slane %v3755_v50, 1  ;;  %v8835_v10 = vadd.f32 %v4183_v24, %v8722_v19  ;;  %v4200_v3 = vpack.c.bf16 %v4194_v43, %v4194_v43  ;;  %v4475_v24 = vld [vmem:[#allocation3 + $0xd8] sm:$0x3] }
 0x396   : > { %4091 = vmatpush1.bf16.msra.mxu1 %v6923_v6  ;;  %v3812_v16 = vsel %vm2426_vm4, %v3807_v53, %v3811_v26  ;;  %v4676_v6 = vrot.slane %v8702_v4, 3  ;;  %v3815_v8 = vrot.slane %v3756_v5, 1 }
 0x397   : > { %v3814_v34 = vsel %vm2426_vm4, %v3809_v23, %v3813_v32  ;;  %4092 = vmatprep.subr.bf16.mxu1 %v9510_v7  ;;  %v3818_v23 = vsel %vm2426_vm4, %v3813_v32, %v3817_v46  ;;  %v8845_v53 = vpack.c.bf16 %v8835_v10, %v8764_v48  ;;  %v8852_v43 = vrot.slane %v4200_v3, 2 }
 0x398   : > { %6026 = vmatprep.mubr.msk.bf16.mxu1 %vm3498_vm7, %v3814_v34  ;;  %v8850_v34 = vrot.slane %v4198_v39, 2  ;;  %v8858_v50 = vsel %vm4663_vm8, %v4672_v58, %v4676_v6  ;;  %v3554_v39 = vld [vmem:[#allocation3 + $0x8] sm:$0xfe]  ;;  %v8874_v58 = vsel %vm4663_vm8, %v4676_v6, %v4680_v21 }
 0x399   : > { %3972 = vmatmul.mubr.bf16.gmra.mrb[44].mxu1 %v3812_v16  ;;  %v9508_v59 = vrot.slane %v8845_v53, 2  ;;  %v3816_v16 = vsel %vm2426_vm4, %v3811_v26, %v3815_v8  ;;  %v4684_v5 = vrot.slane %v8845_v53, 3  ;;  %v3587_v3 = vrot.slane %v3554_v39, 1  ;;  %v3528_v39 = vld [vmem:[#allocation3 + $0x8] sm:$0xff] }
 0x39a   : > { %6027 = vmatprep.mubr.msk.bf16.mxu1 %vm3498_vm7, %v3818_v23  ;;  %4093 = vmatpush1.bf16.msra.mxu1 %v6924_v63  ;;  %v8864_v32 = vsel %vm3132_vm6, %v8850_v34, %v8852_v43  ;;  %v4556_v23 = vrot.slane %v4475_v24, 1 }
 0x39b   : > { %4094 = vmatprep.subr.bf16.mxu1 %v9510_v7  ;;  %v8870_v63 = vsel %vm3132_vm6, %v4245_v37, %v9508_v59  ;;  %v4882_v37 = vld [vmem:[#allocation3 + $0x18] sm:$0xfe]  ;;  %v3589_v59 = vsel %vm2426_vm4, %v3587_v3, %v8522_v33 }
 0x39c   : > { %v4557_v6 = vsel %vm2426_vm4, %v8815_v30, %v4556_v23  ;;  %v4891_v24 = vrot.slane %v4882_v37, 1  ;;  %v3661_v11 = vadd.f32 %v3589_v59, %v3528_v39  ;;  %v6926_v37 = vld [vmem:[%s9496_s6 + $0xa0] sm:$0xff]  }
 0x39d   : > { %v4611_v26 = vadd.f32 %v4557_v6, %v8807_v1  ;;  %v8901_v6 = vld [vmem:[#allocation3 + $0xd0] sm:$0xf] }
 0x39e   : > { %4095 = vmatpush1.bf16.msra.mxu1 %v6925_v60  ;;  %v8880_v60 = vsel %vm4663_vm8, %v4680_v21, %v4684_v5  ;;  %v4892_v33 = vsel %vm2426_vm4, %v4891_v24, %v8529_v17  ;;  %v3687_v3 = vpack.c.bf16 %v8543_v57, %v3661_v11  ;;  %v4895_v11 = vrot.slane %v8899_v29, 1 }
 0x39f   : > { %4343 = vmatprep.subr.bf16.mxu1 %v9510_v7  ;;  %v8892_v7 = vrot.slane %v8886_v36, 1  ;;  %v8905_v59 = vadd.f32 %v4892_v33, %v8509_v61  ;;  %v9523_v33 = vpack.c.bf16 %v8511_v27, %v8526_v38  ;;  %v6929_v38 = vld [vmem:[%s9496_s6 + $0xb8] sm:$0xff]  }
 0x3a0   : > { %v4896_v61 = vsel %vm2426_vm4, %v8815_v30, %v4895_v11 }
 0x3a1   : > { %3980 = vmatmul.mubr.bf16.gmra.mrb[48].mxu1 %v3816_v16  ;;  %v4613_v16 = vadd.f32 %v4556_v23, %v4471_v31  ;;  %v4910_v57 = vpack.c.bf16 %v8566_v20, %v8905_v59 }
 0x3a2   : > { %6028 = vmatprep.mubr.msk.bf16.mxu1 %vm3498_vm7, %v3817_v46  ;;  %v8889_v46 = vld [vmem:[#allocation3 + $0xb0] sm:$0xff] }
 0x3a3   : > { %v4627_v21 = vpack.c.bf16 %v4613_v16, %v4611_v26  ;;  %v4546_v31 = vrot.slane %v8889_v46, 1  ;;  %v8935_v16 = vadd.f32 %v4896_v61, %v8807_v1  ;;  %v6927_v1 = vld [vmem:[%s9496_s6 + $0xa8] sm:$0xff]  }
 0x3a4   : > { %v3556_v61 = vld [vmem:[#allocation3 + $0xc8] sm:$0xf] }
 0x3a5   : > { %v8897_v14 = vrot.slane %v4627_v21, 3  ;;  %v4551_v17 = vsel %vm2426_vm4, %v4546_v31, %v8892_v7  ;;  %v4920_v24 = vpack.c.bf16 %v8935_v16, %v8835_v10 }
 0x3a6   : > { %v8932_v26 = vadd.f32 %v4551_v17, %v8889_v46  ;;  %v6928_v17 = vld [vmem:[%s9496_s6 + $0xb0] sm:$0xff]  }
 0x3a7   : > { %v8910_v23 = vsel %vm4663_vm8, %v4684_v5, %v8897_v14 }
 0x3a9   : > { %3988 = vmatmul.mubr.bf16.gmra.mrb[52].mxu1 %v3815_v8  ;;  %v4893_v8 = vrot.slane %v8901_v6, 1 }
 0x3aa   : > { %6039 = vmatprep.mubr.msk.bf16.mxu1 %vm3498_vm7, %v3687_v3  ;;  %v9524_v3 = vmov 0  }
 0x3ab   : > { %v4894_v5 = vsel %vm2426_vm4, %v8892_v7, %v4893_v8 }
 0x3ac   : > { %v8938_v39 = vadd.f32 %v4894_v5, %v8886_v36  ;;  %v3632_v5 = vrot.slane %v3556_v61, 1  ;;  %v3551_v61 = vld [vmem:[#allocation3 + $0xc0] sm:$0x7] }
 0x3ae   : > { %v4919_v21 = vpack.c.bf16 %v8938_v39, %v8932_v26  ;;  %v7256_v39 = vmov 0.0  }
 0x3af   : > { %6222 = vmatprep.subr.bf16.mxu0 %v7256_v39  ;;  %6238 = vmatprep.mubr.msk.bf16.mxu0 %vm7257_vm10, %v7256_v39 }
 0x3b1   : > { %4109 = vmatmul.mubr.bf16.vlgmr.msra.gmra.mrb[56].mxu1 %v9523_v33  ;;  %v6933_v33 = vld [vmem:[%s9496_s6 + $0xd8] sm:$0xff]  }
 0x3b2   : > { %6040 = vmatprep.mubr.msk.bf16.mxu1 %vm3498_vm7, %v8586_v25  ;;  %4344 = vmatpush1.bf16.msra.mxu1 %v6926_v37  ;;  %v6930_v25 = vld [vmem:[%s9496_s6 + $0xc0] sm:$0xff]   ;;  %v6932_v37 = vld [vmem:[%s9496_s6 + $0xd0] sm:$0xff]  }
 0x3b3   : > { %4345 = vmatprep.subr.bf16.mxu1 %v9524_v3 }
 0x3b6   : > { %4346 = vmatpush1.bf16.msra.mxu1 %v6927_v1 }
 0x3b7   : > { %4347 = vmatprep.subr.bf16.mxu1 %v9524_v3 }
 0x3b9   : > { %4117 = vmatmul.mubr.bf16.gmra.mrb[60].mxu1 %v8549_v51 }
 0x3ba   : > { %6041 = vmatprep.mubr.msk.bf16.mxu1 %vm3498_vm7, %v8643_v35  ;;  %4348 = vmatpush1.bf16.msra.mxu1 %v6928_v17  ;;  %v6931_v35 = vld [vmem:[%s9496_s6 + $0xc8] sm:$0xff]   ;;  %v6934_v17 = vld [vmem:[%s9496_s6 + $0xe0] sm:$0xff]  }
 0x3bb   : > { %4349 = vmatprep.subr.bf16.mxu1 %v9524_v3 }
 0x3be   : > { %4350 = vmatpush1.bf16.msra.mxu1 %v6929_v38  ;;  %v3552_v38 = vld [vmem:[#allocation3 + $0xc8] sm:$0x7] }
 0x3bf   : > { %4351 = vmatprep.subr.bf16.mxu1 %v9524_v3 }
 0x3c1   : > { %4125 = vmatmul.mubr.bf16.gmra.mrb[64].mxu1 %v8581_v42 }
 0x3c2   : > { %6042 = vmatprep.mubr.msk.bf16.mxu1 %vm3498_vm7, %v8702_v4  ;;  %4352 = vmatpush1.bf16.msra.mxu1 %v6930_v25  ;;  %v3633_v4 = vsel %vm2426_vm4, %v8740_v62, %v3632_v5 }
 0x3c3   : > { %4353 = vmatprep.subr.bf16.mxu1 %v9524_v3  ;;  %v3683_v1 = vadd.f32 %v3633_v4, %v8722_v19  ;;  %v3685_v19 = vadd.f32 %v3632_v5, %v3552_v38  ;;  %v4230_v5 = vrot.slane %v8549_v51, 2  ;;  %v6938_v51 = vld [vmem:[%s9496_s6 + $0x100] sm:$0xff]  }
 0x3c5   : > { %v3697_v62 = vpack.c.bf16 %v3683_v1, %v8764_v48  ;;  %v3699_v25 = vpack.c.bf16 %v3685_v19, %v3685_v19  ;;  %v9527_v1 = vpack.c.bf16 %v8511_v27, %v8563_v0  ;;  %v4235_v27 = vrot.slane %v8581_v42, 2  ;;  %v6942_v19 = vld [vmem:[%s9496_s6 + $0x120] sm:$0xff]  }
 0x3c6   : > { %4354 = vmatpush1.bf16.msra.mxu1 %v6931_v35  ;;  %v9525_v35 = vpack.c.bf16 %v8801_v49, %v8698_v22  ;;  %v6936_v22 = vld [vmem:[%s9496_s6 + $0xf0] sm:$0xff]   ;;  %v4239_v42 = vrot.slane %v8637_v40, 2 }
 0x3c7   : > { %4355 = vmatprep.subr.bf16.mxu1 %v9524_v3  ;;  %v4236_v0 = vsel %vm3132_vm6, %v4230_v5, %v4235_v27 }
 0x3c9   : > { %4133 = vmatmul.mubr.bf16.gmra.mrb[68].mxu1 %v8637_v40  ;;  %v4243_v40 = vrot.slane %v8696_v45, 2 }
 0x3ca   : > { %6043 = vmatprep.mubr.msk.bf16.mxu1 %vm3498_vm7, %v8760_v56  ;;  %4356 = vmatpush1.bf16.msra.mxu1 %v6932_v37  ;;  %v6935_v56 = vld [vmem:[%s9496_s6 + $0xe8] sm:$0xff]   ;;  %v9526_v37 = vrot.slane %v8766_v41, 1  ;;  %v6940_v41 = vld [vmem:[%s9496_s6 + $0x110] sm:$0xff]  }
 0x3cb   : > { %4357 = vmatprep.subr.bf16.mxu1 %v9524_v3 }
 0x3cc   : > { %v3684_v4 = vadd.f32 %v9526_v37, %v3551_v61  ;;  %v4248_v61 = vsel %vm3132_vm6, %v4243_v40, %v8850_v34  ;;  %v9074_v34 = vld [vmem:[#allocation3 + $0x10] sm:$0xff] }
 0x3ce   : > { %4358 = vmatpush1.bf16.msra.mxu1 %v6933_v33  ;;  %v3698_v33 = vpack.c.bf16 %v3684_v4, %v3684_v4  ;;  %v6945_v4 = vld [vmem:[%s9496_s6 + $0x138] sm:$0xff]  }
 0x3cf   : > { %4359 = vmatprep.subr.bf16.mxu1 %v9524_v3 }
 0x3d1   : > { %4141 = vmatmul.mubr.bf16.gmra.mrb[72].mxu1 %v8696_v45  ;;  %v6943_v45 = vld [vmem:[%s9496_s6 + $0x128] sm:$0xff]  }
 0x3d2   : > { %6044 = vmatprep.mubr.msk.bf16.mxu1 %vm3498_vm7, %v3697_v62  ;;  %4360 = vmatpush1.bf16.msra.mxu1 %v6934_v17  ;;  %v4229_v17 = vrot.slane %v9527_v1, 2  ;;  %v4240_v62 = vsel %vm3132_vm6, %v4235_v27, %v4239_v42  ;;  %v4450_v1 = vld [vmem:[#allocation3 + $0x30] sm:$0xff] }
 0x3d3   : > { %4361 = vmatprep.subr.bf16.mxu1 %v9524_v3 }
 0x3d4   : > { %v4231_v49 = vsel %vm3132_vm6, %v4229_v17, %v4230_v5  ;;  %v4448_v5 = vld [vmem:[#allocation3 + $0x20] sm:$0xff] }
 0x3d6   : > { %4362 = vmatpush1.bf16.msra.mxu1 %v6935_v56  ;;  %v4167_v56 = vld [vmem:[#allocation3 + $0xc8] sm:$0x7f] }
 0x3d7   : > { %4778 = vmatprep.subr.bf16.mxu1 %v9524_v3  ;;  %v4195_v38 = vadd.f32 %v8815_v30, %v4167_v56 }
 0x3d9   : > { %4149 = vmatmul.mubr.bf16.gmra.mrb[76].mxu1 %v9525_v35  ;;  %v6944_v35 = vld [vmem:[%s9496_s6 + $0x130] sm:$0xff]  }
 0x3da   : > { %6045 = vmatprep.mubr.msk.bf16.mxu1 %vm3498_vm7, %v3699_v25  ;;  %v4201_v25 = vpack.c.bf16 %v4195_v38, %v4195_v38  ;;  %v4444_v38 = vld [vmem:[#allocation3] sm:$0xc0] }
 0x3dc   : > { %v4253_v30 = vrot.slane %v4201_v25, 2 }
 0x3e1   : > { %4157 = vmatmul.mubr.bf16.gmra.mrb[80].mxu1 %v3698_v33  ;;  %v4452_v33 = vld [vmem:[#allocation3 + $0x40] sm:$0xff] }
 0x3e2   : > { %6076 = vmatprep.mubr.msk.bf16.mxu1 %vm3498_vm7, %v8615_v52  ;;  %v6937_v52 = vld [vmem:[%s9496_s6 + $0xf8] sm:$0xff]   ;;  %v4518_v17 = vrot.slane %v4452_v33, 1 }
 0x3e9   : > { %4376 = vmatmul.mubr.bf16.vlgmr.msra.gmra.mrb[84].mxu1 %v4231_v49  ;;  %v4472_v49 = vld [vmem:[#allocation3] sm:$0x80] }
 0x3ea   : > { %6077 = vmatprep.mubr.msk.bf16.mxu1 %vm3498_vm7, %v8672_v28  ;;  %4779 = vmatpush1.bf16.msra.mxu1 %v6936_v22  ;;  %v6939_v28 = vld [vmem:[%s9496_s6 + $0x108] sm:$0xff]   ;;  %v9076_v22 = vrot.slane %v4448_v5, 1 }
 0x3eb   : > { %4780 = vmatprep.subr.bf16.mxu1 %v9524_v3 }
 0x3ee   : > { %4781 = vmatpush1.bf16.msra.mxu1 %v6937_v52  ;;  %v4505_v52 = vrot.slane %v9074_v34, 1 }
 0x3ef   : > { %4782 = vmatprep.subr.bf16.mxu1 %v9524_v3 }
 0x3f1   : > { %4384 = vmatmul.mubr.bf16.gmra.mrb[88].mxu1 %v4236_v0  ;;  %v4504_v0 = vrot.slane %v4472_v49, 1 }
 0x3f2   : > { %6078 = vmatprep.mubr.msk.bf16.mxu1 %vm3498_vm7, %v8727_v13  ;;  %4783 = vmatpush1.bf16.msra.mxu1 %v6938_v51  ;;  %v6941_v13 = vld [vmem:[%s9496_s6 + $0x118] sm:$0xff]   ;;  %v4456_v51 = vld [vmem:[#allocation3 + $0x60] sm:$0xff] }
 0x3f3   : > { %4784 = vmatprep.subr.bf16.mxu1 %v9524_v3 }
 0x3f6   : > { %4785 = vmatpush1.bf16.msra.mxu1 %v6939_v28  ;;  %v4511_v28 = vsel %vm2426_vm4, %v4505_v52, %v9076_v22 }
 0x3f7   : > { %4786 = vmatprep.subr.bf16.mxu1 %v9524_v3 }
 0x3f9   : > { %4392 = vmatmul.mubr.bf16.gmra.mrb[92].mxu1 %v4240_v62  ;;  %v4454_v62 = vld [vmem:[#allocation3 + $0x50] sm:$0xff] }
 0x3fa   : > { %6079 = vmatprep.mubr.msk.bf16.mxu1 %vm3498_vm7, %v8827_v54  ;;  %4787 = vmatpush1.bf16.msra.mxu1 %v6940_v41  ;;  %v4244_v54 = vsel %vm3132_vm6, %v4239_v42, %v4243_v40  ;;  %v4588_v40 = vadd.f32 %v4511_v28, %v9074_v34 }
 0x3fb   : > { %4788 = vmatprep.subr.bf16.mxu1 %v9524_v3 }
 0x3fe   : > { %4789 = vmatpush1.bf16.msra.mxu1 %v6941_v13  ;;  %v4506_v13 = vsel %vm2426_vm4, %v4504_v0, %v4505_v52  ;;  %v4464_v0 = vld [vmem:[#allocation3 + $0xa0] sm:$0xff] }
 0x3ff   : > { %4790 = vmatprep.subr.bf16.mxu1 %v9524_v3 }
 0x401   : > { %4400 = vmatmul.mubr.bf16.gmra.mrb[96].mxu1 %v4244_v54  ;;  %v4586_v54 = vadd.f32 %v4506_v13, %v4444_v38  ;;  %v4542_v13 = vrot.slane %v4464_v0, 1 }
 0x402   : > { %6080 = vmatprep.mubr.msk.bf16.mxu1 %vm3498_vm7, %v8870_v63  ;;  %4791 = vmatpush1.bf16.msra.mxu1 %v6942_v19  ;;  %v9528_v63 = vrot.slane %v8845_v53, 2  ;;  %v4514_v53 = vrot.slane %v4450_v1, 1  ;;  %v4522_v19 = vrot.slane %v4454_v62, 1 }
 0x403   : > { %4792 = vmatprep.subr.bf16.mxu1 %v9524_v3 }
 0x404   : > { %v4254_v37 = vsel %vm3132_vm6, %v9528_v63, %v4253_v30  ;;  %v4519_v27 = vsel %vm2426_vm4, %v4514_v53, %v4518_v17  ;;  %v4515_v42 = vsel %vm2426_vm4, %v9076_v22, %v4514_v53  ;;  %v6946_v53 = vld [vmem:[%s9496_s6 + $0x140] sm:$0xff]  }
 0x405   : > { %v9087_v41 = vadd.f32 %v4519_v27, %v4450_v1  ;;  %v9091_v56 = vadd.f32 %v4515_v42, %v4448_v5  ;;  %v6947_v27 = vld [vmem:[%s9496_s6 + $0x148] sm:$0xff]  }
 0x406   : > { %4793 = vmatpush1.bf16.msra.mxu1 %v6943_v45 }
 0x407   : > { %4794 = vmatprep.subr.bf16.mxu1 %v9524_v3  ;;  %v4616_v25 = vpack.c.bf16 %v9087_v41, %v9091_v56 }
 0x409   : > { %4408 = vmatmul.mubr.bf16.gmra.mrb[100].mxu1 %v4248_v61  ;;  %v4523_v61 = vsel %vm2426_vm4, %v4518_v17, %v4522_v19  ;;  %v4665_v63 = vrot.slane %v4616_v25, 3 }
 0x40a   : > { %6081 = vmatprep.mubr.msk.bf16.mxu1 %vm3498_vm7, %v4254_v37  ;;  %4795 = vmatpush1.bf16.msra.mxu1 %v6944_v35  ;;  %v4460_v35 = vld [vmem:[#allocation3 + $0x80] sm:$0xff] }
 0x40b   : > { %4796 = vmatprep.subr.bf16.mxu1 %v9524_v3  ;;  %v4534_v5 = vrot.slane %v4460_v35, 1 }
 0x40e   : > { %4797 = vmatpush1.bf16.msra.mxu1 %v6945_v4  ;;  %v4458_v4 = vld [vmem:[#allocation3 + $0x70] sm:$0xff] }
 0x40f   : > { %5025 = vmatprep.subr.bf16.mxu1 %v9524_v3  ;;  %v4530_v49 = vrot.slane %v4458_v4, 1 }
 0x411   : > { %4416 = vmatmul.mubr.bf16.gmra.mrb[104].mxu1 %v8864_v32  ;;  %v4526_v32 = vrot.slane %v4456_v51, 1  ;;  %v4535_v17 = vsel %vm2426_vm4, %v4530_v49, %v4534_v5 }
 0x412   : > { %6082 = vmatprep.mubr.msk.bf16.mxu1 %vm3498_vm7, %v4253_v30  ;;  %v4614_v30 = vpack.c.bf16 %v4588_v40, %v4586_v54  ;;  %v9118_v42 = vadd.f32 %v4535_v17, %v4458_v4 }
 0x413   : > { %v4527_v45 = vsel %vm2426_vm4, %v4522_v19, %v4526_v32 }
 0x414   : > { %v9100_v37 = vadd.f32 %v4527_v45, %v4454_v62  ;;  %v4664_v1 = vrot.slane %v4614_v30, 3  ;;  %v4462_v62 = vld [vmem:[#allocation3 + $0x90] sm:$0xff] }
 0x415   : > { %v4538_v38 = vrot.slane %v4462_v62, 1 }
 0x416   : > { %v4666_v52 = vsel %vm4663_vm8, %v4664_v1, %v4665_v63  ;;  %v4547_v1 = vsel %vm2426_vm4, %v4542_v13, %v4546_v31  ;;  %v6953_v31 = vld [vmem:[%s9496_s6 + $0x178] sm:$0xff]  }
 0x417   : > { %v4543_v54 = vsel %vm2426_vm4, %v4538_v38, %v4542_v13  ;;  %v4539_v25 = vsel %vm2426_vm4, %v4534_v5, %v4538_v38  ;;  %v4474_v5 = vld [vmem:[#allocation3 + $0xd0] sm:$0x3] }
 0x418   : > { %v9137_v30 = vadd.f32 %v4543_v54, %v4462_v62 }
 0x419   : > { %4424 = vmatmul.mubr.bf16.gmra.mrb[108].mxu1 %v8852_v43  ;;  %v9105_v43 = vadd.f32 %v4523_v61, %v4452_v33  ;;  %v4531_v33 = vsel %vm2426_vm4, %v4526_v32, %v4530_v49  ;;  %v9139_v61 = vadd.f32 %v4539_v25, %v4460_v35  ;;  %v6951_v35 = vld [vmem:[%s9496_s6 + $0x168] sm:$0xff]   ;;  %v4554_v49 = vrot.slane %v4474_v5, 1 }
 0x41a   : > { %6113 = vmatprep.mubr.msk.bf16.mxu1 %vm3498_vm7, %v8709_v15  ;;  %v9123_v40 = vadd.f32 %v4531_v33, %v4456_v51  ;;  %v6949_v51 = vld [vmem:[%s9496_s6 + $0x158] sm:$0xff]  }
 0x41b   : > { %v4618_v15 = vpack.c.bf16 %v9100_v37, %v9105_v43  ;;  %v4622_v4 = vpack.c.bf16 %v9137_v30, %v9139_v61  ;;  %v4555_v46 = vsel %vm2426_vm4, %v8892_v7, %v4554_v49  ;;  %v6954_v7 = vld [vmem:[%s9496_s6 + $0x180] sm:$0xff]   ;;  %v4911_v5 = vpack.c.bf16 %v9105_v43, %v9087_v41 }
 0x41c   : > { %v4620_v32 = vpack.c.bf16 %v9118_v42, %v9123_v40  ;;  %v4610_v33 = vadd.f32 %v4555_v46, %v8886_v36  ;;  %v6955_v36 = vld [vmem:[%s9496_s6 + $0x188] sm:$0xff]  }
 0x41d   : > { %v4670_v28 = vrot.slane %v4618_v15, 3 }
 0x41e   : > { %v4674_v45 = vrot.slane %v4620_v32, 3  ;;  %v4881_v32 = vld [vmem:[#allocation3 + $0x10] sm:$0xfe] }
 0x41f   : > { %v4671_v19 = vsel %vm4663_vm8, %v4665_v63, %v4670_v28  ;;  %v6950_v63 = vld [vmem:[%s9496_s6 + $0x160] sm:$0xff]  }
 0x421   : > { %4811 = vmatmul.mubr.bf16.vlgmr.msra.gmra.mrb[112].mxu1 %v4666_v52  ;;  %v9157_v52 = vadd.f32 %v4547_v1, %v4464_v0 }
 0x422   : > { %6114 = vmatprep.mubr.msk.bf16.mxu1 %vm3498_vm7, %v8771_v47  ;;  %5026 = vmatpush1.bf16.msra.mxu1 %v6946_v53  ;;  %v6948_v47 = vld [vmem:[%s9496_s6 + $0x150] sm:$0xff]   ;;  %v4678_v53 = vrot.slane %v4622_v4, 3 }
 0x423   : > { %5027 = vmatprep.subr.bf16.mxu1 %v9524_v3  ;;  %v4624_v17 = vpack.c.bf16 %v8932_v26, %v9157_v52  ;;  %v4917_v46 = vpack.c.bf16 %v9157_v52, %v9137_v30  ;;  %v4879_v30 = vld [vmem:[#allocation3 + $0xd0] sm:$0x7]  ;;  %v6956_v26 = vld [vmem:[%s9498_s8] sm:$0xff]  }
 0x424   : > { %v4679_v15 = vsel %vm4663_vm8, %v4674_v45, %v4678_v53  ;;  %v4907_v10 = vadd.f32 %v4893_v8, %v4879_v30  ;;  %6223 = vmatpush3.bf16.msra.mxu0 %v6956_v26 }
 0x425   : > { %v4682_v0 = vrot.slane %v4624_v17, 3  ;;  %6224 = vmatprep.subr.bf16.mxu0 %v7256_v39 }
 0x426   : > { %5028 = vmatpush1.bf16.msra.mxu1 %v6947_v27  ;;  %v4470_v27 = vld [vmem:[#allocation3 + $0xd0] sm:$0x1] }
 0x427   : > { %5029 = vmatprep.subr.bf16.mxu1 %v9524_v3 }
 0x429   : > { %4819 = vmatmul.mubr.bf16.gmra.mrb[116].mxu1 %v4671_v19 }
 0x42a   : > { %6115 = vmatprep.mubr.msk.bf16.mxu1 %vm3498_vm7, %v8858_v50  ;;  %5030 = vmatpush1.bf16.msra.mxu1 %v6948_v47  ;;  %v4675_v50 = vsel %vm4663_vm8, %v4670_v28, %v4674_v45  ;;  %v4612_v28 = vadd.f32 %v4554_v49, %v4470_v27  ;;  %v9531_v49 = vpack.c.bf16 %v8746_v18, %v8688_v2 }
 0x42b   : > { %5031 = vmatprep.subr.bf16.mxu1 %v9524_v3 }
 0x42c   : > { %v4626_v62 = vpack.c.bf16 %v4612_v28, %v4610_v33 }
 0x42e   : > { %5032 = vmatpush1.bf16.msra.mxu1 %v6949_v51  ;;  %v4686_v13 = vrot.slane %v4626_v62, 3  ;;  %v4889_v51 = vrot.slane %v4881_v32, 1 }
 0x42f   : > { %5033 = vmatprep.subr.bf16.mxu1 %v9524_v3 }
 0x430   : > { %v4687_v47 = vsel %vm4663_vm8, %v4682_v0, %v4686_v13 }
 0x431   : > { %4827 = vmatmul.mubr.bf16.gmra.mrb[120].mxu1 %v4675_v50 }
 0x432   : > { %6116 = vmatprep.mubr.msk.bf16.mxu1 %vm3498_vm7, %v8874_v58  ;;  %5034 = vmatpush1.bf16.msra.mxu1 %v6950_v63  ;;  %v6952_v58 = vld [vmem:[%s9496_s6 + $0x170] sm:$0xff]  }
 0x433   : > { %5035 = vmatprep.subr.bf16.mxu1 %v9524_v3 }
 0x436   : > { %5036 = vmatpush1.bf16.msra.mxu1 %v6951_v35  ;;  %v9529_v35 = vpack.c.bf16 %v8627_v12, %v8575_v55 }
 0x437   : > { %5037 = vmatprep.subr.bf16.mxu1 %v9524_v3 }
 0x439   : > { %4835 = vmatmul.mubr.bf16.gmra.mrb[124].mxu1 %v4679_v15  ;;  %v9532_v15 = vld [vmem:[#allocation9_spill] sm:$0xff] }
 0x43a   : > { %6117 = vmatprep.mubr.msk.bf16.mxu1 %vm3498_vm7, %v8880_v60  ;;  %5038 = vmatpush1.bf16.msra.mxu1 %v6952_v58  ;;  %v4683_v60 = vsel %vm4663_vm8, %v4678_v53, %v4682_v0  ;;  %v4913_v53 = vpack.c.bf16 %v9123_v40, %v9100_v37  ;;  %v4915_v58 = vpack.c.bf16 %v9139_v61, %v9118_v42  ;;  %v4880_v42 = vld [vmem:[#allocation3 + $0xd8] sm:$0x7] }
 0x43b   : > { %5039 = vmatprep.subr.bf16.mxu1 %v9524_v3  ;;  %v9533_v17 = vpack.c.bf16 %v8764_v48, %v9532_v15  ;;  %v4908_v48 = vadd.f32 %v4895_v11, %v4880_v42 }
 0x43d   : > { %v4922_v33 = vpack.c.bf16 %v4908_v48, %v4908_v48 }
 0x43e   : > { %5040 = vmatpush1.bf16.msra.mxu1 %v6953_v31 }
 0x43f   : > { %5041 = vmatprep.subr.bf16.mxu1 %v9524_v3 }
 0x441   : > { %4843 = vmatmul.mubr.bf16.gmra.mrb[128].mxu1 %v4683_v60 }
 0x442   : > { %6118 = vmatprep.mubr.msk.bf16.mxu1 %vm3498_vm7, %v8910_v23  ;;  %5042 = vmatpush1.bf16.msra.mxu1 %v6954_v7  ;;  %v4921_v7 = vpack.c.bf16 %v4907_v10, %v4907_v10 }
 0x443   : > { %5043 = vmatprep.subr.bf16.mxu1 %v9524_v3  ;;  %v4890_v3 = vsel %vm2426_vm4, %v4889_v51, %v9076_v22  ;;  %v6958_v51 = vld [vmem:[%s9498_s8 + $0x10] sm:$0xff]  }
 0x444   : > { %v4903_v63 = vadd.f32 %v4890_v3, %v9074_v34  ;;  %v9530_v34 = vpack.c.bf16 %v8685_v44, %v8629_v9 }
 0x446   : > { %5044 = vmatpush1.bf16.msra.mxu1 %v6955_v36  ;;  %v4909_v4 = vpack.c.bf16 %v9091_v56, %v4903_v63 }
 0x447   : > { %6266 = vmatprep.subr.bf16.mxu1 %v7256_v39 }
 0x449   : > { %4851 = vmatmul.mubr.bf16.gmra.mrb[132].mxu1 %v4687_v47 }
 0x44a   : > { %6119 = vmatprep.mubr.msk.bf16.mxu1 %vm3498_vm7, %v8897_v14 }
 0x44c   : > { %v3941_v38 = vpop.f32.mrb[28].mxu1 }
 0x44d   : > { %v3943_v19 = vpop.f32.mrb[29].mxu1 }
 0x44e   : > { %v3944_v54 = vpop.f32.mrb[30].mxu1 }
 0x44f   : > { %v3946_v23 = vpop.f32.mrb[31].mxu1 }
 0x451   : > { %4859 = vmatmul.mubr.bf16.gmra.mrb[136].mxu1 %v4686_v13  ;;  %v6957_v13 = vld [vmem:[%s9498_s8 + $0x8] sm:$0xff]  }
 0x452   : > { %6150 = vmatprep.mubr.msk.bf16.mxu1 %vm3498_vm7, %v4910_v57  ;;  %6225 = vmatpush3.bf16.msra.mxu0 %v6957_v13 }
 0x453   : > { %6226 = vmatprep.subr.bf16.mxu0 %v7256_v39 }
 0x454   : > { %v3949_v25 = vpop.f32.mrb[32].mxu1 }
 0x455   : > { %v3951_v45 = vpop.f32.mrb[33].mxu1 }
 0x456   : > { %v3952_v14 = vpop.f32.mrb[34].mxu1  ;;  %6227 = vmatpush3.bf16.msra.mxu0 %v6958_v51 }
 0x457   : > { %v3954_v50 = vpop.f32.mrb[35].mxu1  ;;  %6228 = vmatprep.subr.bf16.mxu0 %v7256_v39 }
 0x459   : > { %5058 = vmatmul.mubr.bf16.vlgmr.msra.gmra.mrb[140].mxu1 %v4909_v4  ;;  %v6959_v4 = vld [vmem:[%s9498_s8 + $0x18] sm:$0xff]  }
 0x45a   : > { %6151 = vmatprep.mubr.msk.bf16.mxu1 %vm3498_vm7, %v9529_v35  ;;  %6229 = vmatpush3.bf16.msra.mxu0 %v6959_v4 }
 0x45b   : > { %6230 = vmatprep.subr.bf16.mxu0 %v7256_v39 }
 0x45c   : > { %v9201_v20 = vpop.f32.mrb[36].mxu1 }
 0x45d   : > { %v3959_v59 = vpop.f32.mrb[37].mxu1 }
 0x45e   : > { %v9203_v57 = vpop.f32.mrb[38].mxu1 }
 0x45f   : > { %v3962_v22 = vpop.f32.mrb[39].mxu1 }
 0x461   : > { %5066 = vmatmul.mubr.bf16.gmra.mrb[144].mxu1 %v4911_v5 }
 0x462   : > { %6152 = vmatprep.mubr.msk.bf16.mxu1 %vm3498_vm7, %v9530_v34 }
 0x464   : > { %v9211_v56 = vpop.f32.mrb[40].mxu1 }
 0x465   : > { %v3967_v55 = vpop.f32.mrb[41].mxu1 }
 0x466   : > { %v9213_v12 = vpop.f32.mrb[42].mxu1 }
 0x467   : > { %v3970_v1 = vpop.f32.mrb[43].mxu1 }
 0x469   : > { %5074 = vmatmul.mubr.bf16.gmra.mrb[148].mxu1 %v4913_v53 }
 0x46a   : > { %6153 = vmatprep.mubr.msk.bf16.mxu1 %vm3498_vm7, %v9531_v49 }
 0x46c   : > { %v9221_v41 = vpop.f32.mrb[44].mxu1 }
 0x46d   : > { %v3975_v9 = vpop.f32.mrb[45].mxu1 }
 0x46e   : > { %v9223_v44 = vpop.f32.mrb[46].mxu1 }
 0x46f   : > { %v3978_v43 = vpop.f32.mrb[47].mxu1 }
 0x471   : > { %5082 = vmatmul.mubr.bf16.gmra.mrb[152].mxu1 %v4915_v58 }
 0x472   : > { %6154 = vmatprep.mubr.msk.bf16.mxu1 %vm3498_vm7, %v9533_v17 }
 0x474   : > { %v9231_v37 = vpop.f32.mrb[48].mxu1 }
 0x475   : > { %v3983_v2 = vpop.f32.mrb[49].mxu1 }
 0x476   : > { %v9233_v18 = vpop.f32.mrb[50].mxu1 }
 0x477   : > { %v3986_v40 = vpop.f32.mrb[51].mxu1 }
 0x479   : > { %5090 = vmatmul.mubr.bf16.gmra.mrb[156].mxu1 %v4917_v46  ;;  %v6963_v46 = vld [vmem:[%s9498_s8 + $0x38] ss:$0 sps:$4 sm:$0xff]  }
 0x47a   : > { %6155 = vmatprep.mubr.msk.bf16.mxu1 %vm3498_vm7, %v4920_v24 }
 0x47c   : > { %v9241_v61 = vpop.f32.mrb[52].mxu1 }
 0x47d   : > { %v3991_v31 = vpop.f32.mrb[53].mxu1 }
 0x47e   : > { %v3992_v27 = vpop.f32.mrb[54].mxu1 }
 0x47f   : > { %v3993_v0 = vpop.f32.mrb[55].mxu1 }
 0x481   : > { %5098 = vmatmul.mubr.bf16.gmra.mrb[160].mxu1 %v4919_v21 }
 0x482   : > { %6156 = vmatprep.mubr.msk.bf16.mxu1 %vm3498_vm7, %v4922_v33 }
 0x484   : > { %v4110_v16 = vpop.f32.mrb[56].mxu1 }
 0x485   : > { %v9251_v24 = vadd.f32 %v4110_v16, %v3941_v38  ;;  %v4112_v52 = vpop.f32.mrb[57].mxu1 }
 0x486   : > { %v4113_v29 = vpop.f32.mrb[58].mxu1 }
 0x487   : > { %v9253_v11 = vadd.f32 %v4113_v29, %v3944_v54  ;;  %v4115_v28 = vpop.f32.mrb[59].mxu1 }
 0x489   : > { %5106 = vmatmul.mubr.bf16.gmra.mrb[164].mxu1 %v4921_v7 }
 0x48a   : > { %6278 = vmatprep.mubr.msk.bf16.mxu1 %vm7257_vm10, %v7256_v39 }
 0x48c   : > { %v4118_v6 = vpop.f32.mrb[60].mxu1 }
 0x48d   : > { %v9261_v8 = vadd.f32 %v4118_v6, %v3949_v25  ;;  %v4120_v21 = vpop.f32.mrb[61].mxu1 }
 0x48e   : > { %v4121_v60 = vpop.f32.mrb[62].mxu1 }
 0x48f   : > { %v9263_v62 = vadd.f32 %v4121_v60, %v3952_v14  ;;  %v4123_v36 = vpop.f32.mrb[63].mxu1 }
 0x494   : > { %v4126_v47 = vpop.f32.mrb[64].mxu1 }
 0x495   : > { %v4127_v38 = vadd.f32 %v4126_v47, %v9201_v20  ;;  %v4128_v19 = vpop.f32.mrb[65].mxu1 }
 0x496   : > { %v4129_v32 = vpop.f32.mrb[66].mxu1 }
 0x497   : > { %v4130_v54 = vadd.f32 %v4129_v32, %v9203_v57  ;;  %v4131_v23 = vpop.f32.mrb[67].mxu1  ;;  %v6960_v57 = vld [vmem:[%s9498_s8 + $0x20] sm:$0xff]  }
 0x498   : > { %6231 = vmatpush3.bf16.msra.mxu0 %v6960_v57 }
 0x499   : > { %6232 = vmatprep.subr.bf16.mxu0 %v7256_v39 }
 0x49c   : > { %v4134_v3 = vpop.f32.mrb[68].mxu1 }
 0x49d   : > { %v4135_v25 = vadd.f32 %v4134_v3, %v9211_v56  ;;  %v4136_v45 = vpop.f32.mrb[69].mxu1 }
 0x49e   : > { %v4137_v63 = vpop.f32.mrb[70].mxu1 }
 0x49f   : > { %v4138_v14 = vadd.f32 %v4137_v63, %v9213_v12  ;;  %v4139_v50 = vpop.f32.mrb[71].mxu1 }
 0x4a4   : > { %v4142_v35 = vpop.f32.mrb[72].mxu1 }
 0x4a5   : > { %v4143_v20 = vadd.f32 %v4142_v35, %v9221_v41  ;;  %v4144_v59 = vpop.f32.mrb[73].mxu1  ;;  %v6961_v41 = vld [vmem:[%s9498_s8 + $0x28] sm:$0xff]  }
 0x4a6   : > { %v4145_v22 = vpop.f32.mrb[74].mxu1  ;;  %6233 = vmatpush3.bf16.msra.mxu0 %v6961_v41 }
 0x4a7   : > { %v4146_v5 = vadd.f32 %v4145_v22, %v9223_v44  ;;  %v4147_v34 = vpop.f32.mrb[75].mxu1  ;;  %6234 = vmatprep.subr.bf16.mxu0 %v7256_v39 }
 0x4a8   : > { %v6966_v34 = vld [vmem:[%s9500_s10 + $0x10] sm:$0xff]  }
 0x4ac   : > { %v4150_v56 = vpop.f32.mrb[76].mxu1 }
 0x4ad   : > { %v4151_v55 = vadd.f32 %v4150_v56, %v9231_v37  ;;  %v4152_v12 = vpop.f32.mrb[77].mxu1 }
 0x4ae   : > { %v4153_v1 = vpop.f32.mrb[78].mxu1  ;;  %v6967_v12 = vld [vmem:[%s9500_s10 + $0x18] sm:$0xff]  }
 0x4af   : > { %v4154_v53 = vadd.f32 %v4153_v1, %v9233_v18  ;;  %v4155_v49 = vpop.f32.mrb[79].mxu1  ;;  %v6962_v18 = vld [vmem:[%s9498_s8 + $0x30] sm:$0xff]  }
 0x4b0   : > { %6235 = vmatpush3.bf16.msra.mxu0 %v6962_v18 }
 0x4b1   : > { %6236 = vmatprep.subr.bf16.mxu0 %v7256_v39 }
 0x4b4   : > { %v4158_v9 = vpop.f32.mrb[80].mxu1 }
 0x4b5   : > { %v4159_v44 = vadd.f32 %v4158_v9, %v9241_v61  ;;  %v4160_v43 = vpop.f32.mrb[81].mxu1  ;;  %v5256_v61 = vsel %vm2042_vm1, %v6963_v46, 0 }
 0x4b6   : > { %v4161_v58 = vpop.f32.mrb[82].mxu1  ;;  %6237 = vmatpush3.bf16.msra.mxu0 %v5256_v61 }
 0x4b7   : > { %v4162_v15 = vpop.f32.mrb[83].mxu1 }
 0x4bc   : > { %v4377_v17 = vpop.f32.mrb[84].mxu1 }
 0x4bd   : > { %v4431_v37 = vadd.f32 %v4377_v17, %v9251_v24  ;;  %v4379_v2 = vpop.f32.mrb[85].mxu1 }
 0x4be   : > { %v4380_v40 = vpop.f32.mrb[86].mxu1 }
 0x4bf   : > { %v4432_v42 = vadd.f32 %v4380_v40, %v9253_v11  ;;  %v4382_v48 = vpop.f32.mrb[87].mxu1 }
 0x4c4   : > { %v4385_v31 = vpop.f32.mrb[88].mxu1 }
 0x4c5   : > { %v4433_v27 = vadd.f32 %v4385_v31, %v9261_v8  ;;  %v4387_v0 = vpop.f32.mrb[89].mxu1 }
 0x4c6   : > { %v4388_v33 = vpop.f32.mrb[90].mxu1 }
 0x4c7   : > { %v4434_v30 = vadd.f32 %v4388_v33, %v9263_v62  ;;  %v4390_v10 = vpop.f32.mrb[91].mxu1 }
 0x4cc   : > { %v4393_v16 = vpop.f32.mrb[92].mxu1 }
 0x4cd   : > { %v4435_v24 = vadd.f32 %v4393_v16, %v4127_v38  ;;  %v4395_v52 = vpop.f32.mrb[93].mxu1 }
 0x4ce   : > { %v4396_v29 = vpop.f32.mrb[94].mxu1 }
 0x4cf   : > { %v4436_v11 = vadd.f32 %v4396_v29, %v4130_v54  ;;  %v4398_v28 = vpop.f32.mrb[95].mxu1 }
 0x4d4   : > { %v4401_v7 = vpop.f32.mrb[96].mxu1 }
 0x4d5   : > { %v4437_v26 = vadd.f32 %v4401_v7, %v4135_v25  ;;  %v4403_v6 = vpop.f32.mrb[97].mxu1 }
 0x4d6   : > { %v4404_v21 = vpop.f32.mrb[98].mxu1 }
 0x4d7   : > { %v4438_v60 = vadd.f32 %v4404_v21, %v4138_v14  ;;  %v4406_v8 = vpop.f32.mrb[99].mxu1  ;;  %v6964_v14 = vld [vmem:[%s9500_s10] sm:$0xff]  }
 0x4d8   : > { %6267 = vmatpush3.bf16.msra.mxu1 %v6964_v14 }
 0x4d9   : > { %6268 = vmatprep.subr.bf16.mxu1 %v7256_v39 }
 0x4dc   : > { %v4409_v36 = vpop.f32.mrb[100].mxu1 }
 0x4dd   : > { %v4439_v13 = vadd.f32 %v4409_v36, %v4143_v20  ;;  %v4411_v47 = vpop.f32.mrb[101].mxu1  ;;  %v6965_v20 = vld [vmem:[%s9500_s10 + $0x8] sm:$0xff]   ;;  %v9341_v36 = vld [vmem:[%s9497_s7] ss:$0 sm:$0xff] }
 0x4de   : > { %v4412_v19 = vpop.f32.mrb[102].mxu1  ;;  %6269 = vmatpush3.bf16.msra.mxu1 %v6965_v20 }
 0x4df   : > { %v4440_v32 = vadd.f32 %v4412_v19, %v4146_v5  ;;  %v4414_v23 = vpop.f32.mrb[103].mxu1  ;;  %6270 = vmatprep.subr.bf16.mxu1 %v7256_v39 }
 0x4e2   : > { %6271 = vmatpush3.bf16.msra.mxu1 %v6966_v34 }
 0x4e3   : > { %6272 = vmatprep.subr.bf16.mxu1 %v7256_v39 }
 0x4e4   : > { %v4417_v62 = vpop.f32.mrb[104].mxu1 }
 0x4e5   : > { %v4441_v51 = vadd.f32 %v4417_v62, %v4151_v55  ;;  %v4419_v3 = vpop.f32.mrb[105].mxu1 }
 0x4e6   : > { %v4420_v38 = vpop.f32.mrb[106].mxu1  ;;  %6273 = vmatpush3.bf16.msra.mxu1 %v6967_v12 }
 0x4e7   : > { %v4442_v45 = vadd.f32 %v4420_v38, %v4154_v53  ;;  %v4422_v63 = vpop.f32.mrb[107].mxu1  ;;  %6274 = vmatprep.subr.bf16.mxu1 %v7256_v39 }
 0x4ec   : > { %v4425_v54 = vpop.f32.mrb[108].mxu1 }
 0x4ed   : > { %v4443_v50 = vadd.f32 %v4425_v54, %v4159_v44  ;;  %v4427_v4 = vpop.f32.mrb[109].mxu1 }
 0x4ee   : > { %v4428_v25 = vpop.f32.mrb[110].mxu1 }
 0x4ef   : > { %v4429_v35 = vpop.f32.mrb[111].mxu1 }
 0x4f4   : > { %v4812_v59 = vpop.f32.mrb[112].mxu1 }
 0x4f5   : > { %v4866_v57 = vadd.f32 %v4812_v59, %v4431_v37  ;;  %v4814_v22 = vpop.f32.mrb[113].mxu1 }
 0x4f6   : > { %v4815_v5 = vpop.f32.mrb[114].mxu1 }
 0x4f7   : > { %v4867_v56 = vadd.f32 %v4815_v5, %v4432_v42  ;;  %v4817_v55 = vpop.f32.mrb[115].mxu1 }
 0x4fc   : > { %v4820_v1 = vpop.f32.mrb[116].mxu1 }
 0x4fd   : > { %v4868_v53 = vadd.f32 %v4820_v1, %v4433_v27  ;;  %v4822_v49 = vpop.f32.mrb[117].mxu1 }
 0x4fe   : > { %v4823_v41 = vpop.f32.mrb[118].mxu1 }
 0x4ff   : > { %v4869_v9 = vadd.f32 %v4823_v41, %v4434_v30  ;;  %v4825_v44 = vpop.f32.mrb[119].mxu1 }
 0x504   : > { %v4828_v43 = vpop.f32.mrb[120].mxu1 }
 0x505   : > { %v4870_v58 = vadd.f32 %v4828_v43, %v4435_v24  ;;  %v4830_v15 = vpop.f32.mrb[121].mxu1 }
 0x506   : > { %v4831_v17 = vpop.f32.mrb[122].mxu1 }
 0x507   : > { %v4871_v37 = vadd.f32 %v4831_v17, %v4436_v11  ;;  %v4833_v2 = vpop.f32.mrb[123].mxu1 }
 0x50c   : > { %v4836_v40 = vpop.f32.mrb[124].mxu1 }
 0x50d   : > { %v4872_v18 = vadd.f32 %v4836_v40, %v4437_v26  ;;  %v4838_v46 = vpop.f32.mrb[125].mxu1 }
 0x50e   : > { %v4839_v42 = vpop.f32.mrb[126].mxu1 }
 0x50f   : > { %v9326_v48 = vadd.f32 %v4839_v42, %v4438_v60  ;;  %v4841_v61 = vpop.f32.mrb[127].mxu1 }
 0x514   : > { %v4844_v31 = vpop.f32.mrb[128].mxu1 }
 0x515   : > { %v9328_v27 = vadd.f32 %v4844_v31, %v4439_v13  ;;  %v4846_v0 = vpop.f32.mrb[129].mxu1 }
 0x516   : > { %v4847_v33 = vpop.f32.mrb[130].mxu1 }
 0x517   : > { %v9330_v30 = vadd.f32 %v4847_v33, %v4440_v32  ;;  %v4849_v10 = vpop.f32.mrb[131].mxu1 }
 0x51c   : > { %v4852_v16 = vpop.f32.mrb[132].mxu1 }
 0x51d   : > { %v9332_v24 = vadd.f32 %v4852_v16, %v4441_v51  ;;  %v4854_v52 = vpop.f32.mrb[133].mxu1 }
 0x51e   : > { %v4855_v29 = vpop.f32.mrb[134].mxu1 }
 0x51f   : > { %v9334_v11 = vadd.f32 %v4855_v29, %v4442_v45  ;;  %v4857_v28 = vpop.f32.mrb[135].mxu1 }
 0x524   : > { %v4860_v7 = vpop.f32.mrb[136].mxu1 }
 0x525   : > { %v9336_v26 = vadd.f32 %v4860_v7, %v4443_v50  ;;  %v4862_v6 = vpop.f32.mrb[137].mxu1 }
 0x526   : > { %v4863_v21 = vpop.f32.mrb[138].mxu1 }
 0x527   : > { %v4864_v60 = vpop.f32.mrb[139].mxu1 }
 0x52c   : > { %v5059_v8 = vpop.f32.mrb[140].mxu1 }
 0x52d   : > { %v5113_v13 = vadd.f32 %v5059_v8, %v4866_v57  ;;  %v5061_v47 = vpop.f32.mrb[141].mxu1 }
 0x52e   : > { %v5062_v19 = vpop.f32.mrb[142].mxu1 }
 0x52f   : > { %v5133_v32 = vadd.f32 %v9341_v36, %v5113_v13  ;;  %v5114_v23 = vadd.f32 %v5062_v19, %v4867_v56  ;;  %v5064_v62 = vpop.f32.mrb[143].mxu1 }
 0x531   : > { %v5134_v51 = vadd.f32 %v9341_v36, %v5114_v23  ;;  %7138 = vtanh.f32 %v5133_v32 }
 0x533   : > { %7140 = vtanh.f32 %v5134_v51 }
 0x534   : > { %v5067_v3 = vpop.f32.mrb[144].mxu1 }
 0x535   : > { %v5115_v38 = vadd.f32 %v5067_v3, %v4868_v53  ;;  %v5069_v45 = vpop.f32.mrb[145].mxu1 }
 0x536   : > { %v5070_v63 = vpop.f32.mrb[146].mxu1 }
 0x537   : > { %v5135_v54 = vadd.f32 %v9341_v36, %v5115_v38  ;;  %v5116_v50 = vadd.f32 %v5070_v63, %v4869_v9  ;;  %v5072_v4 = vpop.f32.mrb[147].mxu1 }
 0x538   : > { %v9391_v4 = vld [vmem:[%s9499_s9] ss:$0 sm:$0xff] }
 0x539   : > { %v5136_v25 = vadd.f32 %v9341_v36, %v5116_v50  ;;  %7142 = vtanh.f32 %v5135_v54  ;;  %v6969_v54 = vld [vmem:[%s9500_s10 + $0x28] ss:$0 sps:$4 sm:$0x33]  }
 0x53a   : > { %v5441_v50 = vsel %vm5439_vm12, %v6969_v54, 0 }
 0x53b   : > { %7144 = vtanh.f32 %v5136_v25  ;;  %v7139_v35 = vpop.eup %7138 }
 0x53c   : > { %v5075_v14 = vpop.f32.mrb[148].mxu1 }
 0x53d   : > { %v7141_v20 = vpop.eup %7140  ;;  %v5117_v59 = vadd.f32 %v5075_v14, %v4870_v58  ;;  %v5077_v57 = vpop.f32.mrb[149].mxu1 }
 0x53e   : > { %v5159_v22 = vpack.c.bf16 %v7141_v20, %v7139_v35  ;;  %v5078_v5 = vpop.f32.mrb[150].mxu1 }
 0x53f   : > { %v5137_v34 = vadd.f32 %v9341_v36, %v5117_v59  ;;  %v5118_v56 = vadd.f32 %v5078_v5, %v4871_v37  ;;  %v5080_v55 = vpop.f32.mrb[151].mxu1 }
 0x540   : > { %6239 = vmatmul.mubr.msk.bf16.vlgmr.msra.gmra.mrb[56].mxu0 %vm5233_vm11, %v5159_v22 }
 0x541   : > { %v5138_v12 = vadd.f32 %v9341_v36, %v5118_v56  ;;  %6242 = vmatprep.mubr.msk.bf16.mxu0 %vm7257_vm10, %v7256_v39  ;;  %7146 = vtanh.f32 %v5137_v34 }
 0x543   : > { %7148 = vtanh.f32 %v5138_v12  ;;  %v7143_v1 = vpop.eup %7142 }
 0x544   : > { %v5083_v53 = vpop.f32.mrb[152].mxu1 }
 0x545   : > { %v7145_v49 = vpop.eup %7144  ;;  %v5119_v41 = vadd.f32 %v5083_v53, %v4872_v18  ;;  %v5085_v9 = vpop.f32.mrb[153].mxu1 }
 0x546   : > { %v5086_v44 = vpop.f32.mrb[154].mxu1  ;;  %v5160_v43 = vpack.c.bf16 %v7145_v49, %v7143_v1 }
 0x547   : > { %v5139_v58 = vadd.f32 %v9341_v36, %v5119_v41  ;;  %v5120_v15 = vadd.f32 %v5086_v44, %v9326_v48  ;;  %v5088_v17 = vpop.f32.mrb[155].mxu1 }
 0x548   : > { %6243 = vmatmul.mubr.msk.bf16.gmra.mrb[60].mxu0 %vm5233_vm11, %v5160_v43 }
 0x549   : > { %v5140_v37 = vadd.f32 %v9341_v36, %v5120_v15  ;;  %6246 = vmatprep.mubr.msk.bf16.mxu0 %vm7257_vm10, %v7256_v39  ;;  %7150 = vtanh.f32 %v5139_v58 }
 0x54b   : > { %7152 = vtanh.f32 %v5140_v37  ;;  %v7147_v2 = vpop.eup %7146 }
 0x54c   : > { %v5091_v40 = vpop.f32.mrb[156].mxu1 }
 0x54d   : > { %v7149_v18 = vpop.eup %7148  ;;  %v5121_v46 = vadd.f32 %v5091_v40, %v9328_v27  ;;  %v5093_v42 = vpop.f32.mrb[157].mxu1 }
 0x54e   : > { %v5094_v61 = vpop.f32.mrb[158].mxu1  ;;  %v5161_v31 = vpack.c.bf16 %v7149_v18, %v7147_v2 }
 0x54f   : > { %v5141_v48 = vadd.f32 %v9341_v36, %v5121_v46  ;;  %v5122_v0 = vadd.f32 %v5094_v61, %v9330_v30  ;;  %v5096_v33 = vpop.f32.mrb[159].mxu1 }
 0x550   : > { %6247 = vmatmul.mubr.msk.bf16.gmra.mrb[64].mxu0 %vm5233_vm11, %v5161_v31 }
 0x551   : > { %v5142_v10 = vadd.f32 %v9341_v36, %v5122_v0  ;;  %6250 = vmatprep.mubr.msk.bf16.mxu0 %vm7257_vm10, %v7256_v39  ;;  %7154 = vtanh.f32 %v5141_v48 }
 0x553   : > { %7156 = vtanh.f32 %v5142_v10  ;;  %v7151_v16 = vpop.eup %7150 }
 0x554   : > { %v5099_v52 = vpop.f32.mrb[160].mxu1 }
 0x555   : > { %v7153_v27 = vpop.eup %7152  ;;  %v5123_v29 = vadd.f32 %v5099_v52, %v9332_v24  ;;  %v5101_v28 = vpop.f32.mrb[161].mxu1 }
 0x556   : > { %v5102_v7 = vpop.f32.mrb[162].mxu1  ;;  %v5162_v6 = vpack.c.bf16 %v7153_v27, %v7151_v16 }
 0x557   : > { %v5143_v30 = vadd.f32 %v9341_v36, %v5123_v29  ;;  %v5124_v21 = vadd.f32 %v5102_v7, %v9334_v11  ;;  %v5104_v60 = vpop.f32.mrb[163].mxu1 }
 0x558   : > { %6251 = vmatmul.mubr.msk.bf16.gmra.mrb[68].mxu0 %vm5233_vm11, %v5162_v6 }
 0x559   : > { %v5144_v8 = vadd.f32 %v9341_v36, %v5124_v21  ;;  %6254 = vmatprep.mubr.msk.bf16.mxu0 %vm7257_vm10, %v7256_v39  ;;  %7158 = vtanh.f32 %v5143_v30 }
 0x55b   : > { %7160 = vtanh.f32 %v5144_v8  ;;  %v7155_v13 = vpop.eup %7154 }
 0x55c   : > { %v5107_v47 = vpop.f32.mrb[164].mxu1 }
 0x55d   : > { %v7157_v24 = vpop.eup %7156  ;;  %v5125_v19 = vadd.f32 %v5107_v47, %v9336_v26  ;;  %v5109_v32 = vpop.f32.mrb[165].mxu1 }
 0x55e   : > { %v5110_v23 = vpop.f32.mrb[166].mxu1  ;;  %v5163_v62 = vpack.c.bf16 %v7157_v24, %v7155_v13 }
 0x55f   : > { %v5145_v11 = vadd.f32 %v9341_v36, %v5125_v19  ;;  %v5111_v51 = vpop.f32.mrb[167].mxu1  ;;  %v6968_v36 = vld [vmem:[%s9500_s10 + $0x20] sm:$0xff]  }
 0x560   : > { %6255 = vmatmul.mubr.msk.bf16.gmra.mrb[72].mxu0 %vm5233_vm11, %v5163_v62  ;;  %6275 = vmatpush3.bf16.msra.mxu1 %v6968_v36 }
 0x561   : > { %7162 = vtanh.f32 %v5145_v11  ;;  %6258 = vmatprep.mubr.msk.bf16.mxu0 %vm7257_vm10, %v7256_v39  ;;  %6276 = vmatprep.subr.bf16.mxu1 %v7256_v39 }
 0x563   : > { %v7159_v3 = vpop.eup %7158 }
 0x564   : > { %6277 = vmatpush3.bf16.msra.mxu1 %v5441_v50  ;;  %v6174_v50 = vld [vmem:[%s9501_s11] ss:$0 sm:$0xff] }
 0x565   : > { %v7161_v38 = vpop.eup %7160 }
 0x566   : > { %v5164_v45 = vpack.c.bf16 %v7161_v38, %v7159_v3 }
 0x568   : > { %6259 = vmatmul.mubr.msk.bf16.gmra.mrb[76].mxu0 %vm5233_vm11, %v5164_v45 }
 0x569   : > { %6262 = vmatprep.mubr.msk.bf16.mxu0 %vm7257_vm10, %v7256_v39 }
 0x56b   : > { %v7163_v26 = vpop.eup %7162 }
 0x56c   : > { %v5165_v63 = vpack.c.bf16 %v7163_v26, %v7163_v26 }
 0x570   : > { %6263 = vmatmul.mubr.msk.bf16.gmra.mrb[80].mxu0 %vm5233_vm11, %v5165_v63 }
 0x613   : > { %v5292_v25 = vpop.f32.mrb[56].mxu0 }
 0x614   : > { %v5293_v35 = vadd.f32 %v9391_v4, %v5292_v25  ;;  %v6240_v14 = vpop.f32.mrb[57].mxu0 }
 0x615   : > { %v5295_v20 = vpop.f32.mrb[58].mxu0 }
 0x616   : > { %v5296_v59 = vadd.f32 %v9391_v4, %v5295_v20  ;;  %v6241_v57 = vpop.f32.mrb[59].mxu0  ;;  %7164 = vtanh.f32 %v5293_v35 }
 0x618   : > { %7166 = vtanh.f32 %v5296_v59 }
 0x61b   : > { %v5300_v22 = vpop.f32.mrb[60].mxu0 }
 0x61c   : > { %v5301_v5 = vadd.f32 %v9391_v4, %v5300_v22  ;;  %v6244_v34 = vpop.f32.mrb[61].mxu0 }
 0x61d   : > { %v5303_v56 = vpop.f32.mrb[62].mxu0 }
 0x61e   : > { %v5304_v55 = vadd.f32 %v9391_v4, %v5303_v56  ;;  %v6245_v12 = vpop.f32.mrb[63].mxu0  ;;  %7168 = vtanh.f32 %v5301_v5 }
 0x620   : > { %7170 = vtanh.f32 %v5304_v55  ;;  %v7165_v1 = vpop.eup %7164 }
 0x622   : > { %v7167_v53 = vpop.eup %7166 }
 0x623   : > { %v5359_v49 = vpack.c.bf16 %v7167_v53, %v7165_v1  ;;  %v5308_v41 = vpop.f32.mrb[64].mxu0 }
 0x624   : > { %v5309_v9 = vadd.f32 %v9391_v4, %v5308_v41  ;;  %v6248_v44 = vpop.f32.mrb[65].mxu0 }
 0x625   : > { %v5311_v43 = vpop.f32.mrb[66].mxu0  ;;  %6279 = vmatmul.mubr.msk.bf16.vlgmr.msra.gmra.mrb[168].mxu1 %vm5417_vm13, %v5359_v49 }
 0x626   : > { %v5312_v58 = vadd.f32 %v9391_v4, %v5311_v43  ;;  %v6249_v15 = vpop.f32.mrb[67].mxu0  ;;  %6282 = vmatprep.mubr.msk.bf16.mxu1 %vm7257_vm10, %v7256_v39  ;;  %7172 = vtanh.f32 %v5309_v9 }
 0x628   : > { %7174 = vtanh.f32 %v5312_v58  ;;  %v7169_v17 = vpop.eup %7168 }
 0x62a   : > { %v7171_v37 = vpop.eup %7170 }
 0x62b   : > { %v5316_v2 = vpop.f32.mrb[68].mxu0  ;;  %v5360_v40 = vpack.c.bf16 %v7171_v37, %v7169_v17 }
 0x62c   : > { %v5317_v18 = vadd.f32 %v9391_v4, %v5316_v2  ;;  %v6252_v46 = vpop.f32.mrb[69].mxu0 }
 0x62d   : > { %v5319_v42 = vpop.f32.mrb[70].mxu0  ;;  %6283 = vmatmul.mubr.msk.bf16.gmra.mrb[172].mxu1 %vm5417_vm13, %v5360_v40 }
 0x62e   : > { %v5320_v61 = vadd.f32 %v9391_v4, %v5319_v42  ;;  %v6253_v31 = vpop.f32.mrb[71].mxu0  ;;  %6286 = vmatprep.mubr.msk.bf16.mxu1 %vm7257_vm10, %v7256_v39  ;;  %7176 = vtanh.f32 %v5317_v18 }
 0x630   : > { %7178 = vtanh.f32 %v5320_v61  ;;  %v7173_v48 = vpop.eup %7172 }
 0x632   : > { %v7175_v0 = vpop.eup %7174 }
 0x633   : > { %v5324_v33 = vpop.f32.mrb[72].mxu0  ;;  %v5361_v10 = vpack.c.bf16 %v7175_v0, %v7173_v48 }
 0x634   : > { %v5325_v16 = vadd.f32 %v9391_v4, %v5324_v33  ;;  %v6256_v52 = vpop.f32.mrb[73].mxu0 }
 0x635   : > { %v5327_v27 = vpop.f32.mrb[74].mxu0  ;;  %6287 = vmatmul.mubr.msk.bf16.gmra.mrb[176].mxu1 %vm5417_vm13, %v5361_v10 }
 0x636   : > { %v5328_v29 = vadd.f32 %v9391_v4, %v5327_v27  ;;  %v6257_v28 = vpop.f32.mrb[75].mxu0  ;;  %6290 = vmatprep.mubr.msk.bf16.mxu1 %vm7257_vm10, %v7256_v39  ;;  %7180 = vtanh.f32 %v5325_v16 }
 0x638   : > { %7182 = vtanh.f32 %v5328_v29  ;;  %v7177_v7 = vpop.eup %7176 }
 0x63a   : > { %v7179_v6 = vpop.eup %7178 }
 0x63b   : > { %v5332_v30 = vpop.f32.mrb[76].mxu0  ;;  %v5362_v21 = vpack.c.bf16 %v7179_v6, %v7177_v7 }
 0x63c   : > { %v5333_v60 = vadd.f32 %v9391_v4, %v5332_v30  ;;  %v6260_v8 = vpop.f32.mrb[77].mxu0 }
 0x63d   : > { %v5335_v13 = vpop.f32.mrb[78].mxu0  ;;  %6291 = vmatmul.mubr.msk.bf16.gmra.mrb[180].mxu1 %vm5417_vm13, %v5362_v21 }
 0x63e   : > { %v5336_v47 = vadd.f32 %v9391_v4, %v5335_v13  ;;  %v6261_v24 = vpop.f32.mrb[79].mxu0  ;;  %6294 = vmatprep.mubr.msk.bf16.mxu1 %vm7257_vm10, %v7256_v39  ;;  %7184 = vtanh.f32 %v5333_v60 }
 0x640   : > { %7186 = vtanh.f32 %v5336_v47  ;;  %v7181_v19 = vpop.eup %7180 }
 0x642   : > { %v7183_v32 = vpop.eup %7182 }
 0x643   : > { %v5340_v23 = vpop.f32.mrb[80].mxu0  ;;  %v5363_v62 = vpack.c.bf16 %v7183_v32, %v7181_v19 }
 0x644   : > { %v5341_v11 = vadd.f32 %v9391_v4, %v5340_v23  ;;  %v6264_v51 = vpop.f32.mrb[81].mxu0 }
 0x645   : > { %v5343_v3 = vpop.f32.mrb[82].mxu0  ;;  %6295 = vmatmul.mubr.msk.bf16.gmra.mrb[184].mxu1 %vm5417_vm13, %v5363_v62 }
 0x646   : > { %7188 = vtanh.f32 %v5341_v11  ;;  %v6265_v38 = vpop.f32.mrb[83].mxu0  ;;  %6298 = vmatprep.mubr.msk.bf16.mxu1 %vm7257_vm10, %v7256_v39 }
 0x648   : > { %v7185_v45 = vpop.eup %7184 }
 0x64a   : > { %v7187_v26 = vpop.eup %7186 }
 0x64b   : > { %v5364_v63 = vpack.c.bf16 %v7187_v26, %v7185_v45 }
 0x64d   : > { %6299 = vmatmul.mubr.msk.bf16.gmra.mrb[188].mxu1 %vm5417_vm13, %v5364_v63 }
 0x64e   : > { %6302 = vmatprep.mubr.msk.bf16.mxu1 %vm7257_vm10, %v7256_v39 }
 0x650   : > { %v7189_v36 = vpop.eup %7188 }
 0x651   : > { %v5365_v54 = vpack.c.bf16 %v7189_v36, %v7189_v36 }
 0x655   : > { %6303 = vmatmul.mubr.msk.bf16.gmra.mrb[192].mxu1 %vm5417_vm13, %v5365_v54 }
 0x6f8   : > { %v5477_v4 = vpop.f32.mrb[168].mxu1 }
 0x6f9   : > { %v5478_v25 = vadd.f32 %v6174_v50, %v5477_v4  ;;  %v6280_v35 = vpop.f32.mrb[169].mxu1 }
 0x6fa   : > { %v5480_v14 = vpop.f32.mrb[170].mxu1 }
 0x6fb   : > { %5526 = vst [vmem:[%s9431_s23] sm:$0x1] %v5478_v25  ;;  %v5481_v39 = vadd.f32 %v6174_v50, %v5480_v14  ;;  %v6281_v20 = vpop.f32.mrb[171].mxu1 }
 0x6fd   : > { %5527 = vst [vmem:[%s9431_s23 - $0x5] sm:$0x40] %v5481_v39 }
 0x700   : > { %v5485_v59 = vpop.f32.mrb[172].mxu1 }
 0x701   : > { %v6284_v57 = vpop.f32.mrb[173].mxu1 }
 0x702   : > { %v5487_v22 = vpop.f32.mrb[174].mxu1 }
 0x703   : > { %v5488_v5 = vadd.f32 %v6174_v50, %v5487_v22  ;;  %v6285_v34 = vpop.f32.mrb[175].mxu1 }
 0x705   : > { %5528 = vst [vmem:[%s9431_s23 - $0x2] sm:$0x10] %v5488_v5 }
 0x708   : > { %v5492_v56 = vpop.f32.mrb[176].mxu1 }
 0x709   : > { %v6288_v55 = vpop.f32.mrb[177].mxu1 }
 0x70a   : > { %v5494_v12 = vpop.f32.mrb[178].mxu1 }
 0x70b   : > { %v5495_v1 = vadd.f32 %v6174_v50, %v5494_v12  ;;  %v6289_v53 = vpop.f32.mrb[179].mxu1 }
 0x70d   : > { %5529 = vst [vmem:[%s9431_s23 + $0x1] sm:$0x4] %v5495_v1 }
 0x710   : > { %v5499_v49 = vpop.f32.mrb[180].mxu1 }
 0x711   : > { %v6292_v41 = vpop.f32.mrb[181].mxu1 }
 0x712   : > { %v5501_v9 = vpop.f32.mrb[182].mxu1 }
 0x713   : > { %v5502_v44 = vadd.f32 %v6174_v50, %v5501_v9  ;;  %v6293_v43 = vpop.f32.mrb[183].mxu1 }
 0x715   : > { %5530 = vst [vmem:[%s9431_s23 + $0x4] sm:$0x1] %v5502_v44 }
 0x718   : > { %v5506_v58 = vpop.f32.mrb[184].mxu1 }
 0x719   : > { %v5507_v15 = vadd.f32 %v6174_v50, %v5506_v58  ;;  %v6296_v17 = vpop.f32.mrb[185].mxu1 }
 0x71a   : > { %v5509_v37 = vpop.f32.mrb[186].mxu1 }
 0x71b   : > { %5531 = vst [vmem:[%s9431_s23 - $0x1] sm:$0x40] %v5507_v15  ;;  %v6297_v2 = vpop.f32.mrb[187].mxu1 }
 0x720   : > { %v5513_v40 = vpop.f32.mrb[188].mxu1 }
 0x721   : > { %v5514_v18 = vadd.f32 %v6174_v50, %v5513_v40  ;;  %v6300_v46 = vpop.f32.mrb[189].mxu1 }
 0x722   : > { %v5516_v42 = vpop.f32.mrb[190].mxu1 }
 0x723   : > { %5532 = vst [vmem:[%s9431_s23 + $0x2] sm:$0x10] %v5514_v18  ;;  %v6301_v61 = vpop.f32.mrb[191].mxu1 }
 0x728   : > { %v5520_v31 = vpop.f32.mrb[192].mxu1 }
 0x729   : > { %v5521_v48 = vadd.f32 %v6174_v50, %v5520_v31  ;;  %v6304_v0 = vpop.f32.mrb[193].mxu1 }
 0x72a   : > { %v5523_v33 = vpop.f32.mrb[194].mxu1 }
 0x72b   : > { %5533 = vst [vmem:[%s9431_s23 + $0x5] sm:$0x4] %v5521_v48  ;;  %v6305_v10 = vpop.f32.mrb[195].mxu1 }
 0x72c   : > { %7204 = shalt.err (!%p7201_p3)
}
 0x72d   : > { %s7205_s29 = scalar_lea.hbm %s9445_s30, 128  ;;  %s7209_s19 = scalar_lea.hbm %s9502_s12, 256 }
 0x72e   : > { %p7206_p4 = scmp.ne.s32.totalorder %s9445_s30, %s7205_s29  ;;  %p7210_p9 = scmp.lt.u32.totalorder %s9445_s30, %s9502_s12 }
 0x72f   : > { %p7211_p10 = scmp.lt.u32.totalorder %s7209_s19, %s7205_s29  ;;  %p7213_p12 = scmp.lt.u32.totalorder %s7205_s29, %s9445_s30 }
 0x730   : > { %p7207_p7 = pnand %p7206_p4, %p7362_p5 }
 0x731   : > { %p7212_p11 = por %p7211_p10, %p7210_p9 }
 0x732   : > { %p7208_p8 = pneg %p7207_p7 }
 0x733   : > { %p7214_p13 = por %p7213_p12, %p7212_p11 }
 0x735   : > { %p7215_p0 = pnand %p7214_p13, %p7208_p8 }
 0x737   : > { %7218 = shalt.err (!%p7215_p0)
}
 0x738   : > { %6530 = dma.vmem_to_hbm [thread:$0]  (%p7362_p5), %s9447_s18, 128, %s9445_s30, %s5535_s28  }
 0x739 PF: > { %p6536_p1 = scmp.ge.s32.totalorder %s7253_s24, 2  ;;  %s5560_s25 = sand.u32 1, %s7241_s21  }
 0x73a   : > { %s5561_s26 = scalar_lea.sflag [#allocation5], %s5560_s25 }
 0x73b   : > { %p6533_p2 = pnand %p6536_p1, %p7366_p6 }
 0x73d   : > { %7236 = dma.done.wait (!%p6533_p2), %s5561_s26, 128  }
 0x73e   : > { %7238 = vsyncadd (!%p6533_p2), %s5561_s26, 4294967168  ;;  %s9534_s17 = sld [smem:[#allocation7_spill]]  ;;  %s9535_s23 = sld [smem:[#allocation8_spill]] }
 0x73f   : > { %p22_p3 = scmp.ge.s32.totalorder %s7349_s27, 4   ;;  %s9536_s21 = smov %s7245_s22 }
 0x740   : > { %s9538_s24 = smov %s7349_s27 }
 0x741   :  { %24 = sbr.rel (!%p22_p3) target bundleno = 3 (0x3), region = 114 }
 0x744   : > { %s9537_s22 = smov %s9534_s17 }
 0x748   :  { %5566 = vsyncpa [#allocation5], 1 }
 0x749   :  { %5568 = vsyncpa [#allocation5 + $0x1], 1 }

</bundles_post_ra>
